<compile_context>
chip_gen: v7x
topology: tpu7x:2x2x1
jax: 0.10.0
libtpu: 0.0.40
codegen_flags: <defaults>
</compile_context>

<pallas_src>
import math
import random

import jax
import jax.numpy as jnp
from jax.experimental import pallas as pl
from jax.experimental.pallas import tpu as pltpu

# ---- small, forward-consistent shapes -------------------------------------
S, T, B = 10, 8, 2              # src len, trg len, batch
INPUT_DIM, OUTPUT_DIM = 20, 24  # src / trg vocab sizes
EMB = 16                        # embedding dim
HE = 32                         # encoder hidden (per direction)
HD = 32                         # decoder hidden

F32 = jnp.float32
BF16 = jnp.bfloat16


def _gru_gates(gi, gh, H):
    """PyTorch GRU cell given gi = x@W_ih + b_ih, gh = h@W_hh + b_hh (f32)."""
    r = jax.nn.sigmoid(gi[:, 0:H] + gh[:, 0:H])
    z = jax.nn.sigmoid(gi[:, H:2 * H] + gh[:, H:2 * H])
    n = jnp.tanh(gi[:, 2 * H:3 * H] + r * gh[:, 2 * H:3 * H])
    return n, z


def make_kernel(tf_flags):
    tf_flags = tuple(bool(f) for f in tf_flags)   # static, one per decode step

    def kernel(src_ref, trg_ref, dec_emb_ref, mask_ref,
               ewi, ebi, whh, bhf_ref, bhb_ref,    # encoder GRU (fused fwd|bwd)
               fcw, fcb,                           # encoder fc: [h_f;h_b] -> HD
               awe, ab, av,                        # attention (enc proj, bias, v)
               whid, dbi, dbh,                     # fused hidden W = [awh | dwh]
               wxin, owh, ob,                      # fused [gi | fc_out-partial], owh
               out_ref):                           # (T*B, OUTPUT_DIM)
        f32 = F32

        # ---------------- Encoder: bidirectional GRU ----------------------
        # Input-side projections for every timestep, both directions, one dot.
        src_bf = src_ref[...]                                          # (S*B, EMB) bf16
        gi_all = jnp.dot(src_bf, ewi[...], preferred_element_type=f32) + ebi[...]

        whh_v = whh[...]                                               # (2*HE, 6*HE) block-diag
        bhf = jnp.broadcast_to(bhf_ref[...], (B, 3 * HE))              # hoisted broadcasts
        bhb = jnp.broadcast_to(bhb_ref[...], (B, 3 * HE))

        h_f = jnp.zeros((B, HE), f32)
        h_b = jnp.zeros((B, HE), f32)
        enc_f_states = [None] * S
        enc_b_states = [None] * S
        # Interleaved fwd/bwd recurrence: one fused h@W_hh push per step.
        for i in range(S):
            tf_i = i
            tb_i = S - 1 - i
            h_cat = jnp.concatenate([h_f, h_b], axis=1).astype(BF16)   # (B, 2*HE)
            gh_cat = jnp.dot(h_cat, whh_v, preferred_element_type=f32) # (B, 6*HE)
            gh_f = gh_cat[:, :3 * HE] + bhf
            gh_b = gh_cat[:, 3 * HE:] + bhb
            gi_f = gi_all[tf_i * B:(tf_i + 1) * B, :3 * HE]
            gi_b = gi_all[tb_i * B:(tb_i + 1) * B, 3 * HE:]
            n_f, z_f = _gru_gates(gi_f, gh_f, HE)
            h_f = (1.0 - z_f) * n_f + z_f * h_f
            n_b, z_b = _gru_gates(gi_b, gh_b, HE)
            h_b = (1.0 - z_b) * n_b + z_b * h_b
            enc_f_states[tf_i] = h_f
            enc_b_states[tb_i] = h_b

        # hidden = tanh(fc(cat(h_fwd_last, h_bwd_last)))   (single fused dot)
        hfb = jnp.concatenate([h_f, h_b], axis=1).astype(BF16)         # (B, 2*HE)
        hidden = jnp.tanh(
            jnp.dot(hfb, fcw[...], preferred_element_type=f32) + fcb[...])   # (B, HD)

        # Flat encoder outputs (register-accumulated, one concatenate).
        enc_f = jnp.concatenate(enc_f_states, axis=0)                  # (S*B, HE)
        enc_b = jnp.concatenate(enc_b_states, axis=0)                  # (S*B, HE)
        enc_flat = jnp.concatenate([enc_f, enc_b], axis=1)             # (S*B, 2*HE)

        # Step-invariant attention pre-projection and pooled-dot operand.
        enc_proj = (jnp.dot(enc_flat.astype(BF16), awe[...],
                            preferred_element_type=f32) + ab[...])     # (S*B, HD)
        enc_flat_aug = jnp.concatenate(
            [enc_flat, jnp.ones((S * B, 1), f32)], axis=1)             # (S*B, 2*HE+1)

        # ---------------- Decoder with Bahdanau attention ------------------
        mask = mask_ref[...]                   # (B, S*B) bf16, mask[b, s*B+b'] = (b'==b)
        whid_v = whid[...]                     # (HD, 4*HD) = [awh | dwh]
        av_v = av[...]                         # (1, HD)
        av_b = jnp.broadcast_to(av_v, (S * B, HD))
        av_l1 = jnp.sum(jnp.abs(av_v), axis=-1, keepdims=True)         # (1,1) softmax shift
        wxin_v = wxin[...]                     # (EMB+2*HE, 3*HD + OUTPUT_DIM)
        owh_v = owh[...]
        dbi_b = jnp.broadcast_to(dbi[...], (B, 3 * HD))
        dbh_b = jnp.broadcast_to(dbh[...], (B, 3 * HD))
        ob_b = jnp.broadcast_to(ob[...], (B, OUTPUT_DIM))
        dec_emb_v = dec_emb_ref[...]                                   # (Vout, EMB) bf16
        iota_v = jax.lax.broadcasted_iota(jnp.int32, (B, OUTPUT_DIM), 1)

        inp_emb = trg_ref[0]                   # embedded <sos> tokens (B, EMB) f32
        zero_row = jnp.zeros((B, OUTPUT_DIM), f32)
        preds = []

        for t in range(1, T):
            # one fused dot gives the attention hidden-projection and gh
            hh = jnp.dot(hidden.astype(BF16), whid_v,
                         preferred_element_type=f32)                   # (B, 4*HD)
            hp = hh[:, :HD]                                            # (B, HD)
            gh = hh[:, HD:] + dbh_b                                    # (B, 3*HD)

            # attention (flat layout, reductions off the MXU where degenerate)
            hid_tile = jnp.concatenate([hp] * S, axis=0)               # (S*B, HD) replication
            energy = jnp.tanh(enc_proj + hid_tile)                     # (S*B, HD)
            sc = jnp.sum(energy * av_b, axis=-1, keepdims=True)        # (S*B, 1) VPU/XLU
            e = jnp.exp(sc - av_l1)                                    # constant shift, exact softmax
            pooled = jnp.dot(mask, (e * enc_flat_aug).astype(BF16),
                             preferred_element_type=f32)               # (B, 2*HE+1)
            weighted = (pooled[:, :2 * HE]
                        * pl.reciprocal(pooled[:, 2 * HE:], approx=True))  # (B, 2*HE)

            # GRU step + fc_out partial fused into one dot on [embedded ; weighted]
            xcat = jnp.concatenate([inp_emb, weighted], axis=1).astype(BF16)  # (B, EMB+2*HE)
            big = jnp.dot(xcat, wxin_v, preferred_element_type=f32)    # (B, 3*HD+Vout)
            gi = big[:, :3 * HD] + dbi_b
            pred_partial = big[:, 3 * HD:]
            n, z = _gru_gates(gi, gh, HD)
            hidden = (1.0 - z) * n + z * hidden

            # prediction = fc_out([hidden ; weighted ; embedded])
            pred = (jnp.dot(hidden.astype(BF16), owh_v,
                            preferred_element_type=f32) + pred_partial + ob_b)
            preds.append(pred)

            # next input: teacher forcing (static bool) vs greedy argmax
            if t + 1 < T:
                if tf_flags[t - 1]:
                    inp_emb = trg_ref[t]
                else:
                    mx = jnp.max(pred, axis=1, keepdims=True)
                    idx = jnp.min(jnp.where(pred == mx, iota_v, OUTPUT_DIM),
                                  axis=1, keepdims=True)               # first argmax
                    one_hot = (iota_v == idx).astype(BF16)             # (B, Vout)
                    inp_emb = jnp.dot(one_hot, dec_emb_v,
                                      preferred_element_type=f32)      # embed(top1)

        # single output store: outputs[0] stays zero, rows 1..T-1 are preds
        out_ref[...] = jnp.concatenate([zero_row] + preds, axis=0)     # (T*B, Vout)

    return kernel


def init_params(key):
    ks = iter(jax.random.split(key, 32))

    def u(shape, fan):
        k = 1.0 / math.sqrt(fan)
        return jax.random.uniform(next(ks), shape, F32, -k, k)

    p = {}
    p["enc_emb"] = 0.1 * jax.random.normal(next(ks), (INPUT_DIM, EMB), F32)
    p["dec_emb"] = 0.1 * jax.random.normal(next(ks), (OUTPUT_DIM, EMB), F32)
    # encoder bidirectional GRU
    p["ewif"] = u((EMB, 3 * HE), HE); p["ewhf"] = u((HE, 3 * HE), HE)
    p["ebif"] = u((1, 3 * HE), HE);   p["ebhf"] = u((1, 3 * HE), HE)
    p["ewib"] = u((EMB, 3 * HE), HE); p["ewhb"] = u((HE, 3 * HE), HE)
    p["ebib"] = u((1, 3 * HE), HE);   p["ebhb"] = u((1, 3 * HE), HE)
    # encoder fc (2*HE -> HD), split by input half
    p["fcwf"] = u((HE, HD), 2 * HE); p["fcwb"] = u((HE, HD), 2 * HE)
    p["fcb"] = u((1, HD), 2 * HE)
    # attention: Linear(HD + 2*HE -> HD) split, plus v
    p["awh"] = u((HD, HD), HD + 2 * HE); p["awe"] = u((2 * HE, HD), HD + 2 * HE)
    p["ab"] = u((1, HD), HD + 2 * HE);   p["av"] = u((1, HD), HD)
    # decoder GRU, input = [emb ; weighted]
    p["dwie"] = u((EMB, 3 * HD), HD); p["dwiw"] = u((2 * HE, 3 * HD), HD)
    p["dwh"] = u((HD, 3 * HD), HD)
    p["dbi"] = u((1, 3 * HD), HD);    p["dbh"] = u((1, 3 * HD), HD)
    # fc_out, input = [hidden ; weighted ; emb]
    fan_o = HD + 2 * HE + EMB
    p["owh"] = u((HD, OUTPUT_DIM), fan_o); p["oww"] = u((2 * HE, OUTPUT_DIM), fan_o)
    p["owe"] = u((EMB, OUTPUT_DIM), fan_o); p["ob"] = u((1, OUTPUT_DIM), fan_o)
    return p


def seq2seq_forward(src, trg, params, teacher_forcing_ratio=0.5, seed=0):
    # host-side glue: embedding gathers, weight fusion, bf16 casts, mask.
    src_emb = params["enc_emb"][src]                       # (S, B, EMB)
    trg_emb = params["dec_emb"][trg]                       # (T, B, EMB) f32
    src_flat = src_emb.reshape(S * B, EMB).astype(BF16)    # flat time-major

    # fused encoder input weight (fwd|bwd) and block-diagonal hidden weight
    ewi = jnp.concatenate([params["ewif"], params["ewib"]], axis=1).astype(BF16)  # (EMB, 6*HE)
    ebi = jnp.concatenate([params["ebif"], params["ebib"]], axis=1)               # (1, 6*HE)
    whh = jnp.zeros((2 * HE, 6 * HE), F32)
    whh = whh.at[:HE, :3 * HE].set(params["ewhf"])
    whh = whh.at[HE:, 3 * HE:].set(params["ewhb"])
    whh = whh.astype(BF16)                                                        # (2*HE, 6*HE)
    fcw = jnp.concatenate([params["fcwf"], params["fcwb"]], axis=0).astype(BF16)  # (2*HE, HD)

    # fused decoder weights: hidden -> [hp | gh], and xcat -> [gi | fc_out-partial]
    whid = jnp.concatenate([params["awh"], params["dwh"]], axis=1).astype(BF16)   # (HD, 4*HD)
    wxin = jnp.concatenate(
        [jnp.concatenate([params["dwie"], params["owe"]], axis=1),
         jnp.concatenate([params["dwiw"], params["oww"]], axis=1)],
        axis=0).astype(BF16)                                                      # (EMB+2*HE, 3*HD+Vout)

    # static batch-selection matrix for the flat attention layout (0/1, exact in bf16)
    col = jnp.arange(S * B)[None, :] % B
    row = jnp.arange(B)[:, None]
    mask = (col == row).astype(BF16)                       # (B, S*B)

    rng = random.Random(seed)                              # mirrors random.random()
    tf_flags = [rng.random() < teacher_forcing_ratio for _ in range(1, T)]

    inputs = (src_flat, trg_emb, params["dec_emb"].astype(BF16), mask,
              ewi, ebi, whh, params["ebhf"], params["ebhb"],
              fcw, params["fcb"],
              params["awe"].astype(BF16), params["ab"], params["av"],
              whid, params["dbi"], params["dbh"],
              wxin, params["owh"].astype(BF16), params["ob"])

    out_flat = pl.pallas_call(
        make_kernel(tf_flags),
        out_shape=jax.ShapeDtypeStruct((T * B, OUTPUT_DIM), F32),
        in_specs=[pl.BlockSpec(memory_space=pltpu.MemorySpace.VMEM)] * len(inputs),
        out_specs=pl.BlockSpec(memory_space=pltpu.MemorySpace.VMEM),
    )(*inputs)
    return out_flat.reshape(T, B, OUTPUT_DIM)


if __name__ == "__main__":
    key = jax.random.PRNGKey(0)
    pkey, skey, tkey = jax.random.split(key, 3)
    params = init_params(pkey)

    src = jax.random.randint(skey, (S, B), 0, INPUT_DIM, dtype=jnp.int32)   # (src_len, batch)
    trg = jax.random.randint(tkey, (T, B), 0, OUTPUT_DIM, dtype=jnp.int32)  # (trg_len, batch)

    out = seq2seq_forward(src, trg, params, teacher_forcing_ratio=0.5, seed=0)
    out = jax.block_until_ready(out)

    assert out.shape == (T, B, OUTPUT_DIM)
    assert bool(jnp.all(jnp.isfinite(out)))
    assert bool(jnp.all(out[0] == 0.0))   # outputs[0] is never written, as in PyTorch
    print("KERNEL_OK")
</pallas_src>

<mosaic_0001>
module attributes {stable_mosaic.version = 11 : i64} {
  func.func @kernel(%arg0: memref<20x16xbf16, #tpu.memory_space<vmem>>, %arg1: memref<8x2x16xf32, #tpu.memory_space<vmem>>, %arg2: memref<24x16xbf16, #tpu.memory_space<vmem>>, %arg3: memref<2x20xbf16, #tpu.memory_space<vmem>>, %arg4: memref<16x192xbf16, #tpu.memory_space<vmem>>, %arg5: memref<1x192xf32, #tpu.memory_space<vmem>>, %arg6: memref<64x192xbf16, #tpu.memory_space<vmem>>, %arg7: memref<1x96xf32, #tpu.memory_space<vmem>>, %arg8: memref<1x96xf32, #tpu.memory_space<vmem>>, %arg9: memref<64x32xbf16, #tpu.memory_space<vmem>>, %arg10: memref<1x32xf32, #tpu.memory_space<vmem>>, %arg11: memref<64x32xbf16, #tpu.memory_space<vmem>>, %arg12: memref<1x32xf32, #tpu.memory_space<vmem>>, %arg13: memref<1x32xf32, #tpu.memory_space<vmem>>, %arg14: memref<32x128xbf16, #tpu.memory_space<vmem>>, %arg15: memref<1x96xf32, #tpu.memory_space<vmem>>, %arg16: memref<1x96xf32, #tpu.memory_space<vmem>>, %arg17: memref<80x120xbf16, #tpu.memory_space<vmem>>, %arg18: memref<32x24xbf16, #tpu.memory_space<vmem>>, %arg19: memref<1x24xf32, #tpu.memory_space<vmem>>, %arg20: memref<16x24xf32, #tpu.memory_space<vmem>>) attributes {dimension_semantics = [], scalar_prefetch = 0 : i64, scratch_operands = 0 : i64, tpu.core_type = #tpu.core_type<tc>} {
    %c0 = arith.constant 0 : index
    %c0_0 = arith.constant 0 : index
    %0 = vector.load %arg0[%c0, %c0_0] : memref<20x16xbf16, #tpu.memory_space<vmem>>, vector<20x16xbf16>
    %c0_1 = arith.constant 0 : index
    %c0_2 = arith.constant 0 : index
    %1 = vector.load %arg4[%c0_1, %c0_2] : memref<16x192xbf16, #tpu.memory_space<vmem>>, vector<16x192xbf16>
    %cst = arith.constant dense<0.000000e+00> : vector<20x192xf32>
    %2 = tpu.matmul %0, %1, %cst {dimension_numbers = #tpu.dot_dimension_numbers<[1], [0], [0], [1], [0, 0, 1, 1], [], []>} : vector<20x16xbf16>, vector<16x192xbf16>, vector<20x192xf32> -> vector<20x192xf32>
    %c0_3 = arith.constant 0 : index
    %c0_4 = arith.constant 0 : index
    %3 = vector.load %arg5[%c0_3, %c0_4] : memref<1x192xf32, #tpu.memory_space<vmem>>, vector<1x192xf32>
    %4 = vector.broadcast %3 : vector<1x192xf32> to vector<20x192xf32>
    %5 = arith.addf %2, %4 : vector<20x192xf32>
    %c0_5 = arith.constant 0 : index
    %c0_6 = arith.constant 0 : index
    %6 = vector.load %arg6[%c0_5, %c0_6] : memref<64x192xbf16, #tpu.memory_space<vmem>>, vector<64x192xbf16>
    %c0_7 = arith.constant 0 : index
    %c0_8 = arith.constant 0 : index
    %7 = vector.load %arg7[%c0_7, %c0_8] : memref<1x96xf32, #tpu.memory_space<vmem>>, vector<1x96xf32>
    %8 = vector.shape_cast %7 : vector<1x96xf32> to vector<1x96xf32>
    %9 = vector.broadcast %8 : vector<1x96xf32> to vector<2x96xf32>
    %c0_9 = arith.constant 0 : index
    %c0_10 = arith.constant 0 : index
    %10 = vector.load %arg8[%c0_9, %c0_10] : memref<1x96xf32, #tpu.memory_space<vmem>>, vector<1x96xf32>
    %11 = vector.shape_cast %10 : vector<1x96xf32> to vector<1x96xf32>
    %12 = vector.broadcast %11 : vector<1x96xf32> to vector<2x96xf32>
    %cst_11 = arith.constant 0.000000e+00 : f32
    %13 = vector.broadcast %cst_11 : f32 to vector<2x32xf32>
    %cst_12 = arith.constant 0.000000e+00 : f32
    %14 = vector.broadcast %cst_12 : f32 to vector<2x32xf32>
    %15 = tpu.concatenate %13, %14 in 1 : vector<2x32xf32>, vector<2x32xf32> -> vector<2x64xf32>
    %16 = arith.truncf %15 : vector<2x64xf32> to vector<2x64xbf16>
    %cst_13 = arith.constant dense<0.000000e+00> : vector<2x192xf32>
    %17 = tpu.matmul %16, %6, %cst_13 {dimension_numbers = #tpu.dot_dimension_numbers<[1], [0], [0], [1], [0, 0, 1, 1], [], []>} : vector<2x64xbf16>, vector<64x192xbf16>, vector<2x192xf32> -> vector<2x192xf32>
    %18 = vector.extract_strided_slice %17 {offsets = [0, 0], sizes = [2, 96], strides = [1, 1]} : vector<2x192xf32> to vector<2x96xf32>
    %19 = arith.addf %18, %9 : vector<2x96xf32>
    %20 = vector.extract_strided_slice %17 {offsets = [0, 96], sizes = [2, 96], strides = [1, 1]} : vector<2x192xf32> to vector<2x96xf32>
    %21 = arith.addf %20, %12 : vector<2x96xf32>
    %22 = vector.extract_strided_slice %5 {offsets = [0, 0], sizes = [2, 96], strides = [1, 1]} : vector<20x192xf32> to vector<2x96xf32>
    %23 = vector.extract_strided_slice %5 {offsets = [18, 96], sizes = [2, 96], strides = [1, 1]} : vector<20x192xf32> to vector<2x96xf32>
    %24 = vector.extract_strided_slice %22 {offsets = [0, 0], sizes = [2, 32], strides = [1, 1]} : vector<2x96xf32> to vector<2x32xf32>
    %25 = vector.extract_strided_slice %19 {offsets = [0, 0], sizes = [2, 32], strides = [1, 1]} : vector<2x96xf32> to vector<2x32xf32>
    %26 = arith.addf %24, %25 : vector<2x32xf32>
    %27 = arith.negf %26 : vector<2x32xf32>
    %28 = math.exp %27 : vector<2x32xf32>
    %cst_14 = arith.constant 1.000000e+00 : f32
    %29 = vector.broadcast %cst_14 : f32 to vector<2x32xf32>
    %30 = arith.addf %29, %28 : vector<2x32xf32>
    %31 = arith.divf %29, %30 : vector<2x32xf32>
    %32 = vector.extract_strided_slice %22 {offsets = [0, 32], sizes = [2, 32], strides = [1, 1]} : vector<2x96xf32> to vector<2x32xf32>
    %33 = vector.extract_strided_slice %19 {offsets = [0, 32], sizes = [2, 32], strides = [1, 1]} : vector<2x96xf32> to vector<2x32xf32>
    %34 = arith.addf %32, %33 : vector<2x32xf32>
    %35 = arith.negf %34 : vector<2x32xf32>
    %36 = math.exp %35 : vector<2x32xf32>
    %cst_15 = arith.constant 1.000000e+00 : f32
    %37 = vector.broadcast %cst_15 : f32 to vector<2x32xf32>
    %38 = arith.addf %37, %36 : vector<2x32xf32>
    %39 = arith.divf %37, %38 : vector<2x32xf32>
    %40 = vector.extract_strided_slice %22 {offsets = [0, 64], sizes = [2, 32], strides = [1, 1]} : vector<2x96xf32> to vector<2x32xf32>
    %41 = vector.extract_strided_slice %19 {offsets = [0, 64], sizes = [2, 32], strides = [1, 1]} : vector<2x96xf32> to vector<2x32xf32>
    %42 = arith.mulf %31, %41 : vector<2x32xf32>
    %43 = arith.addf %40, %42 : vector<2x32xf32>
    %44 = math.tanh %43 : vector<2x32xf32>
    %cst_16 = arith.constant 1.000000e+00 : f32
    %45 = vector.broadcast %cst_16 : f32 to vector<2x32xf32>
    %46 = arith.subf %45, %39 : vector<2x32xf32>
    %47 = arith.mulf %46, %44 : vector<2x32xf32>
    %48 = arith.mulf %39, %13 : vector<2x32xf32>
    %49 = arith.addf %47, %48 : vector<2x32xf32>
    %50 = vector.extract_strided_slice %23 {offsets = [0, 0], sizes = [2, 32], strides = [1, 1]} : vector<2x96xf32> to vector<2x32xf32>
    %51 = vector.extract_strided_slice %21 {offsets = [0, 0], sizes = [2, 32], strides = [1, 1]} : vector<2x96xf32> to vector<2x32xf32>
    %52 = arith.addf %50, %51 : vector<2x32xf32>
    %53 = arith.negf %52 : vector<2x32xf32>
    %54 = math.exp %53 : vector<2x32xf32>
    %cst_17 = arith.constant 1.000000e+00 : f32
    %55 = vector.broadcast %cst_17 : f32 to vector<2x32xf32>
    %56 = arith.addf %55, %54 : vector<2x32xf32>
    %57 = arith.divf %55, %56 : vector<2x32xf32>
    %58 = vector.extract_strided_slice %23 {offsets = [0, 32], sizes = [2, 32], strides = [1, 1]} : vector<2x96xf32> to vector<2x32xf32>
    %59 = vector.extract_strided_slice %21 {offsets = [0, 32], sizes = [2, 32], strides = [1, 1]} : vector<2x96xf32> to vector<2x32xf32>
    %60 = arith.addf %58, %59 : vector<2x32xf32>
    %61 = arith.negf %60 : vector<2x32xf32>
    %62 = math.exp %61 : vector<2x32xf32>
    %cst_18 = arith.constant 1.000000e+00 : f32
    %63 = vector.broadcast %cst_18 : f32 to vector<2x32xf32>
    %64 = arith.addf %63, %62 : vector<2x32xf32>
    %65 = arith.divf %63, %64 : vector<2x32xf32>
    %66 = vector.extract_strided_slice %23 {offsets = [0, 64], sizes = [2, 32], strides = [1, 1]} : vector<2x96xf32> to vector<2x32xf32>
    %67 = vector.extract_strided_slice %21 {offsets = [0, 64], sizes = [2, 32], strides = [1, 1]} : vector<2x96xf32> to vector<2x32xf32>
    %68 = arith.mulf %57, %67 : vector<2x32xf32>
    %69 = arith.addf %66, %68 : vector<2x32xf32>
    %70 = math.tanh %69 : vector<2x32xf32>
    %cst_19 = arith.constant 1.000000e+00 : f32
    %71 = vector.broadcast %cst_19 : f32 to vector<2x32xf32>
    %72 = arith.subf %71, %65 : vector<2x32xf32>
    %73 = arith.mulf %72, %70 : vector<2x32xf32>
    %74 = arith.mulf %65, %14 : vector<2x32xf32>
    %75 = arith.addf %73, %74 : vector<2x32xf32>
    %76 = tpu.concatenate %49, %75 in 1 : vector<2x32xf32>, vector<2x32xf32> -> vector<2x64xf32>
    %77 = arith.truncf %76 : vector<2x64xf32> to vector<2x64xbf16>
    %cst_20 = arith.constant dense<0.000000e+00> : vector<2x192xf32>
    %78 = tpu.matmul %77, %6, %cst_20 {dimension_numbers = #tpu.dot_dimension_numbers<[1], [0], [0], [1], [0, 0, 1, 1], [], []>} : vector<2x64xbf16>, vector<64x192xbf16>, vector<2x192xf32> -> vector<2x192xf32>
    %79 = vector.extract_strided_slice %78 {offsets = [0, 0], sizes = [2, 96], strides = [1, 1]} : vector<2x192xf32> to vector<2x96xf32>
    %80 = arith.addf %79, %9 : vector<2x96xf32>
    %81 = vector.extract_strided_slice %78 {offsets = [0, 96], sizes = [2, 96], strides = [1, 1]} : vector<2x192xf32> to vector<2x96xf32>
    %82 = arith.addf %81, %12 : vector<2x96xf32>
    %83 = vector.extract_strided_slice %5 {offsets = [2, 0], sizes = [2, 96], strides = [1, 1]} : vector<20x192xf32> to vector<2x96xf32>
    %84 = vector.extract_strided_slice %5 {offsets = [16, 96], sizes = [2, 96], strides = [1, 1]} : vector<20x192xf32> to vector<2x96xf32>
    %85 = vector.extract_strided_slice %83 {offsets = [0, 0], sizes = [2, 32], strides = [1, 1]} : vector<2x96xf32> to vector<2x32xf32>
    %86 = vector.extract_strided_slice %80 {offsets = [0, 0], sizes = [2, 32], strides = [1, 1]} : vector<2x96xf32> to vector<2x32xf32>
    %87 = arith.addf %85, %86 : vector<2x32xf32>
    %88 = arith.negf %87 : vector<2x32xf32>
    %89 = math.exp %88 : vector<2x32xf32>
    %cst_21 = arith.constant 1.000000e+00 : f32
    %90 = vector.broadcast %cst_21 : f32 to vector<2x32xf32>
    %91 = arith.addf %90, %89 : vector<2x32xf32>
    %92 = arith.divf %90, %91 : vector<2x32xf32>
    %93 = vector.extract_strided_slice %83 {offsets = [0, 32], sizes = [2, 32], strides = [1, 1]} : vector<2x96xf32> to vector<2x32xf32>
    %94 = vector.extract_strided_slice %80 {offsets = [0, 32], sizes = [2, 32], strides = [1, 1]} : vector<2x96xf32> to vector<2x32xf32>
    %95 = arith.addf %93, %94 : vector<2x32xf32>
    %96 = arith.negf %95 : vector<2x32xf32>
    %97 = math.exp %96 : vector<2x32xf32>
    %cst_22 = arith.constant 1.000000e+00 : f32
    %98 = vector.broadcast %cst_22 : f32 to vector<2x32xf32>
    %99 = arith.addf %98, %97 : vector<2x32xf32>
    %100 = arith.divf %98, %99 : vector<2x32xf32>
    %101 = vector.extract_strided_slice %83 {offsets = [0, 64], sizes = [2, 32], strides = [1, 1]} : vector<2x96xf32> to vector<2x32xf32>
    %102 = vector.extract_strided_slice %80 {offsets = [0, 64], sizes = [2, 32], strides = [1, 1]} : vector<2x96xf32> to vector<2x32xf32>
    %103 = arith.mulf %92, %102 : vector<2x32xf32>
    %104 = arith.addf %101, %103 : vector<2x32xf32>
    %105 = math.tanh %104 : vector<2x32xf32>
    %cst_23 = arith.constant 1.000000e+00 : f32
    %106 = vector.broadcast %cst_23 : f32 to vector<2x32xf32>
    %107 = arith.subf %106, %100 : vector<2x32xf32>
    %108 = arith.mulf %107, %105 : vector<2x32xf32>
    %109 = arith.mulf %100, %49 : vector<2x32xf32>
    %110 = arith.addf %108, %109 : vector<2x32xf32>
    %111 = vector.extract_strided_slice %84 {offsets = [0, 0], sizes = [2, 32], strides = [1, 1]} : vector<2x96xf32> to vector<2x32xf32>
    %112 = vector.extract_strided_slice %82 {offsets = [0, 0], sizes = [2, 32], strides = [1, 1]} : vector<2x96xf32> to vector<2x32xf32>
    %113 = arith.addf %111, %112 : vector<2x32xf32>
    %114 = arith.negf %113 : vector<2x32xf32>
    %115 = math.exp %114 : vector<2x32xf32>
    %cst_24 = arith.constant 1.000000e+00 : f32
    %116 = vector.broadcast %cst_24 : f32 to vector<2x32xf32>
    %117 = arith.addf %116, %115 : vector<2x32xf32>
    %118 = arith.divf %116, %117 : vector<2x32xf32>
    %119 = vector.extract_strided_slice %84 {offsets = [0, 32], sizes = [2, 32], strides = [1, 1]} : vector<2x96xf32> to vector<2x32xf32>
    %120 = vector.extract_strided_slice %82 {offsets = [0, 32], sizes = [2, 32], strides = [1, 1]} : vector<2x96xf32> to vector<2x32xf32>
    %121 = arith.addf %119, %120 : vector<2x32xf32>
    %122 = arith.negf %121 : vector<2x32xf32>
    %123 = math.exp %122 : vector<2x32xf32>
    %cst_25 = arith.constant 1.000000e+00 : f32
    %124 = vector.broadcast %cst_25 : f32 to vector<2x32xf32>
    %125 = arith.addf %124, %123 : vector<2x32xf32>
    %126 = arith.divf %124, %125 : vector<2x32xf32>
    %127 = vector.extract_strided_slice %84 {offsets = [0, 64], sizes = [2, 32], strides = [1, 1]} : vector<2x96xf32> to vector<2x32xf32>
    %128 = vector.extract_strided_slice %82 {offsets = [0, 64], sizes = [2, 32], strides = [1, 1]} : vector<2x96xf32> to vector<2x32xf32>
    %129 = arith.mulf %118, %128 : vector<2x32xf32>
    %130 = arith.addf %127, %129 : vector<2x32xf32>
    %131 = math.tanh %130 : vector<2x32xf32>
    %cst_26 = arith.constant 1.000000e+00 : f32
    %132 = vector.broadcast %cst_26 : f32 to vector<2x32xf32>
    %133 = arith.subf %132, %126 : vector<2x32xf32>
    %134 = arith.mulf %133, %131 : vector<2x32xf32>
    %135 = arith.mulf %126, %75 : vector<2x32xf32>
    %136 = arith.addf %134, %135 : vector<2x32xf32>
    %137 = tpu.concatenate %110, %136 in 1 : vector<2x32xf32>, vector<2x32xf32> -> vector<2x64xf32>
    %138 = arith.truncf %137 : vector<2x64xf32> to vector<2x64xbf16>
    %cst_27 = arith.constant dense<0.000000e+00> : vector<2x192xf32>
    %139 = tpu.matmul %138, %6, %cst_27 {dimension_numbers = #tpu.dot_dimension_numbers<[1], [0], [0], [1], [0, 0, 1, 1], [], []>} : vector<2x64xbf16>, vector<64x192xbf16>, vector<2x192xf32> -> vector<2x192xf32>
    %140 = vector.extract_strided_slice %139 {offsets = [0, 0], sizes = [2, 96], strides = [1, 1]} : vector<2x192xf32> to vector<2x96xf32>
    %141 = arith.addf %140, %9 : vector<2x96xf32>
    %142 = vector.extract_strided_slice %139 {offsets = [0, 96], sizes = [2, 96], strides = [1, 1]} : vector<2x192xf32> to vector<2x96xf32>
    %143 = arith.addf %142, %12 : vector<2x96xf32>
    %144 = vector.extract_strided_slice %5 {offsets = [4, 0], sizes = [2, 96], strides = [1, 1]} : vector<20x192xf32> to vector<2x96xf32>
    %145 = vector.extract_strided_slice %5 {offsets = [14, 96], sizes = [2, 96], strides = [1, 1]} : vector<20x192xf32> to vector<2x96xf32>
    %146 = vector.extract_strided_slice %144 {offsets = [0, 0], sizes = [2, 32], strides = [1, 1]} : vector<2x96xf32> to vector<2x32xf32>
    %147 = vector.extract_strided_slice %141 {offsets = [0, 0], sizes = [2, 32], strides = [1, 1]} : vector<2x96xf32> to vector<2x32xf32>
    %148 = arith.addf %146, %147 : vector<2x32xf32>
    %149 = arith.negf %148 : vector<2x32xf32>
    %150 = math.exp %149 : vector<2x32xf32>
    %cst_28 = arith.constant 1.000000e+00 : f32
    %151 = vector.broadcast %cst_28 : f32 to vector<2x32xf32>
    %152 = arith.addf %151, %150 : vector<2x32xf32>
    %153 = arith.divf %151, %152 : vector<2x32xf32>
    %154 = vector.extract_strided_slice %144 {offsets = [0, 32], sizes = [2, 32], strides = [1, 1]} : vector<2x96xf32> to vector<2x32xf32>
    %155 = vector.extract_strided_slice %141 {offsets = [0, 32], sizes = [2, 32], strides = [1, 1]} : vector<2x96xf32> to vector<2x32xf32>
    %156 = arith.addf %154, %155 : vector<2x32xf32>
    %157 = arith.negf %156 : vector<2x32xf32>
    %158 = math.exp %157 : vector<2x32xf32>
    %cst_29 = arith.constant 1.000000e+00 : f32
    %159 = vector.broadcast %cst_29 : f32 to vector<2x32xf32>
    %160 = arith.addf %159, %158 : vector<2x32xf32>
    %161 = arith.divf %159, %160 : vector<2x32xf32>
    %162 = vector.extract_strided_slice %144 {offsets = [0, 64], sizes = [2, 32], strides = [1, 1]} : vector<2x96xf32> to vector<2x32xf32>
    %163 = vector.extract_strided_slice %141 {offsets = [0, 64], sizes = [2, 32], strides = [1, 1]} : vector<2x96xf32> to vector<2x32xf32>
    %164 = arith.mulf %153, %163 : vector<2x32xf32>
    %165 = arith.addf %162, %164 : vector<2x32xf32>
    %166 = math.tanh %165 : vector<2x32xf32>
    %cst_30 = arith.constant 1.000000e+00 : f32
    %167 = vector.broadcast %cst_30 : f32 to vector<2x32xf32>
    %168 = arith.subf %167, %161 : vector<2x32xf32>
    %169 = arith.mulf %168, %166 : vector<2x32xf32>
    %170 = arith.mulf %161, %110 : vector<2x32xf32>
    %171 = arith.addf %169, %170 : vector<2x32xf32>
    %172 = vector.extract_strided_slice %145 {offsets = [0, 0], sizes = [2, 32], strides = [1, 1]} : vector<2x96xf32> to vector<2x32xf32>
    %173 = vector.extract_strided_slice %143 {offsets = [0, 0], sizes = [2, 32], strides = [1, 1]} : vector<2x96xf32> to vector<2x32xf32>
    %174 = arith.addf %172, %173 : vector<2x32xf32>
    %175 = arith.negf %174 : vector<2x32xf32>
    %176 = math.exp %175 : vector<2x32xf32>
    %cst_31 = arith.constant 1.000000e+00 : f32
    %177 = vector.broadcast %cst_31 : f32 to vector<2x32xf32>
    %178 = arith.addf %177, %176 : vector<2x32xf32>
    %179 = arith.divf %177, %178 : vector<2x32xf32>
    %180 = vector.extract_strided_slice %145 {offsets = [0, 32], sizes = [2, 32], strides = [1, 1]} : vector<2x96xf32> to vector<2x32xf32>
    %181 = vector.extract_strided_slice %143 {offsets = [0, 32], sizes = [2, 32], strides = [1, 1]} : vector<2x96xf32> to vector<2x32xf32>
    %182 = arith.addf %180, %181 : vector<2x32xf32>
    %183 = arith.negf %182 : vector<2x32xf32>
    %184 = math.exp %183 : vector<2x32xf32>
    %cst_32 = arith.constant 1.000000e+00 : f32
    %185 = vector.broadcast %cst_32 : f32 to vector<2x32xf32>
    %186 = arith.addf %185, %184 : vector<2x32xf32>
    %187 = arith.divf %185, %186 : vector<2x32xf32>
    %188 = vector.extract_strided_slice %145 {offsets = [0, 64], sizes = [2, 32], strides = [1, 1]} : vector<2x96xf32> to vector<2x32xf32>
    %189 = vector.extract_strided_slice %143 {offsets = [0, 64], sizes = [2, 32], strides = [1, 1]} : vector<2x96xf32> to vector<2x32xf32>
    %190 = arith.mulf %179, %189 : vector<2x32xf32>
    %191 = arith.addf %188, %190 : vector<2x32xf32>
    %192 = math.tanh %191 : vector<2x32xf32>
    %cst_33 = arith.constant 1.000000e+00 : f32
    %193 = vector.broadcast %cst_33 : f32 to vector<2x32xf32>
    %194 = arith.subf %193, %187 : vector<2x32xf32>
    %195 = arith.mulf %194, %192 : vector<2x32xf32>
    %196 = arith.mulf %187, %136 : vector<2x32xf32>
    %197 = arith.addf %195, %196 : vector<2x32xf32>
    %198 = tpu.concatenate %171, %197 in 1 : vector<2x32xf32>, vector<2x32xf32> -> vector<2x64xf32>
    %199 = arith.truncf %198 : vector<2x64xf32> to vector<2x64xbf16>
    %cst_34 = arith.constant dense<0.000000e+00> : vector<2x192xf32>
    %200 = tpu.matmul %199, %6, %cst_34 {dimension_numbers = #tpu.dot_dimension_numbers<[1], [0], [0], [1], [0, 0, 1, 1], [], []>} : vector<2x64xbf16>, vector<64x192xbf16>, vector<2x192xf32> -> vector<2x192xf32>
    %201 = vector.extract_strided_slice %200 {offsets = [0, 0], sizes = [2, 96], strides = [1, 1]} : vector<2x192xf32> to vector<2x96xf32>
    %202 = arith.addf %201, %9 : vector<2x96xf32>
    %203 = vector.extract_strided_slice %200 {offsets = [0, 96], sizes = [2, 96], strides = [1, 1]} : vector<2x192xf32> to vector<2x96xf32>
    %204 = arith.addf %203, %12 : vector<2x96xf32>
    %205 = vector.extract_strided_slice %5 {offsets = [6, 0], sizes = [2, 96], strides = [1, 1]} : vector<20x192xf32> to vector<2x96xf32>
    %206 = vector.extract_strided_slice %5 {offsets = [12, 96], sizes = [2, 96], strides = [1, 1]} : vector<20x192xf32> to vector<2x96xf32>
    %207 = vector.extract_strided_slice %205 {offsets = [0, 0], sizes = [2, 32], strides = [1, 1]} : vector<2x96xf32> to vector<2x32xf32>
    %208 = vector.extract_strided_slice %202 {offsets = [0, 0], sizes = [2, 32], strides = [1, 1]} : vector<2x96xf32> to vector<2x32xf32>
    %209 = arith.addf %207, %208 : vector<2x32xf32>
    %210 = arith.negf %209 : vector<2x32xf32>
    %211 = math.exp %210 : vector<2x32xf32>
    %cst_35 = arith.constant 1.000000e+00 : f32
    %212 = vector.broadcast %cst_35 : f32 to vector<2x32xf32>
    %213 = arith.addf %212, %211 : vector<2x32xf32>
    %214 = arith.divf %212, %213 : vector<2x32xf32>
    %215 = vector.extract_strided_slice %205 {offsets = [0, 32], sizes = [2, 32], strides = [1, 1]} : vector<2x96xf32> to vector<2x32xf32>
    %216 = vector.extract_strided_slice %202 {offsets = [0, 32], sizes = [2, 32], strides = [1, 1]} : vector<2x96xf32> to vector<2x32xf32>
    %217 = arith.addf %215, %216 : vector<2x32xf32>
    %218 = arith.negf %217 : vector<2x32xf32>
    %219 = math.exp %218 : vector<2x32xf32>
    %cst_36 = arith.constant 1.000000e+00 : f32
    %220 = vector.broadcast %cst_36 : f32 to vector<2x32xf32>
    %221 = arith.addf %220, %219 : vector<2x32xf32>
    %222 = arith.divf %220, %221 : vector<2x32xf32>
    %223 = vector.extract_strided_slice %205 {offsets = [0, 64], sizes = [2, 32], strides = [1, 1]} : vector<2x96xf32> to vector<2x32xf32>
    %224 = vector.extract_strided_slice %202 {offsets = [0, 64], sizes = [2, 32], strides = [1, 1]} : vector<2x96xf32> to vector<2x32xf32>
    %225 = arith.mulf %214, %224 : vector<2x32xf32>
    %226 = arith.addf %223, %225 : vector<2x32xf32>
    %227 = math.tanh %226 : vector<2x32xf32>
    %cst_37 = arith.constant 1.000000e+00 : f32
    %228 = vector.broadcast %cst_37 : f32 to vector<2x32xf32>
    %229 = arith.subf %228, %222 : vector<2x32xf32>
    %230 = arith.mulf %229, %227 : vector<2x32xf32>
    %231 = arith.mulf %222, %171 : vector<2x32xf32>
    %232 = arith.addf %230, %231 : vector<2x32xf32>
    %233 = vector.extract_strided_slice %206 {offsets = [0, 0], sizes = [2, 32], strides = [1, 1]} : vector<2x96xf32> to vector<2x32xf32>
    %234 = vector.extract_strided_slice %204 {offsets = [0, 0], sizes = [2, 32], strides = [1, 1]} : vector<2x96xf32> to vector<2x32xf32>
    %235 = arith.addf %233, %234 : vector<2x32xf32>
    %236 = arith.negf %235 : vector<2x32xf32>
    %237 = math.exp %236 : vector<2x32xf32>
    %cst_38 = arith.constant 1.000000e+00 : f32
    %238 = vector.broadcast %cst_38 : f32 to vector<2x32xf32>
    %239 = arith.addf %238, %237 : vector<2x32xf32>
    %240 = arith.divf %238, %239 : vector<2x32xf32>
    %241 = vector.extract_strided_slice %206 {offsets = [0, 32], sizes = [2, 32], strides = [1, 1]} : vector<2x96xf32> to vector<2x32xf32>
    %242 = vector.extract_strided_slice %204 {offsets = [0, 32], sizes = [2, 32], strides = [1, 1]} : vector<2x96xf32> to vector<2x32xf32>
    %243 = arith.addf %241, %242 : vector<2x32xf32>
    %244 = arith.negf %243 : vector<2x32xf32>
    %245 = math.exp %244 : vector<2x32xf32>
    %cst_39 = arith.constant 1.000000e+00 : f32
    %246 = vector.broadcast %cst_39 : f32 to vector<2x32xf32>
    %247 = arith.addf %246, %245 : vector<2x32xf32>
    %248 = arith.divf %246, %247 : vector<2x32xf32>
    %249 = vector.extract_strided_slice %206 {offsets = [0, 64], sizes = [2, 32], strides = [1, 1]} : vector<2x96xf32> to vector<2x32xf32>
    %250 = vector.extract_strided_slice %204 {offsets = [0, 64], sizes = [2, 32], strides = [1, 1]} : vector<2x96xf32> to vector<2x32xf32>
    %251 = arith.mulf %240, %250 : vector<2x32xf32>
    %252 = arith.addf %249, %251 : vector<2x32xf32>
    %253 = math.tanh %252 : vector<2x32xf32>
    %cst_40 = arith.constant 1.000000e+00 : f32
    %254 = vector.broadcast %cst_40 : f32 to vector<2x32xf32>
    %255 = arith.subf %254, %248 : vector<2x32xf32>
    %256 = arith.mulf %255, %253 : vector<2x32xf32>
    %257 = arith.mulf %248, %197 : vector<2x32xf32>
    %258 = arith.addf %256, %257 : vector<2x32xf32>
    %259 = tpu.concatenate %232, %258 in 1 : vector<2x32xf32>, vector<2x32xf32> -> vector<2x64xf32>
    %260 = arith.truncf %259 : vector<2x64xf32> to vector<2x64xbf16>
    %cst_41 = arith.constant dense<0.000000e+00> : vector<2x192xf32>
    %261 = tpu.matmul %260, %6, %cst_41 {dimension_numbers = #tpu.dot_dimension_numbers<[1], [0], [0], [1], [0, 0, 1, 1], [], []>} : vector<2x64xbf16>, vector<64x192xbf16>, vector<2x192xf32> -> vector<2x192xf32>
    %262 = vector.extract_strided_slice %261 {offsets = [0, 0], sizes = [2, 96], strides = [1, 1]} : vector<2x192xf32> to vector<2x96xf32>
    %263 = arith.addf %262, %9 : vector<2x96xf32>
    %264 = vector.extract_strided_slice %261 {offsets = [0, 96], sizes = [2, 96], strides = [1, 1]} : vector<2x192xf32> to vector<2x96xf32>
    %265 = arith.addf %264, %12 : vector<2x96xf32>
    %266 = vector.extract_strided_slice %5 {offsets = [8, 0], sizes = [2, 96], strides = [1, 1]} : vector<20x192xf32> to vector<2x96xf32>
    %267 = vector.extract_strided_slice %5 {offsets = [10, 96], sizes = [2, 96], strides = [1, 1]} : vector<20x192xf32> to vector<2x96xf32>
    %268 = vector.extract_strided_slice %266 {offsets = [0, 0], sizes = [2, 32], strides = [1, 1]} : vector<2x96xf32> to vector<2x32xf32>
    %269 = vector.extract_strided_slice %263 {offsets = [0, 0], sizes = [2, 32], strides = [1, 1]} : vector<2x96xf32> to vector<2x32xf32>
    %270 = arith.addf %268, %269 : vector<2x32xf32>
    %271 = arith.negf %270 : vector<2x32xf32>
    %272 = math.exp %271 : vector<2x32xf32>
    %cst_42 = arith.constant 1.000000e+00 : f32
    %273 = vector.broadcast %cst_42 : f32 to vector<2x32xf32>
    %274 = arith.addf %273, %272 : vector<2x32xf32>
    %275 = arith.divf %273, %274 : vector<2x32xf32>
    %276 = vector.extract_strided_slice %266 {offsets = [0, 32], sizes = [2, 32], strides = [1, 1]} : vector<2x96xf32> to vector<2x32xf32>
    %277 = vector.extract_strided_slice %263 {offsets = [0, 32], sizes = [2, 32], strides = [1, 1]} : vector<2x96xf32> to vector<2x32xf32>
    %278 = arith.addf %276, %277 : vector<2x32xf32>
    %279 = arith.negf %278 : vector<2x32xf32>
    %280 = math.exp %279 : vector<2x32xf32>
    %cst_43 = arith.constant 1.000000e+00 : f32
    %281 = vector.broadcast %cst_43 : f32 to vector<2x32xf32>
    %282 = arith.addf %281, %280 : vector<2x32xf32>
    %283 = arith.divf %281, %282 : vector<2x32xf32>
    %284 = vector.extract_strided_slice %266 {offsets = [0, 64], sizes = [2, 32], strides = [1, 1]} : vector<2x96xf32> to vector<2x32xf32>
    %285 = vector.extract_strided_slice %263 {offsets = [0, 64], sizes = [2, 32], strides = [1, 1]} : vector<2x96xf32> to vector<2x32xf32>
    %286 = arith.mulf %275, %285 : vector<2x32xf32>
    %287 = arith.addf %284, %286 : vector<2x32xf32>
    %288 = math.tanh %287 : vector<2x32xf32>
    %cst_44 = arith.constant 1.000000e+00 : f32
    %289 = vector.broadcast %cst_44 : f32 to vector<2x32xf32>
    %290 = arith.subf %289, %283 : vector<2x32xf32>
    %291 = arith.mulf %290, %288 : vector<2x32xf32>
    %292 = arith.mulf %283, %232 : vector<2x32xf32>
    %293 = arith.addf %291, %292 : vector<2x32xf32>
    %294 = vector.extract_strided_slice %267 {offsets = [0, 0], sizes = [2, 32], strides = [1, 1]} : vector<2x96xf32> to vector<2x32xf32>
    %295 = vector.extract_strided_slice %265 {offsets = [0, 0], sizes = [2, 32], strides = [1, 1]} : vector<2x96xf32> to vector<2x32xf32>
    %296 = arith.addf %294, %295 : vector<2x32xf32>
    %297 = arith.negf %296 : vector<2x32xf32>
    %298 = math.exp %297 : vector<2x32xf32>
    %cst_45 = arith.constant 1.000000e+00 : f32
    %299 = vector.broadcast %cst_45 : f32 to vector<2x32xf32>
    %300 = arith.addf %299, %298 : vector<2x32xf32>
    %301 = arith.divf %299, %300 : vector<2x32xf32>
    %302 = vector.extract_strided_slice %267 {offsets = [0, 32], sizes = [2, 32], strides = [1, 1]} : vector<2x96xf32> to vector<2x32xf32>
    %303 = vector.extract_strided_slice %265 {offsets = [0, 32], sizes = [2, 32], strides = [1, 1]} : vector<2x96xf32> to vector<2x32xf32>
    %304 = arith.addf %302, %303 : vector<2x32xf32>
    %305 = arith.negf %304 : vector<2x32xf32>
    %306 = math.exp %305 : vector<2x32xf32>
    %cst_46 = arith.constant 1.000000e+00 : f32
    %307 = vector.broadcast %cst_46 : f32 to vector<2x32xf32>
    %308 = arith.addf %307, %306 : vector<2x32xf32>
    %309 = arith.divf %307, %308 : vector<2x32xf32>
    %310 = vector.extract_strided_slice %267 {offsets = [0, 64], sizes = [2, 32], strides = [1, 1]} : vector<2x96xf32> to vector<2x32xf32>
    %311 = vector.extract_strided_slice %265 {offsets = [0, 64], sizes = [2, 32], strides = [1, 1]} : vector<2x96xf32> to vector<2x32xf32>
    %312 = arith.mulf %301, %311 : vector<2x32xf32>
    %313 = arith.addf %310, %312 : vector<2x32xf32>
    %314 = math.tanh %313 : vector<2x32xf32>
    %cst_47 = arith.constant 1.000000e+00 : f32
    %315 = vector.broadcast %cst_47 : f32 to vector<2x32xf32>
    %316 = arith.subf %315, %309 : vector<2x32xf32>
    %317 = arith.mulf %316, %314 : vector<2x32xf32>
    %318 = arith.mulf %309, %258 : vector<2x32xf32>
    %319 = arith.addf %317, %318 : vector<2x32xf32>
    %320 = tpu.concatenate %293, %319 in 1 : vector<2x32xf32>, vector<2x32xf32> -> vector<2x64xf32>
    %321 = arith.truncf %320 : vector<2x64xf32> to vector<2x64xbf16>
    %cst_48 = arith.constant dense<0.000000e+00> : vector<2x192xf32>
    %322 = tpu.matmul %321, %6, %cst_48 {dimension_numbers = #tpu.dot_dimension_numbers<[1], [0], [0], [1], [0, 0, 1, 1], [], []>} : vector<2x64xbf16>, vector<64x192xbf16>, vector<2x192xf32> -> vector<2x192xf32>
    %323 = vector.extract_strided_slice %322 {offsets = [0, 0], sizes = [2, 96], strides = [1, 1]} : vector<2x192xf32> to vector<2x96xf32>
    %324 = arith.addf %323, %9 : vector<2x96xf32>
    %325 = vector.extract_strided_slice %322 {offsets = [0, 96], sizes = [2, 96], strides = [1, 1]} : vector<2x192xf32> to vector<2x96xf32>
    %326 = arith.addf %325, %12 : vector<2x96xf32>
    %327 = vector.extract_strided_slice %5 {offsets = [10, 0], sizes = [2, 96], strides = [1, 1]} : vector<20x192xf32> to vector<2x96xf32>
    %328 = vector.extract_strided_slice %5 {offsets = [8, 96], sizes = [2, 96], strides = [1, 1]} : vector<20x192xf32> to vector<2x96xf32>
    %329 = vector.extract_strided_slice %327 {offsets = [0, 0], sizes = [2, 32], strides = [1, 1]} : vector<2x96xf32> to vector<2x32xf32>
    %330 = vector.extract_strided_slice %324 {offsets = [0, 0], sizes = [2, 32], strides = [1, 1]} : vector<2x96xf32> to vector<2x32xf32>
    %331 = arith.addf %329, %330 : vector<2x32xf32>
    %332 = arith.negf %331 : vector<2x32xf32>
    %333 = math.exp %332 : vector<2x32xf32>
    %cst_49 = arith.constant 1.000000e+00 : f32
    %334 = vector.broadcast %cst_49 : f32 to vector<2x32xf32>
    %335 = arith.addf %334, %333 : vector<2x32xf32>
    %336 = arith.divf %334, %335 : vector<2x32xf32>
    %337 = vector.extract_strided_slice %327 {offsets = [0, 32], sizes = [2, 32], strides = [1, 1]} : vector<2x96xf32> to vector<2x32xf32>
    %338 = vector.extract_strided_slice %324 {offsets = [0, 32], sizes = [2, 32], strides = [1, 1]} : vector<2x96xf32> to vector<2x32xf32>
    %339 = arith.addf %337, %338 : vector<2x32xf32>
    %340 = arith.negf %339 : vector<2x32xf32>
    %341 = math.exp %340 : vector<2x32xf32>
    %cst_50 = arith.constant 1.000000e+00 : f32
    %342 = vector.broadcast %cst_50 : f32 to vector<2x32xf32>
    %343 = arith.addf %342, %341 : vector<2x32xf32>
    %344 = arith.divf %342, %343 : vector<2x32xf32>
    %345 = vector.extract_strided_slice %327 {offsets = [0, 64], sizes = [2, 32], strides = [1, 1]} : vector<2x96xf32> to vector<2x32xf32>
    %346 = vector.extract_strided_slice %324 {offsets = [0, 64], sizes = [2, 32], strides = [1, 1]} : vector<2x96xf32> to vector<2x32xf32>
    %347 = arith.mulf %336, %346 : vector<2x32xf32>
    %348 = arith.addf %345, %347 : vector<2x32xf32>
    %349 = math.tanh %348 : vector<2x32xf32>
    %cst_51 = arith.constant 1.000000e+00 : f32
    %350 = vector.broadcast %cst_51 : f32 to vector<2x32xf32>
    %351 = arith.subf %350, %344 : vector<2x32xf32>
    %352 = arith.mulf %351, %349 : vector<2x32xf32>
    %353 = arith.mulf %344, %293 : vector<2x32xf32>
    %354 = arith.addf %352, %353 : vector<2x32xf32>
    %355 = vector.extract_strided_slice %328 {offsets = [0, 0], sizes = [2, 32], strides = [1, 1]} : vector<2x96xf32> to vector<2x32xf32>
    %356 = vector.extract_strided_slice %326 {offsets = [0, 0], sizes = [2, 32], strides = [1, 1]} : vector<2x96xf32> to vector<2x32xf32>
    %357 = arith.addf %355, %356 : vector<2x32xf32>
    %358 = arith.negf %357 : vector<2x32xf32>
    %359 = math.exp %358 : vector<2x32xf32>
    %cst_52 = arith.constant 1.000000e+00 : f32
    %360 = vector.broadcast %cst_52 : f32 to vector<2x32xf32>
    %361 = arith.addf %360, %359 : vector<2x32xf32>
    %362 = arith.divf %360, %361 : vector<2x32xf32>
    %363 = vector.extract_strided_slice %328 {offsets = [0, 32], sizes = [2, 32], strides = [1, 1]} : vector<2x96xf32> to vector<2x32xf32>
    %364 = vector.extract_strided_slice %326 {offsets = [0, 32], sizes = [2, 32], strides = [1, 1]} : vector<2x96xf32> to vector<2x32xf32>
    %365 = arith.addf %363, %364 : vector<2x32xf32>
    %366 = arith.negf %365 : vector<2x32xf32>
    %367 = math.exp %366 : vector<2x32xf32>
    %cst_53 = arith.constant 1.000000e+00 : f32
    %368 = vector.broadcast %cst_53 : f32 to vector<2x32xf32>
    %369 = arith.addf %368, %367 : vector<2x32xf32>
    %370 = arith.divf %368, %369 : vector<2x32xf32>
    %371 = vector.extract_strided_slice %328 {offsets = [0, 64], sizes = [2, 32], strides = [1, 1]} : vector<2x96xf32> to vector<2x32xf32>
    %372 = vector.extract_strided_slice %326 {offsets = [0, 64], sizes = [2, 32], strides = [1, 1]} : vector<2x96xf32> to vector<2x32xf32>
    %373 = arith.mulf %362, %372 : vector<2x32xf32>
    %374 = arith.addf %371, %373 : vector<2x32xf32>
    %375 = math.tanh %374 : vector<2x32xf32>
    %cst_54 = arith.constant 1.000000e+00 : f32
    %376 = vector.broadcast %cst_54 : f32 to vector<2x32xf32>
    %377 = arith.subf %376, %370 : vector<2x32xf32>
    %378 = arith.mulf %377, %375 : vector<2x32xf32>
    %379 = arith.mulf %370, %319 : vector<2x32xf32>
    %380 = arith.addf %378, %379 : vector<2x32xf32>
    %381 = tpu.concatenate %354, %380 in 1 : vector<2x32xf32>, vector<2x32xf32> -> vector<2x64xf32>
    %382 = arith.truncf %381 : vector<2x64xf32> to vector<2x64xbf16>
    %cst_55 = arith.constant dense<0.000000e+00> : vector<2x192xf32>
    %383 = tpu.matmul %382, %6, %cst_55 {dimension_numbers = #tpu.dot_dimension_numbers<[1], [0], [0], [1], [0, 0, 1, 1], [], []>} : vector<2x64xbf16>, vector<64x192xbf16>, vector<2x192xf32> -> vector<2x192xf32>
    %384 = vector.extract_strided_slice %383 {offsets = [0, 0], sizes = [2, 96], strides = [1, 1]} : vector<2x192xf32> to vector<2x96xf32>
    %385 = arith.addf %384, %9 : vector<2x96xf32>
    %386 = vector.extract_strided_slice %383 {offsets = [0, 96], sizes = [2, 96], strides = [1, 1]} : vector<2x192xf32> to vector<2x96xf32>
    %387 = arith.addf %386, %12 : vector<2x96xf32>
    %388 = vector.extract_strided_slice %5 {offsets = [12, 0], sizes = [2, 96], strides = [1, 1]} : vector<20x192xf32> to vector<2x96xf32>
    %389 = vector.extract_strided_slice %5 {offsets = [6, 96], sizes = [2, 96], strides = [1, 1]} : vector<20x192xf32> to vector<2x96xf32>
    %390 = vector.extract_strided_slice %388 {offsets = [0, 0], sizes = [2, 32], strides = [1, 1]} : vector<2x96xf32> to vector<2x32xf32>
    %391 = vector.extract_strided_slice %385 {offsets = [0, 0], sizes = [2, 32], strides = [1, 1]} : vector<2x96xf32> to vector<2x32xf32>
    %392 = arith.addf %390, %391 : vector<2x32xf32>
    %393 = arith.negf %392 : vector<2x32xf32>
    %394 = math.exp %393 : vector<2x32xf32>
    %cst_56 = arith.constant 1.000000e+00 : f32
    %395 = vector.broadcast %cst_56 : f32 to vector<2x32xf32>
    %396 = arith.addf %395, %394 : vector<2x32xf32>
    %397 = arith.divf %395, %396 : vector<2x32xf32>
    %398 = vector.extract_strided_slice %388 {offsets = [0, 32], sizes = [2, 32], strides = [1, 1]} : vector<2x96xf32> to vector<2x32xf32>
    %399 = vector.extract_strided_slice %385 {offsets = [0, 32], sizes = [2, 32], strides = [1, 1]} : vector<2x96xf32> to vector<2x32xf32>
    %400 = arith.addf %398, %399 : vector<2x32xf32>
    %401 = arith.negf %400 : vector<2x32xf32>
    %402 = math.exp %401 : vector<2x32xf32>
    %cst_57 = arith.constant 1.000000e+00 : f32
    %403 = vector.broadcast %cst_57 : f32 to vector<2x32xf32>
    %404 = arith.addf %403, %402 : vector<2x32xf32>
    %405 = arith.divf %403, %404 : vector<2x32xf32>
    %406 = vector.extract_strided_slice %388 {offsets = [0, 64], sizes = [2, 32], strides = [1, 1]} : vector<2x96xf32> to vector<2x32xf32>
    %407 = vector.extract_strided_slice %385 {offsets = [0, 64], sizes = [2, 32], strides = [1, 1]} : vector<2x96xf32> to vector<2x32xf32>
    %408 = arith.mulf %397, %407 : vector<2x32xf32>
    %409 = arith.addf %406, %408 : vector<2x32xf32>
    %410 = math.tanh %409 : vector<2x32xf32>
    %cst_58 = arith.constant 1.000000e+00 : f32
    %411 = vector.broadcast %cst_58 : f32 to vector<2x32xf32>
    %412 = arith.subf %411, %405 : vector<2x32xf32>
    %413 = arith.mulf %412, %410 : vector<2x32xf32>
    %414 = arith.mulf %405, %354 : vector<2x32xf32>
    %415 = arith.addf %413, %414 : vector<2x32xf32>
    %416 = vector.extract_strided_slice %389 {offsets = [0, 0], sizes = [2, 32], strides = [1, 1]} : vector<2x96xf32> to vector<2x32xf32>
    %417 = vector.extract_strided_slice %387 {offsets = [0, 0], sizes = [2, 32], strides = [1, 1]} : vector<2x96xf32> to vector<2x32xf32>
    %418 = arith.addf %416, %417 : vector<2x32xf32>
    %419 = arith.negf %418 : vector<2x32xf32>
    %420 = math.exp %419 : vector<2x32xf32>
    %cst_59 = arith.constant 1.000000e+00 : f32
    %421 = vector.broadcast %cst_59 : f32 to vector<2x32xf32>
    %422 = arith.addf %421, %420 : vector<2x32xf32>
    %423 = arith.divf %421, %422 : vector<2x32xf32>
    %424 = vector.extract_strided_slice %389 {offsets = [0, 32], sizes = [2, 32], strides = [1, 1]} : vector<2x96xf32> to vector<2x32xf32>
    %425 = vector.extract_strided_slice %387 {offsets = [0, 32], sizes = [2, 32], strides = [1, 1]} : vector<2x96xf32> to vector<2x32xf32>
    %426 = arith.addf %424, %425 : vector<2x32xf32>
    %427 = arith.negf %426 : vector<2x32xf32>
    %428 = math.exp %427 : vector<2x32xf32>
    %cst_60 = arith.constant 1.000000e+00 : f32
    %429 = vector.broadcast %cst_60 : f32 to vector<2x32xf32>
    %430 = arith.addf %429, %428 : vector<2x32xf32>
    %431 = arith.divf %429, %430 : vector<2x32xf32>
    %432 = vector.extract_strided_slice %389 {offsets = [0, 64], sizes = [2, 32], strides = [1, 1]} : vector<2x96xf32> to vector<2x32xf32>
    %433 = vector.extract_strided_slice %387 {offsets = [0, 64], sizes = [2, 32], strides = [1, 1]} : vector<2x96xf32> to vector<2x32xf32>
    %434 = arith.mulf %423, %433 : vector<2x32xf32>
    %435 = arith.addf %432, %434 : vector<2x32xf32>
    %436 = math.tanh %435 : vector<2x32xf32>
    %cst_61 = arith.constant 1.000000e+00 : f32
    %437 = vector.broadcast %cst_61 : f32 to vector<2x32xf32>
    %438 = arith.subf %437, %431 : vector<2x32xf32>
    %439 = arith.mulf %438, %436 : vector<2x32xf32>
    %440 = arith.mulf %431, %380 : vector<2x32xf32>
    %441 = arith.addf %439, %440 : vector<2x32xf32>
    %442 = tpu.concatenate %415, %441 in 1 : vector<2x32xf32>, vector<2x32xf32> -> vector<2x64xf32>
    %443 = arith.truncf %442 : vector<2x64xf32> to vector<2x64xbf16>
    %cst_62 = arith.constant dense<0.000000e+00> : vector<2x192xf32>
    %444 = tpu.matmul %443, %6, %cst_62 {dimension_numbers = #tpu.dot_dimension_numbers<[1], [0], [0], [1], [0, 0, 1, 1], [], []>} : vector<2x64xbf16>, vector<64x192xbf16>, vector<2x192xf32> -> vector<2x192xf32>
    %445 = vector.extract_strided_slice %444 {offsets = [0, 0], sizes = [2, 96], strides = [1, 1]} : vector<2x192xf32> to vector<2x96xf32>
    %446 = arith.addf %445, %9 : vector<2x96xf32>
    %447 = vector.extract_strided_slice %444 {offsets = [0, 96], sizes = [2, 96], strides = [1, 1]} : vector<2x192xf32> to vector<2x96xf32>
    %448 = arith.addf %447, %12 : vector<2x96xf32>
    %449 = vector.extract_strided_slice %5 {offsets = [14, 0], sizes = [2, 96], strides = [1, 1]} : vector<20x192xf32> to vector<2x96xf32>
    %450 = vector.extract_strided_slice %5 {offsets = [4, 96], sizes = [2, 96], strides = [1, 1]} : vector<20x192xf32> to vector<2x96xf32>
    %451 = vector.extract_strided_slice %449 {offsets = [0, 0], sizes = [2, 32], strides = [1, 1]} : vector<2x96xf32> to vector<2x32xf32>
    %452 = vector.extract_strided_slice %446 {offsets = [0, 0], sizes = [2, 32], strides = [1, 1]} : vector<2x96xf32> to vector<2x32xf32>
    %453 = arith.addf %451, %452 : vector<2x32xf32>
    %454 = arith.negf %453 : vector<2x32xf32>
    %455 = math.exp %454 : vector<2x32xf32>
    %cst_63 = arith.constant 1.000000e+00 : f32
    %456 = vector.broadcast %cst_63 : f32 to vector<2x32xf32>
    %457 = arith.addf %456, %455 : vector<2x32xf32>
    %458 = arith.divf %456, %457 : vector<2x32xf32>
    %459 = vector.extract_strided_slice %449 {offsets = [0, 32], sizes = [2, 32], strides = [1, 1]} : vector<2x96xf32> to vector<2x32xf32>
    %460 = vector.extract_strided_slice %446 {offsets = [0, 32], sizes = [2, 32], strides = [1, 1]} : vector<2x96xf32> to vector<2x32xf32>
    %461 = arith.addf %459, %460 : vector<2x32xf32>
    %462 = arith.negf %461 : vector<2x32xf32>
    %463 = math.exp %462 : vector<2x32xf32>
    %cst_64 = arith.constant 1.000000e+00 : f32
    %464 = vector.broadcast %cst_64 : f32 to vector<2x32xf32>
    %465 = arith.addf %464, %463 : vector<2x32xf32>
    %466 = arith.divf %464, %465 : vector<2x32xf32>
    %467 = vector.extract_strided_slice %449 {offsets = [0, 64], sizes = [2, 32], strides = [1, 1]} : vector<2x96xf32> to vector<2x32xf32>
    %468 = vector.extract_strided_slice %446 {offsets = [0, 64], sizes = [2, 32], strides = [1, 1]} : vector<2x96xf32> to vector<2x32xf32>
    %469 = arith.mulf %458, %468 : vector<2x32xf32>
    %470 = arith.addf %467, %469 : vector<2x32xf32>
    %471 = math.tanh %470 : vector<2x32xf32>
    %cst_65 = arith.constant 1.000000e+00 : f32
    %472 = vector.broadcast %cst_65 : f32 to vector<2x32xf32>
    %473 = arith.subf %472, %466 : vector<2x32xf32>
    %474 = arith.mulf %473, %471 : vector<2x32xf32>
    %475 = arith.mulf %466, %415 : vector<2x32xf32>
    %476 = arith.addf %474, %475 : vector<2x32xf32>
    %477 = vector.extract_strided_slice %450 {offsets = [0, 0], sizes = [2, 32], strides = [1, 1]} : vector<2x96xf32> to vector<2x32xf32>
    %478 = vector.extract_strided_slice %448 {offsets = [0, 0], sizes = [2, 32], strides = [1, 1]} : vector<2x96xf32> to vector<2x32xf32>
    %479 = arith.addf %477, %478 : vector<2x32xf32>
    %480 = arith.negf %479 : vector<2x32xf32>
    %481 = math.exp %480 : vector<2x32xf32>
    %cst_66 = arith.constant 1.000000e+00 : f32
    %482 = vector.broadcast %cst_66 : f32 to vector<2x32xf32>
    %483 = arith.addf %482, %481 : vector<2x32xf32>
    %484 = arith.divf %482, %483 : vector<2x32xf32>
    %485 = vector.extract_strided_slice %450 {offsets = [0, 32], sizes = [2, 32], strides = [1, 1]} : vector<2x96xf32> to vector<2x32xf32>
    %486 = vector.extract_strided_slice %448 {offsets = [0, 32], sizes = [2, 32], strides = [1, 1]} : vector<2x96xf32> to vector<2x32xf32>
    %487 = arith.addf %485, %486 : vector<2x32xf32>
    %488 = arith.negf %487 : vector<2x32xf32>
    %489 = math.exp %488 : vector<2x32xf32>
    %cst_67 = arith.constant 1.000000e+00 : f32
    %490 = vector.broadcast %cst_67 : f32 to vector<2x32xf32>
    %491 = arith.addf %490, %489 : vector<2x32xf32>
    %492 = arith.divf %490, %491 : vector<2x32xf32>
    %493 = vector.extract_strided_slice %450 {offsets = [0, 64], sizes = [2, 32], strides = [1, 1]} : vector<2x96xf32> to vector<2x32xf32>
    %494 = vector.extract_strided_slice %448 {offsets = [0, 64], sizes = [2, 32], strides = [1, 1]} : vector<2x96xf32> to vector<2x32xf32>
    %495 = arith.mulf %484, %494 : vector<2x32xf32>
    %496 = arith.addf %493, %495 : vector<2x32xf32>
    %497 = math.tanh %496 : vector<2x32xf32>
    %cst_68 = arith.constant 1.000000e+00 : f32
    %498 = vector.broadcast %cst_68 : f32 to vector<2x32xf32>
    %499 = arith.subf %498, %492 : vector<2x32xf32>
    %500 = arith.mulf %499, %497 : vector<2x32xf32>
    %501 = arith.mulf %492, %441 : vector<2x32xf32>
    %502 = arith.addf %500, %501 : vector<2x32xf32>
    %503 = tpu.concatenate %476, %502 in 1 : vector<2x32xf32>, vector<2x32xf32> -> vector<2x64xf32>
    %504 = arith.truncf %503 : vector<2x64xf32> to vector<2x64xbf16>
    %cst_69 = arith.constant dense<0.000000e+00> : vector<2x192xf32>
    %505 = tpu.matmul %504, %6, %cst_69 {dimension_numbers = #tpu.dot_dimension_numbers<[1], [0], [0], [1], [0, 0, 1, 1], [], []>} : vector<2x64xbf16>, vector<64x192xbf16>, vector<2x192xf32> -> vector<2x192xf32>
    %506 = vector.extract_strided_slice %505 {offsets = [0, 0], sizes = [2, 96], strides = [1, 1]} : vector<2x192xf32> to vector<2x96xf32>
    %507 = arith.addf %506, %9 : vector<2x96xf32>
    %508 = vector.extract_strided_slice %505 {offsets = [0, 96], sizes = [2, 96], strides = [1, 1]} : vector<2x192xf32> to vector<2x96xf32>
    %509 = arith.addf %508, %12 : vector<2x96xf32>
    %510 = vector.extract_strided_slice %5 {offsets = [16, 0], sizes = [2, 96], strides = [1, 1]} : vector<20x192xf32> to vector<2x96xf32>
    %511 = vector.extract_strided_slice %5 {offsets = [2, 96], sizes = [2, 96], strides = [1, 1]} : vector<20x192xf32> to vector<2x96xf32>
    %512 = vector.extract_strided_slice %510 {offsets = [0, 0], sizes = [2, 32], strides = [1, 1]} : vector<2x96xf32> to vector<2x32xf32>
    %513 = vector.extract_strided_slice %507 {offsets = [0, 0], sizes = [2, 32], strides = [1, 1]} : vector<2x96xf32> to vector<2x32xf32>
    %514 = arith.addf %512, %513 : vector<2x32xf32>
    %515 = arith.negf %514 : vector<2x32xf32>
    %516 = math.exp %515 : vector<2x32xf32>
    %cst_70 = arith.constant 1.000000e+00 : f32
    %517 = vector.broadcast %cst_70 : f32 to vector<2x32xf32>
    %518 = arith.addf %517, %516 : vector<2x32xf32>
    %519 = arith.divf %517, %518 : vector<2x32xf32>
    %520 = vector.extract_strided_slice %510 {offsets = [0, 32], sizes = [2, 32], strides = [1, 1]} : vector<2x96xf32> to vector<2x32xf32>
    %521 = vector.extract_strided_slice %507 {offsets = [0, 32], sizes = [2, 32], strides = [1, 1]} : vector<2x96xf32> to vector<2x32xf32>
    %522 = arith.addf %520, %521 : vector<2x32xf32>
    %523 = arith.negf %522 : vector<2x32xf32>
    %524 = math.exp %523 : vector<2x32xf32>
    %cst_71 = arith.constant 1.000000e+00 : f32
    %525 = vector.broadcast %cst_71 : f32 to vector<2x32xf32>
    %526 = arith.addf %525, %524 : vector<2x32xf32>
    %527 = arith.divf %525, %526 : vector<2x32xf32>
    %528 = vector.extract_strided_slice %510 {offsets = [0, 64], sizes = [2, 32], strides = [1, 1]} : vector<2x96xf32> to vector<2x32xf32>
    %529 = vector.extract_strided_slice %507 {offsets = [0, 64], sizes = [2, 32], strides = [1, 1]} : vector<2x96xf32> to vector<2x32xf32>
    %530 = arith.mulf %519, %529 : vector<2x32xf32>
    %531 = arith.addf %528, %530 : vector<2x32xf32>
    %532 = math.tanh %531 : vector<2x32xf32>
    %cst_72 = arith.constant 1.000000e+00 : f32
    %533 = vector.broadcast %cst_72 : f32 to vector<2x32xf32>
    %534 = arith.subf %533, %527 : vector<2x32xf32>
    %535 = arith.mulf %534, %532 : vector<2x32xf32>
    %536 = arith.mulf %527, %476 : vector<2x32xf32>
    %537 = arith.addf %535, %536 : vector<2x32xf32>
    %538 = vector.extract_strided_slice %511 {offsets = [0, 0], sizes = [2, 32], strides = [1, 1]} : vector<2x96xf32> to vector<2x32xf32>
    %539 = vector.extract_strided_slice %509 {offsets = [0, 0], sizes = [2, 32], strides = [1, 1]} : vector<2x96xf32> to vector<2x32xf32>
    %540 = arith.addf %538, %539 : vector<2x32xf32>
    %541 = arith.negf %540 : vector<2x32xf32>
    %542 = math.exp %541 : vector<2x32xf32>
    %cst_73 = arith.constant 1.000000e+00 : f32
    %543 = vector.broadcast %cst_73 : f32 to vector<2x32xf32>
    %544 = arith.addf %543, %542 : vector<2x32xf32>
    %545 = arith.divf %543, %544 : vector<2x32xf32>
    %546 = vector.extract_strided_slice %511 {offsets = [0, 32], sizes = [2, 32], strides = [1, 1]} : vector<2x96xf32> to vector<2x32xf32>
    %547 = vector.extract_strided_slice %509 {offsets = [0, 32], sizes = [2, 32], strides = [1, 1]} : vector<2x96xf32> to vector<2x32xf32>
    %548 = arith.addf %546, %547 : vector<2x32xf32>
    %549 = arith.negf %548 : vector<2x32xf32>
    %550 = math.exp %549 : vector<2x32xf32>
    %cst_74 = arith.constant 1.000000e+00 : f32
    %551 = vector.broadcast %cst_74 : f32 to vector<2x32xf32>
    %552 = arith.addf %551, %550 : vector<2x32xf32>
    %553 = arith.divf %551, %552 : vector<2x32xf32>
    %554 = vector.extract_strided_slice %511 {offsets = [0, 64], sizes = [2, 32], strides = [1, 1]} : vector<2x96xf32> to vector<2x32xf32>
    %555 = vector.extract_strided_slice %509 {offsets = [0, 64], sizes = [2, 32], strides = [1, 1]} : vector<2x96xf32> to vector<2x32xf32>
    %556 = arith.mulf %545, %555 : vector<2x32xf32>
    %557 = arith.addf %554, %556 : vector<2x32xf32>
    %558 = math.tanh %557 : vector<2x32xf32>
    %cst_75 = arith.constant 1.000000e+00 : f32
    %559 = vector.broadcast %cst_75 : f32 to vector<2x32xf32>
    %560 = arith.subf %559, %553 : vector<2x32xf32>
    %561 = arith.mulf %560, %558 : vector<2x32xf32>
    %562 = arith.mulf %553, %502 : vector<2x32xf32>
    %563 = arith.addf %561, %562 : vector<2x32xf32>
    %564 = tpu.concatenate %537, %563 in 1 : vector<2x32xf32>, vector<2x32xf32> -> vector<2x64xf32>
    %565 = arith.truncf %564 : vector<2x64xf32> to vector<2x64xbf16>
    %cst_76 = arith.constant dense<0.000000e+00> : vector<2x192xf32>
    %566 = tpu.matmul %565, %6, %cst_76 {dimension_numbers = #tpu.dot_dimension_numbers<[1], [0], [0], [1], [0, 0, 1, 1], [], []>} : vector<2x64xbf16>, vector<64x192xbf16>, vector<2x192xf32> -> vector<2x192xf32>
    %567 = vector.extract_strided_slice %566 {offsets = [0, 0], sizes = [2, 96], strides = [1, 1]} : vector<2x192xf32> to vector<2x96xf32>
    %568 = arith.addf %567, %9 : vector<2x96xf32>
    %569 = vector.extract_strided_slice %566 {offsets = [0, 96], sizes = [2, 96], strides = [1, 1]} : vector<2x192xf32> to vector<2x96xf32>
    %570 = arith.addf %569, %12 : vector<2x96xf32>
    %571 = vector.extract_strided_slice %5 {offsets = [18, 0], sizes = [2, 96], strides = [1, 1]} : vector<20x192xf32> to vector<2x96xf32>
    %572 = vector.extract_strided_slice %5 {offsets = [0, 96], sizes = [2, 96], strides = [1, 1]} : vector<20x192xf32> to vector<2x96xf32>
    %573 = vector.extract_strided_slice %571 {offsets = [0, 0], sizes = [2, 32], strides = [1, 1]} : vector<2x96xf32> to vector<2x32xf32>
    %574 = vector.extract_strided_slice %568 {offsets = [0, 0], sizes = [2, 32], strides = [1, 1]} : vector<2x96xf32> to vector<2x32xf32>
    %575 = arith.addf %573, %574 : vector<2x32xf32>
    %576 = arith.negf %575 : vector<2x32xf32>
    %577 = math.exp %576 : vector<2x32xf32>
    %cst_77 = arith.constant 1.000000e+00 : f32
    %578 = vector.broadcast %cst_77 : f32 to vector<2x32xf32>
    %579 = arith.addf %578, %577 : vector<2x32xf32>
    %580 = arith.divf %578, %579 : vector<2x32xf32>
    %581 = vector.extract_strided_slice %571 {offsets = [0, 32], sizes = [2, 32], strides = [1, 1]} : vector<2x96xf32> to vector<2x32xf32>
    %582 = vector.extract_strided_slice %568 {offsets = [0, 32], sizes = [2, 32], strides = [1, 1]} : vector<2x96xf32> to vector<2x32xf32>
    %583 = arith.addf %581, %582 : vector<2x32xf32>
    %584 = arith.negf %583 : vector<2x32xf32>
    %585 = math.exp %584 : vector<2x32xf32>
    %cst_78 = arith.constant 1.000000e+00 : f32
    %586 = vector.broadcast %cst_78 : f32 to vector<2x32xf32>
    %587 = arith.addf %586, %585 : vector<2x32xf32>
    %588 = arith.divf %586, %587 : vector<2x32xf32>
    %589 = vector.extract_strided_slice %571 {offsets = [0, 64], sizes = [2, 32], strides = [1, 1]} : vector<2x96xf32> to vector<2x32xf32>
    %590 = vector.extract_strided_slice %568 {offsets = [0, 64], sizes = [2, 32], strides = [1, 1]} : vector<2x96xf32> to vector<2x32xf32>
    %591 = arith.mulf %580, %590 : vector<2x32xf32>
    %592 = arith.addf %589, %591 : vector<2x32xf32>
    %593 = math.tanh %592 : vector<2x32xf32>
    %cst_79 = arith.constant 1.000000e+00 : f32
    %594 = vector.broadcast %cst_79 : f32 to vector<2x32xf32>
    %595 = arith.subf %594, %588 : vector<2x32xf32>
    %596 = arith.mulf %595, %593 : vector<2x32xf32>
    %597 = arith.mulf %588, %537 : vector<2x32xf32>
    %598 = arith.addf %596, %597 : vector<2x32xf32>
    %599 = vector.extract_strided_slice %572 {offsets = [0, 0], sizes = [2, 32], strides = [1, 1]} : vector<2x96xf32> to vector<2x32xf32>
    %600 = vector.extract_strided_slice %570 {offsets = [0, 0], sizes = [2, 32], strides = [1, 1]} : vector<2x96xf32> to vector<2x32xf32>
    %601 = arith.addf %599, %600 : vector<2x32xf32>
    %602 = arith.negf %601 : vector<2x32xf32>
    %603 = math.exp %602 : vector<2x32xf32>
    %cst_80 = arith.constant 1.000000e+00 : f32
    %604 = vector.broadcast %cst_80 : f32 to vector<2x32xf32>
    %605 = arith.addf %604, %603 : vector<2x32xf32>
    %606 = arith.divf %604, %605 : vector<2x32xf32>
    %607 = vector.extract_strided_slice %572 {offsets = [0, 32], sizes = [2, 32], strides = [1, 1]} : vector<2x96xf32> to vector<2x32xf32>
    %608 = vector.extract_strided_slice %570 {offsets = [0, 32], sizes = [2, 32], strides = [1, 1]} : vector<2x96xf32> to vector<2x32xf32>
    %609 = arith.addf %607, %608 : vector<2x32xf32>
    %610 = arith.negf %609 : vector<2x32xf32>
    %611 = math.exp %610 : vector<2x32xf32>
    %cst_81 = arith.constant 1.000000e+00 : f32
    %612 = vector.broadcast %cst_81 : f32 to vector<2x32xf32>
    %613 = arith.addf %612, %611 : vector<2x32xf32>
    %614 = arith.divf %612, %613 : vector<2x32xf32>
    %615 = vector.extract_strided_slice %572 {offsets = [0, 64], sizes = [2, 32], strides = [1, 1]} : vector<2x96xf32> to vector<2x32xf32>
    %616 = vector.extract_strided_slice %570 {offsets = [0, 64], sizes = [2, 32], strides = [1, 1]} : vector<2x96xf32> to vector<2x32xf32>
    %617 = arith.mulf %606, %616 : vector<2x32xf32>
    %618 = arith.addf %615, %617 : vector<2x32xf32>
    %619 = math.tanh %618 : vector<2x32xf32>
    %cst_82 = arith.constant 1.000000e+00 : f32
    %620 = vector.broadcast %cst_82 : f32 to vector<2x32xf32>
    %621 = arith.subf %620, %614 : vector<2x32xf32>
    %622 = arith.mulf %621, %619 : vector<2x32xf32>
    %623 = arith.mulf %614, %563 : vector<2x32xf32>
    %624 = arith.addf %622, %623 : vector<2x32xf32>
    %625 = tpu.concatenate %598, %624 in 1 : vector<2x32xf32>, vector<2x32xf32> -> vector<2x64xf32>
    %626 = arith.truncf %625 : vector<2x64xf32> to vector<2x64xbf16>
    %c0_83 = arith.constant 0 : index
    %c0_84 = arith.constant 0 : index
    %627 = vector.load %arg9[%c0_83, %c0_84] : memref<64x32xbf16, #tpu.memory_space<vmem>>, vector<64x32xbf16>
    %cst_85 = arith.constant dense<0.000000e+00> : vector<2x32xf32>
    %628 = tpu.matmul %626, %627, %cst_85 {dimension_numbers = #tpu.dot_dimension_numbers<[1], [0], [0], [1], [0, 0, 1, 1], [], []>} : vector<2x64xbf16>, vector<64x32xbf16>, vector<2x32xf32> -> vector<2x32xf32>
    %c0_86 = arith.constant 0 : index
    %c0_87 = arith.constant 0 : index
    %629 = vector.load %arg10[%c0_86, %c0_87] : memref<1x32xf32, #tpu.memory_space<vmem>>, vector<1x32xf32>
    %630 = vector.broadcast %629 : vector<1x32xf32> to vector<2x32xf32>
    %631 = arith.addf %628, %630 : vector<2x32xf32>
    %632 = math.tanh %631 : vector<2x32xf32>
    %633 = tpu.concatenate %49, %110, %171, %232, %293, %354, %415, %476, %537, %598 in 0 : vector<2x32xf32>, vector<2x32xf32>, vector<2x32xf32>, vector<2x32xf32>, vector<2x32xf32>, vector<2x32xf32>, vector<2x32xf32>, vector<2x32xf32>, vector<2x32xf32>, vector<2x32xf32> -> vector<20x32xf32>
    %634 = tpu.concatenate %624, %563, %502, %441, %380, %319, %258, %197, %136, %75 in 0 : vector<2x32xf32>, vector<2x32xf32>, vector<2x32xf32>, vector<2x32xf32>, vector<2x32xf32>, vector<2x32xf32>, vector<2x32xf32>, vector<2x32xf32>, vector<2x32xf32>, vector<2x32xf32> -> vector<20x32xf32>
    %635 = tpu.concatenate %633, %634 in 1 : vector<20x32xf32>, vector<20x32xf32> -> vector<20x64xf32>
    %636 = arith.truncf %635 : vector<20x64xf32> to vector<20x64xbf16>
    %c0_88 = arith.constant 0 : index
    %c0_89 = arith.constant 0 : index
    %637 = vector.load %arg11[%c0_88, %c0_89] : memref<64x32xbf16, #tpu.memory_space<vmem>>, vector<64x32xbf16>
    %cst_90 = arith.constant dense<0.000000e+00> : vector<20x32xf32>
    %638 = tpu.matmul %636, %637, %cst_90 {dimension_numbers = #tpu.dot_dimension_numbers<[1], [0], [0], [1], [0, 0, 1, 1], [], []>} : vector<20x64xbf16>, vector<64x32xbf16>, vector<20x32xf32> -> vector<20x32xf32>
    %c0_91 = arith.constant 0 : index
    %c0_92 = arith.constant 0 : index
    %639 = vector.load %arg12[%c0_91, %c0_92] : memref<1x32xf32, #tpu.memory_space<vmem>>, vector<1x32xf32>
    %640 = vector.broadcast %639 : vector<1x32xf32> to vector<20x32xf32>
    %641 = arith.addf %638, %640 : vector<20x32xf32>
    %cst_93 = arith.constant 1.000000e+00 : f32
    %642 = vector.broadcast %cst_93 : f32 to vector<20x1xf32>
    %643 = tpu.concatenate %635, %642 in 1 : vector<20x64xf32>, vector<20x1xf32> -> vector<20x65xf32>
    %c0_94 = arith.constant 0 : index
    %c0_95 = arith.constant 0 : index
    %644 = vector.load %arg3[%c0_94, %c0_95] : memref<2x20xbf16, #tpu.memory_space<vmem>>, vector<2x20xbf16>
    %c0_96 = arith.constant 0 : index
    %c0_97 = arith.constant 0 : index
    %645 = vector.load %arg14[%c0_96, %c0_97] : memref<32x128xbf16, #tpu.memory_space<vmem>>, vector<32x128xbf16>
    %c0_98 = arith.constant 0 : index
    %c0_99 = arith.constant 0 : index
    %646 = vector.load %arg13[%c0_98, %c0_99] : memref<1x32xf32, #tpu.memory_space<vmem>>, vector<1x32xf32>
    %647 = vector.shape_cast %646 : vector<1x32xf32> to vector<1x32xf32>
    %648 = vector.broadcast %647 : vector<1x32xf32> to vector<20x32xf32>
    %649 = math.absf %646 : vector<1x32xf32>
    %cst_100 = arith.constant dense<0.000000e+00> : vector<1xf32>
    %650 = vector.multi_reduction <add>, %649, %cst_100 [1] : vector<1x32xf32> to vector<1xf32>
    %651 = vector.shape_cast %650 : vector<1xf32> to vector<1x1xf32>
    %c0_101 = arith.constant 0 : index
    %c0_102 = arith.constant 0 : index
    %652 = vector.load %arg17[%c0_101, %c0_102] : memref<80x120xbf16, #tpu.memory_space<vmem>>, vector<80x120xbf16>
    %c0_103 = arith.constant 0 : index
    %c0_104 = arith.constant 0 : index
    %653 = vector.load %arg18[%c0_103, %c0_104] : memref<32x24xbf16, #tpu.memory_space<vmem>>, vector<32x24xbf16>
    %c0_105 = arith.constant 0 : index
    %c0_106 = arith.constant 0 : index
    %654 = vector.load %arg15[%c0_105, %c0_106] : memref<1x96xf32, #tpu.memory_space<vmem>>, vector<1x96xf32>
    %655 = vector.shape_cast %654 : vector<1x96xf32> to vector<1x96xf32>
    %656 = vector.broadcast %655 : vector<1x96xf32> to vector<2x96xf32>
    %c0_107 = arith.constant 0 : index
    %c0_108 = arith.constant 0 : index
    %657 = vector.load %arg16[%c0_107, %c0_108] : memref<1x96xf32, #tpu.memory_space<vmem>>, vector<1x96xf32>
    %658 = vector.shape_cast %657 : vector<1x96xf32> to vector<1x96xf32>
    %659 = vector.broadcast %658 : vector<1x96xf32> to vector<2x96xf32>
    %c0_109 = arith.constant 0 : index
    %c0_110 = arith.constant 0 : index
    %660 = vector.load %arg19[%c0_109, %c0_110] : memref<1x24xf32, #tpu.memory_space<vmem>>, vector<1x24xf32>
    %661 = vector.shape_cast %660 : vector<1x24xf32> to vector<1x24xf32>
    %662 = vector.broadcast %661 : vector<1x24xf32> to vector<2x24xf32>
    %c0_111 = arith.constant 0 : index
    %c0_112 = arith.constant 0 : index
    %663 = vector.load %arg2[%c0_111, %c0_112] : memref<24x16xbf16, #tpu.memory_space<vmem>>, vector<24x16xbf16>
    %664 = tpu.iota {dimensions = array<i32: 1>} : vector<2x24xi32>
    %c0_113 = arith.constant 0 : index
    %c0_114 = arith.constant 0 : index
    %c0_115 = arith.constant 0 : index
    %665 = vector.load %arg1[%c0_113, %c0_114, %c0_115] : memref<8x2x16xf32, #tpu.memory_space<vmem>>, vector<1x2x16xf32>
    %666 = vector.shape_cast %665 : vector<1x2x16xf32> to vector<2x16xf32>
    %cst_116 = arith.constant 0.000000e+00 : f32
    %667 = vector.broadcast %cst_116 : f32 to vector<2x24xf32>
    %668 = arith.truncf %632 : vector<2x32xf32> to vector<2x32xbf16>
    %cst_117 = arith.constant dense<0.000000e+00> : vector<2x128xf32>
    %669 = tpu.matmul %668, %645, %cst_117 {dimension_numbers = #tpu.dot_dimension_numbers<[1], [0], [0], [1], [0, 0, 1, 1], [], []>} : vector<2x32xbf16>, vector<32x128xbf16>, vector<2x128xf32> -> vector<2x128xf32>
    %670 = vector.extract_strided_slice %669 {offsets = [0, 0], sizes = [2, 32], strides = [1, 1]} : vector<2x128xf32> to vector<2x32xf32>
    %671 = vector.extract_strided_slice %669 {offsets = [0, 32], sizes = [2, 96], strides = [1, 1]} : vector<2x128xf32> to vector<2x96xf32>
    %672 = arith.addf %671, %659 : vector<2x96xf32>
    %673 = tpu.concatenate %670, %670, %670, %670, %670, %670, %670, %670, %670, %670 in 0 : vector<2x32xf32>, vector<2x32xf32>, vector<2x32xf32>, vector<2x32xf32>, vector<2x32xf32>, vector<2x32xf32>, vector<2x32xf32>, vector<2x32xf32>, vector<2x32xf32>, vector<2x32xf32> -> vector<20x32xf32>
    %674 = arith.addf %641, %673 : vector<20x32xf32>
    %675 = math.tanh %674 : vector<20x32xf32>
    %676 = arith.mulf %675, %648 : vector<20x32xf32>
    %cst_118 = arith.constant dense<0.000000e+00> : vector<20xf32>
    %677 = vector.multi_reduction <add>, %676, %cst_118 [1] : vector<20x32xf32> to vector<20xf32>
    %678 = vector.shape_cast %677 : vector<20xf32> to vector<20x1xf32>
    %679 = vector.broadcast %651 : vector<1x1xf32> to vector<20x1xf32>
    %680 = arith.subf %678, %679 : vector<20x1xf32>
    %681 = math.exp %680 : vector<20x1xf32>
    %682 = vector.broadcast %681 : vector<20x1xf32> to vector<20x65xf32>
    %683 = arith.mulf %682, %643 : vector<20x65xf32>
    %684 = arith.truncf %683 : vector<20x65xf32> to vector<20x65xbf16>
    %cst_119 = arith.constant dense<0.000000e+00> : vector<2x65xf32>
    %685 = tpu.matmul %644, %684, %cst_119 {dimension_numbers = #tpu.dot_dimension_numbers<[1], [0], [0], [1], [0, 0, 1, 1], [], []>} : vector<2x20xbf16>, vector<20x65xbf16>, vector<2x65xf32> -> vector<2x65xf32>
    %686 = vector.extract_strided_slice %685 {offsets = [0, 0], sizes = [2, 64], strides = [1, 1]} : vector<2x65xf32> to vector<2x64xf32>
    %687 = vector.extract_strided_slice %685 {offsets = [0, 64], sizes = [2, 1], strides = [1, 1]} : vector<2x65xf32> to vector<2x1xf32>
    %688 = tpu.reciprocal %687 {approx = true} : vector<2x1xf32> -> vector<2x1xf32>
    %689 = vector.broadcast %688 : vector<2x1xf32> to vector<2x64xf32>
    %690 = arith.mulf %686, %689 : vector<2x64xf32>
    %691 = tpu.concatenate %666, %690 in 1 : vector<2x16xf32>, vector<2x64xf32> -> vector<2x80xf32>
    %692 = arith.truncf %691 : vector<2x80xf32> to vector<2x80xbf16>
    %cst_120 = arith.constant dense<0.000000e+00> : vector<2x120xf32>
    %693 = tpu.matmul %692, %652, %cst_120 {dimension_numbers = #tpu.dot_dimension_numbers<[1], [0], [0], [1], [0, 0, 1, 1], [], []>} : vector<2x80xbf16>, vector<80x120xbf16>, vector<2x120xf32> -> vector<2x120xf32>
    %694 = vector.extract_strided_slice %693 {offsets = [0, 0], sizes = [2, 96], strides = [1, 1]} : vector<2x120xf32> to vector<2x96xf32>
    %695 = arith.addf %694, %656 : vector<2x96xf32>
    %696 = vector.extract_strided_slice %693 {offsets = [0, 96], sizes = [2, 24], strides = [1, 1]} : vector<2x120xf32> to vector<2x24xf32>
    %697 = vector.extract_strided_slice %695 {offsets = [0, 0], sizes = [2, 32], strides = [1, 1]} : vector<2x96xf32> to vector<2x32xf32>
    %698 = vector.extract_strided_slice %672 {offsets = [0, 0], sizes = [2, 32], strides = [1, 1]} : vector<2x96xf32> to vector<2x32xf32>
    %699 = arith.addf %697, %698 : vector<2x32xf32>
    %700 = arith.negf %699 : vector<2x32xf32>
    %701 = math.exp %700 : vector<2x32xf32>
    %cst_121 = arith.constant 1.000000e+00 : f32
    %702 = vector.broadcast %cst_121 : f32 to vector<2x32xf32>
    %703 = arith.addf %702, %701 : vector<2x32xf32>
    %704 = arith.divf %702, %703 : vector<2x32xf32>
    %705 = vector.extract_strided_slice %695 {offsets = [0, 32], sizes = [2, 32], strides = [1, 1]} : vector<2x96xf32> to vector<2x32xf32>
    %706 = vector.extract_strided_slice %672 {offsets = [0, 32], sizes = [2, 32], strides = [1, 1]} : vector<2x96xf32> to vector<2x32xf32>
    %707 = arith.addf %705, %706 : vector<2x32xf32>
    %708 = arith.negf %707 : vector<2x32xf32>
    %709 = math.exp %708 : vector<2x32xf32>
    %cst_122 = arith.constant 1.000000e+00 : f32
    %710 = vector.broadcast %cst_122 : f32 to vector<2x32xf32>
    %711 = arith.addf %710, %709 : vector<2x32xf32>
    %712 = arith.divf %710, %711 : vector<2x32xf32>
    %713 = vector.extract_strided_slice %695 {offsets = [0, 64], sizes = [2, 32], strides = [1, 1]} : vector<2x96xf32> to vector<2x32xf32>
    %714 = vector.extract_strided_slice %672 {offsets = [0, 64], sizes = [2, 32], strides = [1, 1]} : vector<2x96xf32> to vector<2x32xf32>
    %715 = arith.mulf %704, %714 : vector<2x32xf32>
    %716 = arith.addf %713, %715 : vector<2x32xf32>
    %717 = math.tanh %716 : vector<2x32xf32>
    %cst_123 = arith.constant 1.000000e+00 : f32
    %718 = vector.broadcast %cst_123 : f32 to vector<2x32xf32>
    %719 = arith.subf %718, %712 : vector<2x32xf32>
    %720 = arith.mulf %719, %717 : vector<2x32xf32>
    %721 = arith.mulf %712, %632 : vector<2x32xf32>
    %722 = arith.addf %720, %721 : vector<2x32xf32>
    %723 = arith.truncf %722 : vector<2x32xf32> to vector<2x32xbf16>
    %cst_124 = arith.constant dense<0.000000e+00> : vector<2x24xf32>
    %724 = tpu.matmul %723, %653, %cst_124 {dimension_numbers = #tpu.dot_dimension_numbers<[1], [0], [0], [1], [0, 0, 1, 1], [], []>} : vector<2x32xbf16>, vector<32x24xbf16>, vector<2x24xf32> -> vector<2x24xf32>
    %725 = arith.addf %724, %696 : vector<2x24xf32>
    %726 = arith.addf %725, %662 : vector<2x24xf32>
    %cst_125 = arith.constant dense<0xFF800000> : vector<2xf32>
    %727 = vector.multi_reduction <maximumf>, %726, %cst_125 [1] : vector<2x24xf32> to vector<2xf32>
    %728 = vector.shape_cast %727 : vector<2xf32> to vector<2x1xf32>
    %729 = vector.broadcast %728 : vector<2x1xf32> to vector<2x24xf32>
    %730 = arith.cmpf oeq, %726, %729 : vector<2x24xf32>
    %c24_i32 = arith.constant 24 : i32
    %731 = vector.broadcast %c24_i32 : i32 to vector<2x24xi32>
    %732 = arith.select %730, %664, %731 : vector<2x24xi1>, vector<2x24xi32>
    %cst_126 = arith.constant dense<2147483647> : vector<2xi32>
    %733 = vector.multi_reduction <minsi>, %732, %cst_126 [1] : vector<2x24xi32> to vector<2xi32>
    %734 = vector.shape_cast %733 : vector<2xi32> to vector<2x1xi32>
    %735 = vector.broadcast %734 : vector<2x1xi32> to vector<2x24xi32>
    %736 = arith.cmpi eq, %664, %735 : vector<2x24xi32>
    %737 = arith.extui %736 : vector<2x24xi1> to vector<2x24xi32>
    %738 = arith.sitofp %737 : vector<2x24xi32> to vector<2x24xf32>
    %739 = arith.truncf %738 : vector<2x24xf32> to vector<2x24xbf16>
    %cst_127 = arith.constant dense<0.000000e+00> : vector<2x16xf32>
    %740 = tpu.matmul %739, %663, %cst_127 {dimension_numbers = #tpu.dot_dimension_numbers<[1], [0], [0], [1], [0, 0, 1, 1], [], []>} : vector<2x24xbf16>, vector<24x16xbf16>, vector<2x16xf32> -> vector<2x16xf32>
    %741 = arith.truncf %722 : vector<2x32xf32> to vector<2x32xbf16>
    %cst_128 = arith.constant dense<0.000000e+00> : vector<2x128xf32>
    %742 = tpu.matmul %741, %645, %cst_128 {dimension_numbers = #tpu.dot_dimension_numbers<[1], [0], [0], [1], [0, 0, 1, 1], [], []>} : vector<2x32xbf16>, vector<32x128xbf16>, vector<2x128xf32> -> vector<2x128xf32>
    %743 = vector.extract_strided_slice %742 {offsets = [0, 0], sizes = [2, 32], strides = [1, 1]} : vector<2x128xf32> to vector<2x32xf32>
    %744 = vector.extract_strided_slice %742 {offsets = [0, 32], sizes = [2, 96], strides = [1, 1]} : vector<2x128xf32> to vector<2x96xf32>
    %745 = arith.addf %744, %659 : vector<2x96xf32>
    %746 = tpu.concatenate %743, %743, %743, %743, %743, %743, %743, %743, %743, %743 in 0 : vector<2x32xf32>, vector<2x32xf32>, vector<2x32xf32>, vector<2x32xf32>, vector<2x32xf32>, vector<2x32xf32>, vector<2x32xf32>, vector<2x32xf32>, vector<2x32xf32>, vector<2x32xf32> -> vector<20x32xf32>
    %747 = arith.addf %641, %746 : vector<20x32xf32>
    %748 = math.tanh %747 : vector<20x32xf32>
    %749 = arith.mulf %748, %648 : vector<20x32xf32>
    %cst_129 = arith.constant dense<0.000000e+00> : vector<20xf32>
    %750 = vector.multi_reduction <add>, %749, %cst_129 [1] : vector<20x32xf32> to vector<20xf32>
    %751 = vector.shape_cast %750 : vector<20xf32> to vector<20x1xf32>
    %752 = vector.broadcast %651 : vector<1x1xf32> to vector<20x1xf32>
    %753 = arith.subf %751, %752 : vector<20x1xf32>
    %754 = math.exp %753 : vector<20x1xf32>
    %755 = vector.broadcast %754 : vector<20x1xf32> to vector<20x65xf32>
    %756 = arith.mulf %755, %643 : vector<20x65xf32>
    %757 = arith.truncf %756 : vector<20x65xf32> to vector<20x65xbf16>
    %cst_130 = arith.constant dense<0.000000e+00> : vector<2x65xf32>
    %758 = tpu.matmul %644, %757, %cst_130 {dimension_numbers = #tpu.dot_dimension_numbers<[1], [0], [0], [1], [0, 0, 1, 1], [], []>} : vector<2x20xbf16>, vector<20x65xbf16>, vector<2x65xf32> -> vector<2x65xf32>
    %759 = vector.extract_strided_slice %758 {offsets = [0, 0], sizes = [2, 64], strides = [1, 1]} : vector<2x65xf32> to vector<2x64xf32>
    %760 = vector.extract_strided_slice %758 {offsets = [0, 64], sizes = [2, 1], strides = [1, 1]} : vector<2x65xf32> to vector<2x1xf32>
    %761 = tpu.reciprocal %760 {approx = true} : vector<2x1xf32> -> vector<2x1xf32>
    %762 = vector.broadcast %761 : vector<2x1xf32> to vector<2x64xf32>
    %763 = arith.mulf %759, %762 : vector<2x64xf32>
    %764 = tpu.concatenate %740, %763 in 1 : vector<2x16xf32>, vector<2x64xf32> -> vector<2x80xf32>
    %765 = arith.truncf %764 : vector<2x80xf32> to vector<2x80xbf16>
    %cst_131 = arith.constant dense<0.000000e+00> : vector<2x120xf32>
    %766 = tpu.matmul %765, %652, %cst_131 {dimension_numbers = #tpu.dot_dimension_numbers<[1], [0], [0], [1], [0, 0, 1, 1], [], []>} : vector<2x80xbf16>, vector<80x120xbf16>, vector<2x120xf32> -> vector<2x120xf32>
    %767 = vector.extract_strided_slice %766 {offsets = [0, 0], sizes = [2, 96], strides = [1, 1]} : vector<2x120xf32> to vector<2x96xf32>
    %768 = arith.addf %767, %656 : vector<2x96xf32>
    %769 = vector.extract_strided_slice %766 {offsets = [0, 96], sizes = [2, 24], strides = [1, 1]} : vector<2x120xf32> to vector<2x24xf32>
    %770 = vector.extract_strided_slice %768 {offsets = [0, 0], sizes = [2, 32], strides = [1, 1]} : vector<2x96xf32> to vector<2x32xf32>
    %771 = vector.extract_strided_slice %745 {offsets = [0, 0], sizes = [2, 32], strides = [1, 1]} : vector<2x96xf32> to vector<2x32xf32>
    %772 = arith.addf %770, %771 : vector<2x32xf32>
    %773 = arith.negf %772 : vector<2x32xf32>
    %774 = math.exp %773 : vector<2x32xf32>
    %cst_132 = arith.constant 1.000000e+00 : f32
    %775 = vector.broadcast %cst_132 : f32 to vector<2x32xf32>
    %776 = arith.addf %775, %774 : vector<2x32xf32>
    %777 = arith.divf %775, %776 : vector<2x32xf32>
    %778 = vector.extract_strided_slice %768 {offsets = [0, 32], sizes = [2, 32], strides = [1, 1]} : vector<2x96xf32> to vector<2x32xf32>
    %779 = vector.extract_strided_slice %745 {offsets = [0, 32], sizes = [2, 32], strides = [1, 1]} : vector<2x96xf32> to vector<2x32xf32>
    %780 = arith.addf %778, %779 : vector<2x32xf32>
    %781 = arith.negf %780 : vector<2x32xf32>
    %782 = math.exp %781 : vector<2x32xf32>
    %cst_133 = arith.constant 1.000000e+00 : f32
    %783 = vector.broadcast %cst_133 : f32 to vector<2x32xf32>
    %784 = arith.addf %783, %782 : vector<2x32xf32>
    %785 = arith.divf %783, %784 : vector<2x32xf32>
    %786 = vector.extract_strided_slice %768 {offsets = [0, 64], sizes = [2, 32], strides = [1, 1]} : vector<2x96xf32> to vector<2x32xf32>
    %787 = vector.extract_strided_slice %745 {offsets = [0, 64], sizes = [2, 32], strides = [1, 1]} : vector<2x96xf32> to vector<2x32xf32>
    %788 = arith.mulf %777, %787 : vector<2x32xf32>
    %789 = arith.addf %786, %788 : vector<2x32xf32>
    %790 = math.tanh %789 : vector<2x32xf32>
    %cst_134 = arith.constant 1.000000e+00 : f32
    %791 = vector.broadcast %cst_134 : f32 to vector<2x32xf32>
    %792 = arith.subf %791, %785 : vector<2x32xf32>
    %793 = arith.mulf %792, %790 : vector<2x32xf32>
    %794 = arith.mulf %785, %722 : vector<2x32xf32>
    %795 = arith.addf %793, %794 : vector<2x32xf32>
    %796 = arith.truncf %795 : vector<2x32xf32> to vector<2x32xbf16>
    %cst_135 = arith.constant dense<0.000000e+00> : vector<2x24xf32>
    %797 = tpu.matmul %796, %653, %cst_135 {dimension_numbers = #tpu.dot_dimension_numbers<[1], [0], [0], [1], [0, 0, 1, 1], [], []>} : vector<2x32xbf16>, vector<32x24xbf16>, vector<2x24xf32> -> vector<2x24xf32>
    %798 = arith.addf %797, %769 : vector<2x24xf32>
    %799 = arith.addf %798, %662 : vector<2x24xf32>
    %cst_136 = arith.constant dense<0xFF800000> : vector<2xf32>
    %800 = vector.multi_reduction <maximumf>, %799, %cst_136 [1] : vector<2x24xf32> to vector<2xf32>
    %801 = vector.shape_cast %800 : vector<2xf32> to vector<2x1xf32>
    %802 = vector.broadcast %801 : vector<2x1xf32> to vector<2x24xf32>
    %803 = arith.cmpf oeq, %799, %802 : vector<2x24xf32>
    %c24_i32_137 = arith.constant 24 : i32
    %804 = vector.broadcast %c24_i32_137 : i32 to vector<2x24xi32>
    %805 = arith.select %803, %664, %804 : vector<2x24xi1>, vector<2x24xi32>
    %cst_138 = arith.constant dense<2147483647> : vector<2xi32>
    %806 = vector.multi_reduction <minsi>, %805, %cst_138 [1] : vector<2x24xi32> to vector<2xi32>
    %807 = vector.shape_cast %806 : vector<2xi32> to vector<2x1xi32>
    %808 = vector.broadcast %807 : vector<2x1xi32> to vector<2x24xi32>
    %809 = arith.cmpi eq, %664, %808 : vector<2x24xi32>
    %810 = arith.extui %809 : vector<2x24xi1> to vector<2x24xi32>
    %811 = arith.sitofp %810 : vector<2x24xi32> to vector<2x24xf32>
    %812 = arith.truncf %811 : vector<2x24xf32> to vector<2x24xbf16>
    %cst_139 = arith.constant dense<0.000000e+00> : vector<2x16xf32>
    %813 = tpu.matmul %812, %663, %cst_139 {dimension_numbers = #tpu.dot_dimension_numbers<[1], [0], [0], [1], [0, 0, 1, 1], [], []>} : vector<2x24xbf16>, vector<24x16xbf16>, vector<2x16xf32> -> vector<2x16xf32>
    %814 = arith.truncf %795 : vector<2x32xf32> to vector<2x32xbf16>
    %cst_140 = arith.constant dense<0.000000e+00> : vector<2x128xf32>
    %815 = tpu.matmul %814, %645, %cst_140 {dimension_numbers = #tpu.dot_dimension_numbers<[1], [0], [0], [1], [0, 0, 1, 1], [], []>} : vector<2x32xbf16>, vector<32x128xbf16>, vector<2x128xf32> -> vector<2x128xf32>
    %816 = vector.extract_strided_slice %815 {offsets = [0, 0], sizes = [2, 32], strides = [1, 1]} : vector<2x128xf32> to vector<2x32xf32>
    %817 = vector.extract_strided_slice %815 {offsets = [0, 32], sizes = [2, 96], strides = [1, 1]} : vector<2x128xf32> to vector<2x96xf32>
    %818 = arith.addf %817, %659 : vector<2x96xf32>
    %819 = tpu.concatenate %816, %816, %816, %816, %816, %816, %816, %816, %816, %816 in 0 : vector<2x32xf32>, vector<2x32xf32>, vector<2x32xf32>, vector<2x32xf32>, vector<2x32xf32>, vector<2x32xf32>, vector<2x32xf32>, vector<2x32xf32>, vector<2x32xf32>, vector<2x32xf32> -> vector<20x32xf32>
    %820 = arith.addf %641, %819 : vector<20x32xf32>
    %821 = math.tanh %820 : vector<20x32xf32>
    %822 = arith.mulf %821, %648 : vector<20x32xf32>
    %cst_141 = arith.constant dense<0.000000e+00> : vector<20xf32>
    %823 = vector.multi_reduction <add>, %822, %cst_141 [1] : vector<20x32xf32> to vector<20xf32>
    %824 = vector.shape_cast %823 : vector<20xf32> to vector<20x1xf32>
    %825 = vector.broadcast %651 : vector<1x1xf32> to vector<20x1xf32>
    %826 = arith.subf %824, %825 : vector<20x1xf32>
    %827 = math.exp %826 : vector<20x1xf32>
    %828 = vector.broadcast %827 : vector<20x1xf32> to vector<20x65xf32>
    %829 = arith.mulf %828, %643 : vector<20x65xf32>
    %830 = arith.truncf %829 : vector<20x65xf32> to vector<20x65xbf16>
    %cst_142 = arith.constant dense<0.000000e+00> : vector<2x65xf32>
    %831 = tpu.matmul %644, %830, %cst_142 {dimension_numbers = #tpu.dot_dimension_numbers<[1], [0], [0], [1], [0, 0, 1, 1], [], []>} : vector<2x20xbf16>, vector<20x65xbf16>, vector<2x65xf32> -> vector<2x65xf32>
    %832 = vector.extract_strided_slice %831 {offsets = [0, 0], sizes = [2, 64], strides = [1, 1]} : vector<2x65xf32> to vector<2x64xf32>
    %833 = vector.extract_strided_slice %831 {offsets = [0, 64], sizes = [2, 1], strides = [1, 1]} : vector<2x65xf32> to vector<2x1xf32>
    %834 = tpu.reciprocal %833 {approx = true} : vector<2x1xf32> -> vector<2x1xf32>
    %835 = vector.broadcast %834 : vector<2x1xf32> to vector<2x64xf32>
    %836 = arith.mulf %832, %835 : vector<2x64xf32>
    %837 = tpu.concatenate %813, %836 in 1 : vector<2x16xf32>, vector<2x64xf32> -> vector<2x80xf32>
    %838 = arith.truncf %837 : vector<2x80xf32> to vector<2x80xbf16>
    %cst_143 = arith.constant dense<0.000000e+00> : vector<2x120xf32>
    %839 = tpu.matmul %838, %652, %cst_143 {dimension_numbers = #tpu.dot_dimension_numbers<[1], [0], [0], [1], [0, 0, 1, 1], [], []>} : vector<2x80xbf16>, vector<80x120xbf16>, vector<2x120xf32> -> vector<2x120xf32>
    %840 = vector.extract_strided_slice %839 {offsets = [0, 0], sizes = [2, 96], strides = [1, 1]} : vector<2x120xf32> to vector<2x96xf32>
    %841 = arith.addf %840, %656 : vector<2x96xf32>
    %842 = vector.extract_strided_slice %839 {offsets = [0, 96], sizes = [2, 24], strides = [1, 1]} : vector<2x120xf32> to vector<2x24xf32>
    %843 = vector.extract_strided_slice %841 {offsets = [0, 0], sizes = [2, 32], strides = [1, 1]} : vector<2x96xf32> to vector<2x32xf32>
    %844 = vector.extract_strided_slice %818 {offsets = [0, 0], sizes = [2, 32], strides = [1, 1]} : vector<2x96xf32> to vector<2x32xf32>
    %845 = arith.addf %843, %844 : vector<2x32xf32>
    %846 = arith.negf %845 : vector<2x32xf32>
    %847 = math.exp %846 : vector<2x32xf32>
    %cst_144 = arith.constant 1.000000e+00 : f32
    %848 = vector.broadcast %cst_144 : f32 to vector<2x32xf32>
    %849 = arith.addf %848, %847 : vector<2x32xf32>
    %850 = arith.divf %848, %849 : vector<2x32xf32>
    %851 = vector.extract_strided_slice %841 {offsets = [0, 32], sizes = [2, 32], strides = [1, 1]} : vector<2x96xf32> to vector<2x32xf32>
    %852 = vector.extract_strided_slice %818 {offsets = [0, 32], sizes = [2, 32], strides = [1, 1]} : vector<2x96xf32> to vector<2x32xf32>
    %853 = arith.addf %851, %852 : vector<2x32xf32>
    %854 = arith.negf %853 : vector<2x32xf32>
    %855 = math.exp %854 : vector<2x32xf32>
    %cst_145 = arith.constant 1.000000e+00 : f32
    %856 = vector.broadcast %cst_145 : f32 to vector<2x32xf32>
    %857 = arith.addf %856, %855 : vector<2x32xf32>
    %858 = arith.divf %856, %857 : vector<2x32xf32>
    %859 = vector.extract_strided_slice %841 {offsets = [0, 64], sizes = [2, 32], strides = [1, 1]} : vector<2x96xf32> to vector<2x32xf32>
    %860 = vector.extract_strided_slice %818 {offsets = [0, 64], sizes = [2, 32], strides = [1, 1]} : vector<2x96xf32> to vector<2x32xf32>
    %861 = arith.mulf %850, %860 : vector<2x32xf32>
    %862 = arith.addf %859, %861 : vector<2x32xf32>
    %863 = math.tanh %862 : vector<2x32xf32>
    %cst_146 = arith.constant 1.000000e+00 : f32
    %864 = vector.broadcast %cst_146 : f32 to vector<2x32xf32>
    %865 = arith.subf %864, %858 : vector<2x32xf32>
    %866 = arith.mulf %865, %863 : vector<2x32xf32>
    %867 = arith.mulf %858, %795 : vector<2x32xf32>
    %868 = arith.addf %866, %867 : vector<2x32xf32>
    %869 = arith.truncf %868 : vector<2x32xf32> to vector<2x32xbf16>
    %cst_147 = arith.constant dense<0.000000e+00> : vector<2x24xf32>
    %870 = tpu.matmul %869, %653, %cst_147 {dimension_numbers = #tpu.dot_dimension_numbers<[1], [0], [0], [1], [0, 0, 1, 1], [], []>} : vector<2x32xbf16>, vector<32x24xbf16>, vector<2x24xf32> -> vector<2x24xf32>
    %871 = arith.addf %870, %842 : vector<2x24xf32>
    %872 = arith.addf %871, %662 : vector<2x24xf32>
    %c3 = arith.constant 3 : index
    %c0_148 = arith.constant 0 : index
    %c0_149 = arith.constant 0 : index
    %873 = vector.load %arg1[%c3, %c0_148, %c0_149] : memref<8x2x16xf32, #tpu.memory_space<vmem>>, vector<1x2x16xf32>
    %874 = vector.shape_cast %873 : vector<1x2x16xf32> to vector<2x16xf32>
    %875 = arith.truncf %868 : vector<2x32xf32> to vector<2x32xbf16>
    %cst_150 = arith.constant dense<0.000000e+00> : vector<2x128xf32>
    %876 = tpu.matmul %875, %645, %cst_150 {dimension_numbers = #tpu.dot_dimension_numbers<[1], [0], [0], [1], [0, 0, 1, 1], [], []>} : vector<2x32xbf16>, vector<32x128xbf16>, vector<2x128xf32> -> vector<2x128xf32>
    %877 = vector.extract_strided_slice %876 {offsets = [0, 0], sizes = [2, 32], strides = [1, 1]} : vector<2x128xf32> to vector<2x32xf32>
    %878 = vector.extract_strided_slice %876 {offsets = [0, 32], sizes = [2, 96], strides = [1, 1]} : vector<2x128xf32> to vector<2x96xf32>
    %879 = arith.addf %878, %659 : vector<2x96xf32>
    %880 = tpu.concatenate %877, %877, %877, %877, %877, %877, %877, %877, %877, %877 in 0 : vector<2x32xf32>, vector<2x32xf32>, vector<2x32xf32>, vector<2x32xf32>, vector<2x32xf32>, vector<2x32xf32>, vector<2x32xf32>, vector<2x32xf32>, vector<2x32xf32>, vector<2x32xf32> -> vector<20x32xf32>
    %881 = arith.addf %641, %880 : vector<20x32xf32>
    %882 = math.tanh %881 : vector<20x32xf32>
    %883 = arith.mulf %882, %648 : vector<20x32xf32>
    %cst_151 = arith.constant dense<0.000000e+00> : vector<20xf32>
    %884 = vector.multi_reduction <add>, %883, %cst_151 [1] : vector<20x32xf32> to vector<20xf32>
    %885 = vector.shape_cast %884 : vector<20xf32> to vector<20x1xf32>
    %886 = vector.broadcast %651 : vector<1x1xf32> to vector<20x1xf32>
    %887 = arith.subf %885, %886 : vector<20x1xf32>
    %888 = math.exp %887 : vector<20x1xf32>
    %889 = vector.broadcast %888 : vector<20x1xf32> to vector<20x65xf32>
    %890 = arith.mulf %889, %643 : vector<20x65xf32>
    %891 = arith.truncf %890 : vector<20x65xf32> to vector<20x65xbf16>
    %cst_152 = arith.constant dense<0.000000e+00> : vector<2x65xf32>
    %892 = tpu.matmul %644, %891, %cst_152 {dimension_numbers = #tpu.dot_dimension_numbers<[1], [0], [0], [1], [0, 0, 1, 1], [], []>} : vector<2x20xbf16>, vector<20x65xbf16>, vector<2x65xf32> -> vector<2x65xf32>
    %893 = vector.extract_strided_slice %892 {offsets = [0, 0], sizes = [2, 64], strides = [1, 1]} : vector<2x65xf32> to vector<2x64xf32>
    %894 = vector.extract_strided_slice %892 {offsets = [0, 64], sizes = [2, 1], strides = [1, 1]} : vector<2x65xf32> to vector<2x1xf32>
    %895 = tpu.reciprocal %894 {approx = true} : vector<2x1xf32> -> vector<2x1xf32>
    %896 = vector.broadcast %895 : vector<2x1xf32> to vector<2x64xf32>
    %897 = arith.mulf %893, %896 : vector<2x64xf32>
    %898 = tpu.concatenate %874, %897 in 1 : vector<2x16xf32>, vector<2x64xf32> -> vector<2x80xf32>
    %899 = arith.truncf %898 : vector<2x80xf32> to vector<2x80xbf16>
    %cst_153 = arith.constant dense<0.000000e+00> : vector<2x120xf32>
    %900 = tpu.matmul %899, %652, %cst_153 {dimension_numbers = #tpu.dot_dimension_numbers<[1], [0], [0], [1], [0, 0, 1, 1], [], []>} : vector<2x80xbf16>, vector<80x120xbf16>, vector<2x120xf32> -> vector<2x120xf32>
    %901 = vector.extract_strided_slice %900 {offsets = [0, 0], sizes = [2, 96], strides = [1, 1]} : vector<2x120xf32> to vector<2x96xf32>
    %902 = arith.addf %901, %656 : vector<2x96xf32>
    %903 = vector.extract_strided_slice %900 {offsets = [0, 96], sizes = [2, 24], strides = [1, 1]} : vector<2x120xf32> to vector<2x24xf32>
    %904 = vector.extract_strided_slice %902 {offsets = [0, 0], sizes = [2, 32], strides = [1, 1]} : vector<2x96xf32> to vector<2x32xf32>
    %905 = vector.extract_strided_slice %879 {offsets = [0, 0], sizes = [2, 32], strides = [1, 1]} : vector<2x96xf32> to vector<2x32xf32>
    %906 = arith.addf %904, %905 : vector<2x32xf32>
    %907 = arith.negf %906 : vector<2x32xf32>
    %908 = math.exp %907 : vector<2x32xf32>
    %cst_154 = arith.constant 1.000000e+00 : f32
    %909 = vector.broadcast %cst_154 : f32 to vector<2x32xf32>
    %910 = arith.addf %909, %908 : vector<2x32xf32>
    %911 = arith.divf %909, %910 : vector<2x32xf32>
    %912 = vector.extract_strided_slice %902 {offsets = [0, 32], sizes = [2, 32], strides = [1, 1]} : vector<2x96xf32> to vector<2x32xf32>
    %913 = vector.extract_strided_slice %879 {offsets = [0, 32], sizes = [2, 32], strides = [1, 1]} : vector<2x96xf32> to vector<2x32xf32>
    %914 = arith.addf %912, %913 : vector<2x32xf32>
    %915 = arith.negf %914 : vector<2x32xf32>
    %916 = math.exp %915 : vector<2x32xf32>
    %cst_155 = arith.constant 1.000000e+00 : f32
    %917 = vector.broadcast %cst_155 : f32 to vector<2x32xf32>
    %918 = arith.addf %917, %916 : vector<2x32xf32>
    %919 = arith.divf %917, %918 : vector<2x32xf32>
    %920 = vector.extract_strided_slice %902 {offsets = [0, 64], sizes = [2, 32], strides = [1, 1]} : vector<2x96xf32> to vector<2x32xf32>
    %921 = vector.extract_strided_slice %879 {offsets = [0, 64], sizes = [2, 32], strides = [1, 1]} : vector<2x96xf32> to vector<2x32xf32>
    %922 = arith.mulf %911, %921 : vector<2x32xf32>
    %923 = arith.addf %920, %922 : vector<2x32xf32>
    %924 = math.tanh %923 : vector<2x32xf32>
    %cst_156 = arith.constant 1.000000e+00 : f32
    %925 = vector.broadcast %cst_156 : f32 to vector<2x32xf32>
    %926 = arith.subf %925, %919 : vector<2x32xf32>
    %927 = arith.mulf %926, %924 : vector<2x32xf32>
    %928 = arith.mulf %919, %868 : vector<2x32xf32>
    %929 = arith.addf %927, %928 : vector<2x32xf32>
    %930 = arith.truncf %929 : vector<2x32xf32> to vector<2x32xbf16>
    %cst_157 = arith.constant dense<0.000000e+00> : vector<2x24xf32>
    %931 = tpu.matmul %930, %653, %cst_157 {dimension_numbers = #tpu.dot_dimension_numbers<[1], [0], [0], [1], [0, 0, 1, 1], [], []>} : vector<2x32xbf16>, vector<32x24xbf16>, vector<2x24xf32> -> vector<2x24xf32>
    %932 = arith.addf %931, %903 : vector<2x24xf32>
    %933 = arith.addf %932, %662 : vector<2x24xf32>
    %c4 = arith.constant 4 : index
    %c0_158 = arith.constant 0 : index
    %c0_159 = arith.constant 0 : index
    %934 = vector.load %arg1[%c4, %c0_158, %c0_159] : memref<8x2x16xf32, #tpu.memory_space<vmem>>, vector<1x2x16xf32>
    %935 = vector.shape_cast %934 : vector<1x2x16xf32> to vector<2x16xf32>
    %936 = arith.truncf %929 : vector<2x32xf32> to vector<2x32xbf16>
    %cst_160 = arith.constant dense<0.000000e+00> : vector<2x128xf32>
    %937 = tpu.matmul %936, %645, %cst_160 {dimension_numbers = #tpu.dot_dimension_numbers<[1], [0], [0], [1], [0, 0, 1, 1], [], []>} : vector<2x32xbf16>, vector<32x128xbf16>, vector<2x128xf32> -> vector<2x128xf32>
    %938 = vector.extract_strided_slice %937 {offsets = [0, 0], sizes = [2, 32], strides = [1, 1]} : vector<2x128xf32> to vector<2x32xf32>
    %939 = vector.extract_strided_slice %937 {offsets = [0, 32], sizes = [2, 96], strides = [1, 1]} : vector<2x128xf32> to vector<2x96xf32>
    %940 = arith.addf %939, %659 : vector<2x96xf32>
    %941 = tpu.concatenate %938, %938, %938, %938, %938, %938, %938, %938, %938, %938 in 0 : vector<2x32xf32>, vector<2x32xf32>, vector<2x32xf32>, vector<2x32xf32>, vector<2x32xf32>, vector<2x32xf32>, vector<2x32xf32>, vector<2x32xf32>, vector<2x32xf32>, vector<2x32xf32> -> vector<20x32xf32>
    %942 = arith.addf %641, %941 : vector<20x32xf32>
    %943 = math.tanh %942 : vector<20x32xf32>
    %944 = arith.mulf %943, %648 : vector<20x32xf32>
    %cst_161 = arith.constant dense<0.000000e+00> : vector<20xf32>
    %945 = vector.multi_reduction <add>, %944, %cst_161 [1] : vector<20x32xf32> to vector<20xf32>
    %946 = vector.shape_cast %945 : vector<20xf32> to vector<20x1xf32>
    %947 = vector.broadcast %651 : vector<1x1xf32> to vector<20x1xf32>
    %948 = arith.subf %946, %947 : vector<20x1xf32>
    %949 = math.exp %948 : vector<20x1xf32>
    %950 = vector.broadcast %949 : vector<20x1xf32> to vector<20x65xf32>
    %951 = arith.mulf %950, %643 : vector<20x65xf32>
    %952 = arith.truncf %951 : vector<20x65xf32> to vector<20x65xbf16>
    %cst_162 = arith.constant dense<0.000000e+00> : vector<2x65xf32>
    %953 = tpu.matmul %644, %952, %cst_162 {dimension_numbers = #tpu.dot_dimension_numbers<[1], [0], [0], [1], [0, 0, 1, 1], [], []>} : vector<2x20xbf16>, vector<20x65xbf16>, vector<2x65xf32> -> vector<2x65xf32>
    %954 = vector.extract_strided_slice %953 {offsets = [0, 0], sizes = [2, 64], strides = [1, 1]} : vector<2x65xf32> to vector<2x64xf32>
    %955 = vector.extract_strided_slice %953 {offsets = [0, 64], sizes = [2, 1], strides = [1, 1]} : vector<2x65xf32> to vector<2x1xf32>
    %956 = tpu.reciprocal %955 {approx = true} : vector<2x1xf32> -> vector<2x1xf32>
    %957 = vector.broadcast %956 : vector<2x1xf32> to vector<2x64xf32>
    %958 = arith.mulf %954, %957 : vector<2x64xf32>
    %959 = tpu.concatenate %935, %958 in 1 : vector<2x16xf32>, vector<2x64xf32> -> vector<2x80xf32>
    %960 = arith.truncf %959 : vector<2x80xf32> to vector<2x80xbf16>
    %cst_163 = arith.constant dense<0.000000e+00> : vector<2x120xf32>
    %961 = tpu.matmul %960, %652, %cst_163 {dimension_numbers = #tpu.dot_dimension_numbers<[1], [0], [0], [1], [0, 0, 1, 1], [], []>} : vector<2x80xbf16>, vector<80x120xbf16>, vector<2x120xf32> -> vector<2x120xf32>
    %962 = vector.extract_strided_slice %961 {offsets = [0, 0], sizes = [2, 96], strides = [1, 1]} : vector<2x120xf32> to vector<2x96xf32>
    %963 = arith.addf %962, %656 : vector<2x96xf32>
    %964 = vector.extract_strided_slice %961 {offsets = [0, 96], sizes = [2, 24], strides = [1, 1]} : vector<2x120xf32> to vector<2x24xf32>
    %965 = vector.extract_strided_slice %963 {offsets = [0, 0], sizes = [2, 32], strides = [1, 1]} : vector<2x96xf32> to vector<2x32xf32>
    %966 = vector.extract_strided_slice %940 {offsets = [0, 0], sizes = [2, 32], strides = [1, 1]} : vector<2x96xf32> to vector<2x32xf32>
    %967 = arith.addf %965, %966 : vector<2x32xf32>
    %968 = arith.negf %967 : vector<2x32xf32>
    %969 = math.exp %968 : vector<2x32xf32>
    %cst_164 = arith.constant 1.000000e+00 : f32
    %970 = vector.broadcast %cst_164 : f32 to vector<2x32xf32>
    %971 = arith.addf %970, %969 : vector<2x32xf32>
    %972 = arith.divf %970, %971 : vector<2x32xf32>
    %973 = vector.extract_strided_slice %963 {offsets = [0, 32], sizes = [2, 32], strides = [1, 1]} : vector<2x96xf32> to vector<2x32xf32>
    %974 = vector.extract_strided_slice %940 {offsets = [0, 32], sizes = [2, 32], strides = [1, 1]} : vector<2x96xf32> to vector<2x32xf32>
    %975 = arith.addf %973, %974 : vector<2x32xf32>
    %976 = arith.negf %975 : vector<2x32xf32>
    %977 = math.exp %976 : vector<2x32xf32>
    %cst_165 = arith.constant 1.000000e+00 : f32
    %978 = vector.broadcast %cst_165 : f32 to vector<2x32xf32>
    %979 = arith.addf %978, %977 : vector<2x32xf32>
    %980 = arith.divf %978, %979 : vector<2x32xf32>
    %981 = vector.extract_strided_slice %963 {offsets = [0, 64], sizes = [2, 32], strides = [1, 1]} : vector<2x96xf32> to vector<2x32xf32>
    %982 = vector.extract_strided_slice %940 {offsets = [0, 64], sizes = [2, 32], strides = [1, 1]} : vector<2x96xf32> to vector<2x32xf32>
    %983 = arith.mulf %972, %982 : vector<2x32xf32>
    %984 = arith.addf %981, %983 : vector<2x32xf32>
    %985 = math.tanh %984 : vector<2x32xf32>
    %cst_166 = arith.constant 1.000000e+00 : f32
    %986 = vector.broadcast %cst_166 : f32 to vector<2x32xf32>
    %987 = arith.subf %986, %980 : vector<2x32xf32>
    %988 = arith.mulf %987, %985 : vector<2x32xf32>
    %989 = arith.mulf %980, %929 : vector<2x32xf32>
    %990 = arith.addf %988, %989 : vector<2x32xf32>
    %991 = arith.truncf %990 : vector<2x32xf32> to vector<2x32xbf16>
    %cst_167 = arith.constant dense<0.000000e+00> : vector<2x24xf32>
    %992 = tpu.matmul %991, %653, %cst_167 {dimension_numbers = #tpu.dot_dimension_numbers<[1], [0], [0], [1], [0, 0, 1, 1], [], []>} : vector<2x32xbf16>, vector<32x24xbf16>, vector<2x24xf32> -> vector<2x24xf32>
    %993 = arith.addf %992, %964 : vector<2x24xf32>
    %994 = arith.addf %993, %662 : vector<2x24xf32>
    %cst_168 = arith.constant dense<0xFF800000> : vector<2xf32>
    %995 = vector.multi_reduction <maximumf>, %994, %cst_168 [1] : vector<2x24xf32> to vector<2xf32>
    %996 = vector.shape_cast %995 : vector<2xf32> to vector<2x1xf32>
    %997 = vector.broadcast %996 : vector<2x1xf32> to vector<2x24xf32>
    %998 = arith.cmpf oeq, %994, %997 : vector<2x24xf32>
    %c24_i32_169 = arith.constant 24 : i32
    %999 = vector.broadcast %c24_i32_169 : i32 to vector<2x24xi32>
    %1000 = arith.select %998, %664, %999 : vector<2x24xi1>, vector<2x24xi32>
    %cst_170 = arith.constant dense<2147483647> : vector<2xi32>
    %1001 = vector.multi_reduction <minsi>, %1000, %cst_170 [1] : vector<2x24xi32> to vector<2xi32>
    %1002 = vector.shape_cast %1001 : vector<2xi32> to vector<2x1xi32>
    %1003 = vector.broadcast %1002 : vector<2x1xi32> to vector<2x24xi32>
    %1004 = arith.cmpi eq, %664, %1003 : vector<2x24xi32>
    %1005 = arith.extui %1004 : vector<2x24xi1> to vector<2x24xi32>
    %1006 = arith.sitofp %1005 : vector<2x24xi32> to vector<2x24xf32>
    %1007 = arith.truncf %1006 : vector<2x24xf32> to vector<2x24xbf16>
    %cst_171 = arith.constant dense<0.000000e+00> : vector<2x16xf32>
    %1008 = tpu.matmul %1007, %663, %cst_171 {dimension_numbers = #tpu.dot_dimension_numbers<[1], [0], [0], [1], [0, 0, 1, 1], [], []>} : vector<2x24xbf16>, vector<24x16xbf16>, vector<2x16xf32> -> vector<2x16xf32>
    %1009 = arith.truncf %990 : vector<2x32xf32> to vector<2x32xbf16>
    %cst_172 = arith.constant dense<0.000000e+00> : vector<2x128xf32>
    %1010 = tpu.matmul %1009, %645, %cst_172 {dimension_numbers = #tpu.dot_dimension_numbers<[1], [0], [0], [1], [0, 0, 1, 1], [], []>} : vector<2x32xbf16>, vector<32x128xbf16>, vector<2x128xf32> -> vector<2x128xf32>
    %1011 = vector.extract_strided_slice %1010 {offsets = [0, 0], sizes = [2, 32], strides = [1, 1]} : vector<2x128xf32> to vector<2x32xf32>
    %1012 = vector.extract_strided_slice %1010 {offsets = [0, 32], sizes = [2, 96], strides = [1, 1]} : vector<2x128xf32> to vector<2x96xf32>
    %1013 = arith.addf %1012, %659 : vector<2x96xf32>
    %1014 = tpu.concatenate %1011, %1011, %1011, %1011, %1011, %1011, %1011, %1011, %1011, %1011 in 0 : vector<2x32xf32>, vector<2x32xf32>, vector<2x32xf32>, vector<2x32xf32>, vector<2x32xf32>, vector<2x32xf32>, vector<2x32xf32>, vector<2x32xf32>, vector<2x32xf32>, vector<2x32xf32> -> vector<20x32xf32>
    %1015 = arith.addf %641, %1014 : vector<20x32xf32>
    %1016 = math.tanh %1015 : vector<20x32xf32>
    %1017 = arith.mulf %1016, %648 : vector<20x32xf32>
    %cst_173 = arith.constant dense<0.000000e+00> : vector<20xf32>
    %1018 = vector.multi_reduction <add>, %1017, %cst_173 [1] : vector<20x32xf32> to vector<20xf32>
    %1019 = vector.shape_cast %1018 : vector<20xf32> to vector<20x1xf32>
    %1020 = vector.broadcast %651 : vector<1x1xf32> to vector<20x1xf32>
    %1021 = arith.subf %1019, %1020 : vector<20x1xf32>
    %1022 = math.exp %1021 : vector<20x1xf32>
    %1023 = vector.broadcast %1022 : vector<20x1xf32> to vector<20x65xf32>
    %1024 = arith.mulf %1023, %643 : vector<20x65xf32>
    %1025 = arith.truncf %1024 : vector<20x65xf32> to vector<20x65xbf16>
    %cst_174 = arith.constant dense<0.000000e+00> : vector<2x65xf32>
    %1026 = tpu.matmul %644, %1025, %cst_174 {dimension_numbers = #tpu.dot_dimension_numbers<[1], [0], [0], [1], [0, 0, 1, 1], [], []>} : vector<2x20xbf16>, vector<20x65xbf16>, vector<2x65xf32> -> vector<2x65xf32>
    %1027 = vector.extract_strided_slice %1026 {offsets = [0, 0], sizes = [2, 64], strides = [1, 1]} : vector<2x65xf32> to vector<2x64xf32>
    %1028 = vector.extract_strided_slice %1026 {offsets = [0, 64], sizes = [2, 1], strides = [1, 1]} : vector<2x65xf32> to vector<2x1xf32>
    %1029 = tpu.reciprocal %1028 {approx = true} : vector<2x1xf32> -> vector<2x1xf32>
    %1030 = vector.broadcast %1029 : vector<2x1xf32> to vector<2x64xf32>
    %1031 = arith.mulf %1027, %1030 : vector<2x64xf32>
    %1032 = tpu.concatenate %1008, %1031 in 1 : vector<2x16xf32>, vector<2x64xf32> -> vector<2x80xf32>
    %1033 = arith.truncf %1032 : vector<2x80xf32> to vector<2x80xbf16>
    %cst_175 = arith.constant dense<0.000000e+00> : vector<2x120xf32>
    %1034 = tpu.matmul %1033, %652, %cst_175 {dimension_numbers = #tpu.dot_dimension_numbers<[1], [0], [0], [1], [0, 0, 1, 1], [], []>} : vector<2x80xbf16>, vector<80x120xbf16>, vector<2x120xf32> -> vector<2x120xf32>
    %1035 = vector.extract_strided_slice %1034 {offsets = [0, 0], sizes = [2, 96], strides = [1, 1]} : vector<2x120xf32> to vector<2x96xf32>
    %1036 = arith.addf %1035, %656 : vector<2x96xf32>
    %1037 = vector.extract_strided_slice %1034 {offsets = [0, 96], sizes = [2, 24], strides = [1, 1]} : vector<2x120xf32> to vector<2x24xf32>
    %1038 = vector.extract_strided_slice %1036 {offsets = [0, 0], sizes = [2, 32], strides = [1, 1]} : vector<2x96xf32> to vector<2x32xf32>
    %1039 = vector.extract_strided_slice %1013 {offsets = [0, 0], sizes = [2, 32], strides = [1, 1]} : vector<2x96xf32> to vector<2x32xf32>
    %1040 = arith.addf %1038, %1039 : vector<2x32xf32>
    %1041 = arith.negf %1040 : vector<2x32xf32>
    %1042 = math.exp %1041 : vector<2x32xf32>
    %cst_176 = arith.constant 1.000000e+00 : f32
    %1043 = vector.broadcast %cst_176 : f32 to vector<2x32xf32>
    %1044 = arith.addf %1043, %1042 : vector<2x32xf32>
    %1045 = arith.divf %1043, %1044 : vector<2x32xf32>
    %1046 = vector.extract_strided_slice %1036 {offsets = [0, 32], sizes = [2, 32], strides = [1, 1]} : vector<2x96xf32> to vector<2x32xf32>
    %1047 = vector.extract_strided_slice %1013 {offsets = [0, 32], sizes = [2, 32], strides = [1, 1]} : vector<2x96xf32> to vector<2x32xf32>
    %1048 = arith.addf %1046, %1047 : vector<2x32xf32>
    %1049 = arith.negf %1048 : vector<2x32xf32>
    %1050 = math.exp %1049 : vector<2x32xf32>
    %cst_177 = arith.constant 1.000000e+00 : f32
    %1051 = vector.broadcast %cst_177 : f32 to vector<2x32xf32>
    %1052 = arith.addf %1051, %1050 : vector<2x32xf32>
    %1053 = arith.divf %1051, %1052 : vector<2x32xf32>
    %1054 = vector.extract_strided_slice %1036 {offsets = [0, 64], sizes = [2, 32], strides = [1, 1]} : vector<2x96xf32> to vector<2x32xf32>
    %1055 = vector.extract_strided_slice %1013 {offsets = [0, 64], sizes = [2, 32], strides = [1, 1]} : vector<2x96xf32> to vector<2x32xf32>
    %1056 = arith.mulf %1045, %1055 : vector<2x32xf32>
    %1057 = arith.addf %1054, %1056 : vector<2x32xf32>
    %1058 = math.tanh %1057 : vector<2x32xf32>
    %cst_178 = arith.constant 1.000000e+00 : f32
    %1059 = vector.broadcast %cst_178 : f32 to vector<2x32xf32>
    %1060 = arith.subf %1059, %1053 : vector<2x32xf32>
    %1061 = arith.mulf %1060, %1058 : vector<2x32xf32>
    %1062 = arith.mulf %1053, %990 : vector<2x32xf32>
    %1063 = arith.addf %1061, %1062 : vector<2x32xf32>
    %1064 = arith.truncf %1063 : vector<2x32xf32> to vector<2x32xbf16>
    %cst_179 = arith.constant dense<0.000000e+00> : vector<2x24xf32>
    %1065 = tpu.matmul %1064, %653, %cst_179 {dimension_numbers = #tpu.dot_dimension_numbers<[1], [0], [0], [1], [0, 0, 1, 1], [], []>} : vector<2x32xbf16>, vector<32x24xbf16>, vector<2x24xf32> -> vector<2x24xf32>
    %1066 = arith.addf %1065, %1037 : vector<2x24xf32>
    %1067 = arith.addf %1066, %662 : vector<2x24xf32>
    %c6 = arith.constant 6 : index
    %c0_180 = arith.constant 0 : index
    %c0_181 = arith.constant 0 : index
    %1068 = vector.load %arg1[%c6, %c0_180, %c0_181] : memref<8x2x16xf32, #tpu.memory_space<vmem>>, vector<1x2x16xf32>
    %1069 = vector.shape_cast %1068 : vector<1x2x16xf32> to vector<2x16xf32>
    %1070 = arith.truncf %1063 : vector<2x32xf32> to vector<2x32xbf16>
    %cst_182 = arith.constant dense<0.000000e+00> : vector<2x128xf32>
    %1071 = tpu.matmul %1070, %645, %cst_182 {dimension_numbers = #tpu.dot_dimension_numbers<[1], [0], [0], [1], [0, 0, 1, 1], [], []>} : vector<2x32xbf16>, vector<32x128xbf16>, vector<2x128xf32> -> vector<2x128xf32>
    %1072 = vector.extract_strided_slice %1071 {offsets = [0, 0], sizes = [2, 32], strides = [1, 1]} : vector<2x128xf32> to vector<2x32xf32>
    %1073 = vector.extract_strided_slice %1071 {offsets = [0, 32], sizes = [2, 96], strides = [1, 1]} : vector<2x128xf32> to vector<2x96xf32>
    %1074 = arith.addf %1073, %659 : vector<2x96xf32>
    %1075 = tpu.concatenate %1072, %1072, %1072, %1072, %1072, %1072, %1072, %1072, %1072, %1072 in 0 : vector<2x32xf32>, vector<2x32xf32>, vector<2x32xf32>, vector<2x32xf32>, vector<2x32xf32>, vector<2x32xf32>, vector<2x32xf32>, vector<2x32xf32>, vector<2x32xf32>, vector<2x32xf32> -> vector<20x32xf32>
    %1076 = arith.addf %641, %1075 : vector<20x32xf32>
    %1077 = math.tanh %1076 : vector<20x32xf32>
    %1078 = arith.mulf %1077, %648 : vector<20x32xf32>
    %cst_183 = arith.constant dense<0.000000e+00> : vector<20xf32>
    %1079 = vector.multi_reduction <add>, %1078, %cst_183 [1] : vector<20x32xf32> to vector<20xf32>
    %1080 = vector.shape_cast %1079 : vector<20xf32> to vector<20x1xf32>
    %1081 = vector.broadcast %651 : vector<1x1xf32> to vector<20x1xf32>
    %1082 = arith.subf %1080, %1081 : vector<20x1xf32>
    %1083 = math.exp %1082 : vector<20x1xf32>
    %1084 = vector.broadcast %1083 : vector<20x1xf32> to vector<20x65xf32>
    %1085 = arith.mulf %1084, %643 : vector<20x65xf32>
    %1086 = arith.truncf %1085 : vector<20x65xf32> to vector<20x65xbf16>
    %cst_184 = arith.constant dense<0.000000e+00> : vector<2x65xf32>
    %1087 = tpu.matmul %644, %1086, %cst_184 {dimension_numbers = #tpu.dot_dimension_numbers<[1], [0], [0], [1], [0, 0, 1, 1], [], []>} : vector<2x20xbf16>, vector<20x65xbf16>, vector<2x65xf32> -> vector<2x65xf32>
    %1088 = vector.extract_strided_slice %1087 {offsets = [0, 0], sizes = [2, 64], strides = [1, 1]} : vector<2x65xf32> to vector<2x64xf32>
    %1089 = vector.extract_strided_slice %1087 {offsets = [0, 64], sizes = [2, 1], strides = [1, 1]} : vector<2x65xf32> to vector<2x1xf32>
    %1090 = tpu.reciprocal %1089 {approx = true} : vector<2x1xf32> -> vector<2x1xf32>
    %1091 = vector.broadcast %1090 : vector<2x1xf32> to vector<2x64xf32>
    %1092 = arith.mulf %1088, %1091 : vector<2x64xf32>
    %1093 = tpu.concatenate %1069, %1092 in 1 : vector<2x16xf32>, vector<2x64xf32> -> vector<2x80xf32>
    %1094 = arith.truncf %1093 : vector<2x80xf32> to vector<2x80xbf16>
    %cst_185 = arith.constant dense<0.000000e+00> : vector<2x120xf32>
    %1095 = tpu.matmul %1094, %652, %cst_185 {dimension_numbers = #tpu.dot_dimension_numbers<[1], [0], [0], [1], [0, 0, 1, 1], [], []>} : vector<2x80xbf16>, vector<80x120xbf16>, vector<2x120xf32> -> vector<2x120xf32>
    %1096 = vector.extract_strided_slice %1095 {offsets = [0, 0], sizes = [2, 96], strides = [1, 1]} : vector<2x120xf32> to vector<2x96xf32>
    %1097 = arith.addf %1096, %656 : vector<2x96xf32>
    %1098 = vector.extract_strided_slice %1095 {offsets = [0, 96], sizes = [2, 24], strides = [1, 1]} : vector<2x120xf32> to vector<2x24xf32>
    %1099 = vector.extract_strided_slice %1097 {offsets = [0, 0], sizes = [2, 32], strides = [1, 1]} : vector<2x96xf32> to vector<2x32xf32>
    %1100 = vector.extract_strided_slice %1074 {offsets = [0, 0], sizes = [2, 32], strides = [1, 1]} : vector<2x96xf32> to vector<2x32xf32>
    %1101 = arith.addf %1099, %1100 : vector<2x32xf32>
    %1102 = arith.negf %1101 : vector<2x32xf32>
    %1103 = math.exp %1102 : vector<2x32xf32>
    %cst_186 = arith.constant 1.000000e+00 : f32
    %1104 = vector.broadcast %cst_186 : f32 to vector<2x32xf32>
    %1105 = arith.addf %1104, %1103 : vector<2x32xf32>
    %1106 = arith.divf %1104, %1105 : vector<2x32xf32>
    %1107 = vector.extract_strided_slice %1097 {offsets = [0, 32], sizes = [2, 32], strides = [1, 1]} : vector<2x96xf32> to vector<2x32xf32>
    %1108 = vector.extract_strided_slice %1074 {offsets = [0, 32], sizes = [2, 32], strides = [1, 1]} : vector<2x96xf32> to vector<2x32xf32>
    %1109 = arith.addf %1107, %1108 : vector<2x32xf32>
    %1110 = arith.negf %1109 : vector<2x32xf32>
    %1111 = math.exp %1110 : vector<2x32xf32>
    %cst_187 = arith.constant 1.000000e+00 : f32
    %1112 = vector.broadcast %cst_187 : f32 to vector<2x32xf32>
    %1113 = arith.addf %1112, %1111 : vector<2x32xf32>
    %1114 = arith.divf %1112, %1113 : vector<2x32xf32>
    %1115 = vector.extract_strided_slice %1097 {offsets = [0, 64], sizes = [2, 32], strides = [1, 1]} : vector<2x96xf32> to vector<2x32xf32>
    %1116 = vector.extract_strided_slice %1074 {offsets = [0, 64], sizes = [2, 32], strides = [1, 1]} : vector<2x96xf32> to vector<2x32xf32>
    %1117 = arith.mulf %1106, %1116 : vector<2x32xf32>
    %1118 = arith.addf %1115, %1117 : vector<2x32xf32>
    %1119 = math.tanh %1118 : vector<2x32xf32>
    %cst_188 = arith.constant 1.000000e+00 : f32
    %1120 = vector.broadcast %cst_188 : f32 to vector<2x32xf32>
    %1121 = arith.subf %1120, %1114 : vector<2x32xf32>
    %1122 = arith.mulf %1121, %1119 : vector<2x32xf32>
    %1123 = arith.mulf %1114, %1063 : vector<2x32xf32>
    %1124 = arith.addf %1122, %1123 : vector<2x32xf32>
    %1125 = arith.truncf %1124 : vector<2x32xf32> to vector<2x32xbf16>
    %cst_189 = arith.constant dense<0.000000e+00> : vector<2x24xf32>
    %1126 = tpu.matmul %1125, %653, %cst_189 {dimension_numbers = #tpu.dot_dimension_numbers<[1], [0], [0], [1], [0, 0, 1, 1], [], []>} : vector<2x32xbf16>, vector<32x24xbf16>, vector<2x24xf32> -> vector<2x24xf32>
    %1127 = arith.addf %1126, %1098 : vector<2x24xf32>
    %1128 = arith.addf %1127, %662 : vector<2x24xf32>
    %1129 = tpu.concatenate %667, %726, %799, %872, %933, %994, %1067, %1128 in 0 : vector<2x24xf32>, vector<2x24xf32>, vector<2x24xf32>, vector<2x24xf32>, vector<2x24xf32>, vector<2x24xf32>, vector<2x24xf32>, vector<2x24xf32> -> vector<16x24xf32>
    %c0_190 = arith.constant 0 : index
    %c0_191 = arith.constant 0 : index
    %1130 = vector.load %arg20[%c0_190, %c0_191] : memref<16x24xf32, #tpu.memory_space<vmem>>, vector<16x24xf32>
    tpu.vector_store %arg20[%c0_190, %c0_191], %1129 {strides = array<i32>} : memref<16x24xf32, #tpu.memory_space<vmem>>, vector<16x24xf32>,
    return
  }
}

</mosaic_0001>

<bundles_post_ra>
// kernel: tpu_custom_call.1
= control target key start
LH: loop header
LB: loop body
LE: loop exit
PB: predicated region body
PF: predicated region fallthrough
CT: control target
= control target key end

     0   :  { %s6560_s0 = inlined_call_operand.vmem [shape: bf16[20,16], index: 0, kind: input, shape index: {}]   ;;  %s6561_s1 = inlined_call_operand.vmem [shape: f32[8,2,16], index: 1, kind: input, shape index: {}]   ;;  %s6562_s2 = inlined_call_operand.vmem [shape: bf16[24,16], index: 2, kind: input, shape index: {}]   ;;  %s6563_s3 = inlined_call_operand.hbm [shape: bf16[2,20], index: 3, kind: input, shape index: {}]   ;;  %s6564_s4 = inlined_call_operand.vmem [shape: bf16[16,192], index: 4, kind: input, shape index: {}]   ;;  %s6565_s5 = inlined_call_operand.vmem [shape: f32[1,192], index: 5, kind: input, shape index: {}]   ;;  %s6566_s6 = inlined_call_operand.vmem [shape: bf16[64,192], index: 6, kind: input, shape index: {}]   ;;  %s6567_s7 = inlined_call_operand.hbm [shape: f32[1,96], index: 7, kind: input, shape index: {}]   ;;  %s6568_s8 = inlined_call_operand.hbm [shape: f32[1,96], index: 8, kind: input, shape index: {}]   ;;  %s6569_s9 = inlined_call_operand.vmem [shape: bf16[64,32], index: 9, kind: input, shape index: {}]   ;;  %s6570_s10 = inlined_call_operand.vmem [shape: f32[1,32], index: 10, kind: input, shape index: {}]   ;;  %s6571_s11 = inlined_call_operand.vmem [shape: bf16[64,32], index: 11, kind: input, shape index: {}]   ;;  %s6572_s12 = inlined_call_operand.vmem [shape: f32[1,32], index: 12, kind: input, shape index: {}]   ;;  %s6573_s13 = inlined_call_operand.vmem [shape: f32[1,32], index: 13, kind: input, shape index: {}]   ;;  %s6574_s14 = inlined_call_operand.vmem [shape: bf16[32,128], index: 14, kind: input, shape index: {}]   ;;  %s6575_s15 = inlined_call_operand.vmem [shape: f32[1,96], index: 15, kind: input, shape index: {}]   ;;  %s6576_s16 = inlined_call_operand.vmem [shape: f32[1,96], index: 16, kind: input, shape index: {}]   ;;  %s6577_s17 = inlined_call_operand.vmem [shape: bf16[80,120], index: 17, kind: input, shape index: {}]   ;;  %s6578_s18 = inlined_call_operand.vmem [shape: bf16[32,24], index: 18, kind: input, shape index: {}]   ;;  %s6579_s19 = inlined_call_operand.vmem [shape: f32[1,24], index: 19, kind: input, shape index: {}]   ;;  %s6580_s20 = inlined_call_operand.hbm [shape: f32[16,24], index: 20, kind: output, shape index: {}]  }
   0x1   :  { %6586 = sst [smem:[#allocation12_spill]] %s6560_s0 }
   0x2   :  { %6587 = sst [smem:[#allocation13_spill]] %s6561_s1 }
   0x3   :  { %6588 = sst [smem:[#allocation14_spill]] %s6562_s2 }
   0x4   :  { %6589 = sst [smem:[#allocation15_spill]] %s6563_s3 }
   0x5   :  { %6590 = sst [smem:[#allocation16_spill]] %s6564_s4 }
   0x6   :  { %25 = vsyncpa [#allocation3], 0 }
   0x7   :  { %26 = vsyncpa [#allocation6], 0 }
   0x8   :  { %27 = vsyncpa [#allocation4], 0  ;;  %s5030_s1 = smov [#allocation5]   ;;  %s5031_s23 = smov [#allocation2]  }
   0x9   :  { %s56_s22 = sshll.u32 %s5030_s1, 4  ;;  %s40_s24 = sshll.u32 %s5031_s23, 4  ;;  %s57_s22 = int_to_ptr.vmem [resolvable:$true] %s56_s22  ;;  %s41_s24 = int_to_ptr.vmem [resolvable:$true] %s40_s24 }
   0xa   :  { %s4936_s3 = scalar_lea.hbm %s6567_s7, 16 }
   0xb   :  { %p4937_p0 = scmp.ne.s32.totalorder %s6567_s7, %s4936_s3  ;;  %p4940_p1 = scmp.lt.u32.totalorder %s4936_s3, %s6567_s7 }
   0xd   :  { %p4942_p2 = pnand %p4940_p1, %p4937_p0 }
   0xf   :  { %4945 = shalt.err (!%p4942_p2)
}
  0x10   :  { %s4946_s29 = scalar_lea.vmem %s57_s22, 16  ;;  %s4950_s30 = scalar_lea.vmem %s57_s22, 32 }
  0x11   :  { %p4947_p3 = scmp.ne.s32.totalorder %s57_s22, %s4946_s29  ;;  %p4951_p4 = scmp.lt.s32.totalorder %s57_s22, %s57_s22 }
  0x12   :  { %p4952_p5 = scmp.lt.s32.totalorder %s4950_s30, %s4946_s29 }
  0x14   :  { %p4953_p6 = por %p4952_p5, %p4951_p4 }
  0x16   :  { %p4954_p7 = pnand %p4953_p6, %p4947_p3 }
  0x18   :  { %4957 = shalt.err (!%p4954_p7)
}
  0x19   :  { %59 = dma.hbm_to_vmem [thread:$0]  %s6567_s7, 16, %s57_s22, [#allocation6]  }
  0x1a   :  { %s6591_s2 = sld [smem:[#allocation15_spill]] }
  0x20   :  { %s4958_s25 = scalar_lea.hbm %s6591_s2, 16 }
  0x21   :  { %p4959_p8 = scmp.ne.s32.totalorder %s6591_s2, %s4958_s25  ;;  %p4962_p9 = scmp.lt.u32.totalorder %s4958_s25, %s6591_s2 }
  0x23   :  { %p4964_p10 = pnand %p4962_p9, %p4959_p8 }
  0x25   :  { %4967 = shalt.err (!%p4964_p10)
}
  0x26   :  { %s4968_s4 = scalar_lea.vmem %s41_s24, 16  ;;  %s4972_s29 = scalar_lea.vmem %s41_s24, 32 }
  0x27   :  { %p4969_p11 = scmp.ne.s32.totalorder %s41_s24, %s4968_s4  ;;  %p4973_p12 = scmp.lt.s32.totalorder %s41_s24, %s41_s24 }
  0x28   :  { %p4974_p13 = scmp.lt.s32.totalorder %s4972_s29, %s4968_s4 }
  0x2a   :  { %p4975_p0 = por %p4974_p13, %p4973_p12 }
  0x2c   :  { %p4976_p1 = pnand %p4975_p0, %p4969_p11 }
  0x2e   :  { %4979 = shalt.err (!%p4976_p1)
}
  0x2f   :  { %43 = dma.hbm_to_vmem [thread:$0]  %s6591_s2, 16, %s41_s24, [#allocation3]  }
  0x30   :  { %s5032_s30 = smov [#allocation7]   ;;  %s4980_s23 = scalar_lea.hbm %s6568_s8, 16 }
  0x31   :  { %s66_s0 = sshll.u32 %s5032_s30, 4  ;;  %p4981_p2 = scmp.ne.s32.totalorder %s6568_s8, %s4980_s23  ;;  %s67_s0 = int_to_ptr.vmem [resolvable:$true] %s66_s0 }
  0x32   :  { %p4984_p3 = scmp.lt.u32.totalorder %s4980_s23, %s6568_s8 }
  0x34   :  { %p4986_p4 = pnand %p4984_p3, %p4981_p2 }
  0x36   :  { %4989 = shalt.err (!%p4986_p4)
}
  0x37   :  { %s4990_s28 = scalar_lea.vmem %s67_s0, 16  ;;  %s4994_s24 = scalar_lea.vmem %s67_s0, 32 }
  0x38   :  { %p4991_p5 = scmp.ne.s32.totalorder %s67_s0, %s4990_s28  ;;  %p4995_p6 = scmp.lt.s32.totalorder %s67_s0, %s67_s0 }
  0x39   :  { %p4996_p7 = scmp.lt.s32.totalorder %s4994_s24, %s4990_s28 }
  0x3b   :  { %p4997_p8 = por %p4996_p7, %p4995_p6 }
  0x3d   :  { %p4998_p9 = pnand %p4997_p8, %p4991_p5 }
  0x3f   :  { %5001 = shalt.err (!%p4998_p9)
}
  0x40   :  { %69 = dma.hbm_to_vmem [thread:$0]  %s6568_s8, 16, %s67_s0, [#allocation6]  }
  0x41   :  { %5024 = dma.done.wait [#allocation3], 16  }
  0x42   :  { %5025 = vsyncadd [#allocation3], 4294967280 }
  0x43   :  { %5026 = dma.done.wait [#allocation6], 32  }
  0x44   :  { %5027 = vsyncadd [#allocation6], 4294967264  ;;  %v5033_v0 = vmov 0   ;;  %s6592_s22 = sld [smem:[#allocation16_spill]]  ;;  %s6593_s0 = sld [smem:[#allocation12_spill]]  ;;  %vm137_vm0 = vcmask 130048   ;;  %v109_v15 = vlaneseq }
  0x45   :  { %176 = vmatprep.mubr.bf16.mxu1 %v5033_v0  ;;  %419 = vmatprep.mubr.bf16.mxu0 %v5033_v0  ;;  %v5200_v4 = vld [vmem:[%s6566_s6 + $0x4] ss:$8 sps:$4 sm:$0xff]   ;;  %v5205_v5 = vld [vmem:[%s6566_s6] ss:$8 sps:$4 sm:$0xff]   ;;  %v5210_v6 = vld [vmem:[%s6566_s6 + $0x14] ss:$8 sps:$4 sm:$0xff]  }
  0x46   :  { %387 = vmatprep.subr.bf16.mxu0 %v5200_v4  ;;  %v5220_v7 = vld [vmem:[%s6566_s6 + $0x10] ss:$8 sps:$4 sm:$0xff]   ;;  %v5230_v9 = vld [vmem:[%s6566_s6 + $0x24] ss:$8 sps:$4 sm:$0xff]   ;;  %v4003_v10 = vld [vmem:[#allocation7] ss:$0 sm:$0xff] }
  0x47   :  { %388 = vmatpush1.bf16.msra.mxu0 %v5205_v5  ;;  %v5236_v11 = vld [vmem:[%s6566_s6 + $0x20] ss:$8 sps:$4 sm:$0xff]   ;;  %s5034_s1 = smov 96   ;;  %v5242_v12 = vld [vmem:[%s6566_s6 + $0x34] ss:$8 sps:$4 sm:$0xff]   ;;  %v5035_v14 = vmov 0.0|0.0  }
  0x48   :  { %389 = vmatprep.subr.bf16.mxu0 %v5210_v6  ;;  %303 = vrot.lane.b32.xlu0 %v4003_v10, %s5034_s1  ;;  %v5251_v13 = vld [vmem:[%s6566_s6 + $0x30] ss:$8 sps:$4 sm:$0xff]   ;;  %v110_v16 = vshrl.u32 %v109_v15, 7  ;;  %v107_v18 = vld [vmem:[%s6565_s5] sm:$0x3]  ;;  %s5036_s5 = smov 64  }
  0x49   :  { %v5285_v33 = vld [vmem:[#allocation5] ss:$0 sm:$0xff]  ;;  %s5037_s27 = smov 32   ;;  %vm381_vm1 = vcmask 261120   ;;  %vm257_vm2 = vcmask 523264   ;;  %vm1609_vm3 = vcmask 1041408  }
  0x4a   :  { %v4577_v1 = vld [vmem:[%s6592_s22 + $0x4] ss:$8 sps:$4 sm:$0xff]   ;;  %v4579_v2 = vld [vmem:[%s6592_s22] ss:$8 sps:$4 sm:$0xff]   ;;  %v115_v17 = vsub.s32 1, %v110_v16  ;;  %v5276_v19 = vsub.s32 0, %v110_v16 }
  0x4b   :  { %144 = vmatprep.subr.bf16.mxu1 %v4577_v1  ;;  %v4580_v3 = vld [vmem:[%s6593_s0] sm:$0xff]   ;;  %v4587_v8 = vld [vmem:[%s6593_s0 + $0x8] ss:$0 sps:$4 sm:$0x33]   ;;  %390 = vmatpush1.bf16.msra.mxu0 %v5220_v7  ;;  %vm1611_vm4 = vcmask 1043456   ;;  %vm1613_vm5 = vcmask 1045504  }
  0x4c   :  { %145 = vmatpush1.bf16.msra.mxu1 %v4579_v2  ;;  %391 = vmatprep.subr.bf16.mxu0 %v5230_v9  ;;  %v116_v20 = vrot.slane %v107_v18, %v115_v17  ;;  %v112_v22 = vrot.slane %v107_v18, %v5276_v19  ;;  %vm5039_vm6 = vmmov 0   ;;  %vm1764_vm7 = vcmask 253952   ;;  %s5041_s25 = smov 16   ;;  %s6594_s28 = sld [smem:[#allocation13_spill]] }
  0x4d   :  { %261 = vmatprep.subr.bf16.mxu1 %v5200_v4  ;;  %vm1893_vm8 = vcmask 257024   ;;  %vm1915_vm9 = vcmask 162816   ;;  %vm2005_vm10 = vcmask 654336   ;;  %vm2147_vm11 = vcmask 189440   ;;  %s6595_s30 = sld [smem:[#allocation14_spill]] }
  0x4e   :  { %vm2181_vm15 = vcmask 195584  }
  0x4f   :  { %4000 = vmatmul.mubr.msk.bf16.vlgmr.msra.gmra.mrb[0].mxu1 %vm137_vm0, %v4580_v3  ;;  %392 = vmatpush1.bf16.msra.mxu0 %v5236_v11 }
  0x50   :  { %262 = vmatpush1.bf16.msra.mxu1 %v5205_v5  ;;  %186 = vmatprep.mubr.bf16.mxu1 %v5033_v0 }
  0x51   :  { %263 = vmatprep.subr.bf16.mxu1 %v5210_v6  ;;  %393 = vmatprep.subr.bf16.mxu0 %v5242_v12 }
  0x53   :  { %394 = vmatpush1.bf16.msra.mxu0 %v5251_v13 }
  0x54   :  { %264 = vmatpush1.bf16.msra.mxu1 %v5220_v7  ;;  %641 = vmatprep.subr.bf16.mxu0 %v5200_v4 }
  0x55   :  { %265 = vmatprep.subr.bf16.mxu1 %v5230_v9 }
  0x57   :  { %4001 = vmatmul.mubr.msk.bf16.gmra.mrb[4].mxu1 %vm137_vm0, %v4587_v8 }
  0x58   :  { %266 = vmatpush1.bf16.msra.mxu1 %v5236_v11  ;;  %293 = vmatprep.mubr.bf16.mxu1 %v5033_v0 }
  0x59   :  { %267 = vmatprep.subr.bf16.mxu1 %v5242_v12 }
  0x5c   :  { %268 = vmatpush1.bf16.msra.mxu1 %v5251_v13 }
  0x5d   :  { %511 = vmatprep.subr.bf16.mxu1 %v5200_v4 }
  0x5f   :  { %294 = vmatmul.mubr.bf16.vlgmr.msra.gmra.mrb[8].mxu1 %v5035_v14 }
  0x60   :  { %512 = vmatpush1.bf16.msra.mxu1 %v5205_v5  ;;  %543 = vmatprep.mubr.bf16.mxu1 %v5033_v0 }
  0x61   :  { %513 = vmatprep.subr.bf16.mxu1 %v5210_v6 }
  0x64   :  { %514 = vmatpush1.bf16.msra.mxu1 %v5220_v7 }
  0x65   :  { %515 = vmatprep.subr.bf16.mxu1 %v5230_v9 }
  0x68   :  { %516 = vmatpush1.bf16.msra.mxu1 %v5236_v11 }
  0x69   :  { %517 = vmatprep.subr.bf16.mxu1 %v5242_v12 }
  0x6c   :  { %518 = vmatpush1.bf16.msra.mxu1 %v5251_v13 }
  0x6d   :  { %770 = vmatprep.subr.bf16.mxu1 %v5200_v4 }
  0xba   :  { %v5287_v34 = vpop.permute.xlu0 %303 }
 0x122   :  { %v178_v21 = vpop.f32.mrb[0].mxu1 }
 0x123   :  { %v180_v23 = vpop.f32.mrb[1].mxu1  ;;  %v5294_v43 = vadd.f32 %v178_v21, %v112_v22 }
 0x124   :  { %v5279_v24 = vadd.f32 %v180_v23, %v116_v20  ;;  %v182_v25 = vpop.f32.mrb[2].mxu1 }
 0x125   :  { %v5281_v26 = vadd.f32 %v182_v25, %v112_v22  ;;  %v184_v27 = vpop.f32.mrb[3].mxu1 }
 0x126   :  { %v5283_v28 = vadd.f32 %v184_v27, %v116_v20 }
 0x12a   :  { %v188_v29 = vpop.f32.mrb[4].mxu1 }
 0x12b   :  { %v190_v30 = vpop.f32.mrb[5].mxu1  ;;  %v5297_v46 = vadd.f32 %v188_v29, %v112_v22 }
 0x12c   :  { %v192_v31 = vpop.f32.mrb[6].mxu1  ;;  %v5303_v62 = vadd.f32 %v190_v30, %v116_v20 }
 0x12d   :  { %v193_v32 = vpop.f32.mrb[7].mxu1 }
 0x132   :  { %v295_v35 = vpop.f32.mrb[8].mxu1 }
 0x133   :  { %v297_v36 = vpop.f32.mrb[9].mxu1  ;;  %v302_v37 = vadd.f32 %v5285_v33, %v295_v35  ;;  %v306_v42 = vadd.f32 %v5287_v34, %v295_v35 }
 0x134   :  { %v307_v38 = vadd.f32 %v5287_v34, %v297_v36  ;;  %v299_v39 = vpop.f32.mrb[10].mxu1 }
 0x135   :  { %316 = vrot.lane.b32.xlu1 %v302_v37, %s5036_s5  ;;  %v300_v40 = vpop.f32.mrb[11].mxu1  ;;  %v335_v44 = vrot.slane %v306_v42, 6  ;;  %v308_v45 = vadd.f32 %v302_v37, %v5294_v43 }
 0x136   :  { %v345_v41 = vrot.slane %v307_v38, 6 }
 0x137   :  { %v337_v47 = vadd.f32 %v335_v44, %v5297_v46  ;;  %v4012_v48 = vmul.f32 -1.442695, %v308_v45 }
 0x138   :  { %354 = vrot.lane.b32.xlu0 %v345_v41, %s5036_s5  ;;  %v347_v8 = vadd.f32 %v345_v41, %v5303_v62 }
 0x139   :  { %v4013_v49 = vmul.f32 -1.442695, %v337_v47  ;;  %4613 = vpow2.f32 %v4012_v48 }
 0x13a   :  { %v4014_v10 = vmul.f32 -1.442695, %v347_v8 }
 0x13b   :  { %4615 = vpow2.f32 %v4013_v49 }
 0x143   :  { %v4614_v50 = vpop.eup %4613 }
 0x144   :  { %v312_v52 = vadd.f32 1.0, %v4614_v50 }
 0x145   :  { %v4616_v51 = vpop.eup %4615 }
 0x146   :  { %v341_v53 = vadd.f32 1.0, %v4616_v51  ;;  %4617 = vrcp.f32 %v312_v52 }
 0x148   :  { %4619 = vrcp.f32 %v341_v53 }
 0x150   :  { %v4618_v54 = vpop.eup %4617 }
 0x151   :  { %v326_v18 = vsub.f32 1.0, %v4618_v54  ;;  %v332_v21 = vmul.f32 0.0, %v4618_v54 }
 0x152   :  { %v4620_v57 = vpop.eup %4619 }
 0x1a7   :  { %v317_v55 = vpop.permute.xlu1 %316 }
 0x1a8   :  { %v319_v56 = vmul.f32 %v4618_v54, %v317_v55 }
 0x1aa   :  { %v355_v58 = vpop.permute.xlu0 %354  ;;  %321 = vrot.lane.b32.xlu0 %v319_v56, %s5036_s5 }
 0x1ab   :  { %v357_v59 = vmul.f32 %v4620_v57, %v355_v58 }
 0x1ad   :  { %359 = vrot.lane.b32.xlu1 %v357_v59, %s5036_s5 }
 0x21c   :  { %v322_v60 = vpop.permute.xlu0 %321 }
 0x21d   :  { %v324_v61 = vadd.f32 %v322_v60, %v5294_v43 }
 0x21f   :  { %4621 = vtanh.f32 %v324_v61  ;;  %v360_v63 = vpop.permute.xlu1 %359 }
 0x220   :  { %v362_v1 = vadd.f32 %v360_v63, %v5303_v62 }
 0x222   :  { %4623 = vtanh.f32 %v362_v1 }
 0x223   :  { %4625 = vpow2.f32 %v4014_v10 }
 0x229   :  { %v4622_v2 = vpop.eup %4621 }
 0x22a   :  { %328 = vrot.lane.b32.xlu0 %v4622_v2, %s5034_s1 }
 0x22c   :  { %v4624_v3 = vpop.eup %4623 }
 0x22d   :  { %366 = vrot.lane.b32.xlu1 %v4624_v3, %s5034_s1  ;;  %v4626_v14 = vpop.eup %4625 }
 0x22e   :  { %v351_v16 = vadd.f32 1.0, %v4626_v14 }
 0x230   :  { %4627 = vrcp.f32 %v351_v16 }
 0x23a   :  { %v4628_v17 = vpop.eup %4627 }
 0x23b   :  { %v364_v23 = vsub.f32 1.0, %v4628_v17  ;;  %v370_v29 = vmul.f32 0.0, %v4628_v17 }
 0x29c   :  { %v329_v20 = vpop.permute.xlu0 %328 }
 0x29d   :  { %v331_v22 = vmul.f32 %v329_v20, %v326_v18 }
 0x29f   :  { %v5309_v25 = vadd.f32 %v332_v21, %v331_v22  ;;  %v367_v27 = vpop.permute.xlu1 %366 }
 0x2a0   :  { %v369_v30 = vmul.f32 %v367_v27, %v364_v23 }
 0x2a1   :  { %373 = vrot.lane.b32.xlu1 %v5309_v25, %s5034_s1 }
 0x2a2   :  { %v5313_v31 = vadd.f32 %v370_v29, %v369_v30  ;;  %v457_v29 = vrot.slane %v5309_v25, 6 }
 0x2a4   :  { %v377_v32 = vrot.slane %v5313_v31, 2 }
 0x2a6   :  { %378 = vrot.lane.b32.xlu0 %v377_v32, %s5037_s27 }
 0x313   :  { %v374_v35 = vpop.permute.xlu1 %373 }
 0x318   :  { %v379_v36 = vpop.permute.xlu0 %378 }
 0x319   :  { %v382_v37 = vsel %vm381_vm1, %v374_v35, %v379_v36 }
 0x31a   :  { %v383_v38 = vpack.c.bf16 %v382_v37, %v382_v37 }
 0x31c   :  { %4015 = vmatmul.mubr.msk.bf16.vlgmr.msra.gmra.mrb[0].mxu0 %vm257_vm2, %v383_v38 }
 0x31d   :  { %642 = vmatpush1.bf16.msra.mxu0 %v5205_v5  ;;  %673 = vmatprep.mubr.bf16.mxu0 %v5033_v0 }
 0x31e   :  { %643 = vmatprep.subr.bf16.mxu0 %v5210_v6 }
 0x321   :  { %644 = vmatpush1.bf16.msra.mxu0 %v5220_v7 }
 0x322   :  { %645 = vmatprep.subr.bf16.mxu0 %v5230_v9 }
 0x325   :  { %646 = vmatpush1.bf16.msra.mxu0 %v5236_v11 }
 0x326   :  { %647 = vmatprep.subr.bf16.mxu0 %v5242_v12 }
 0x329   :  { %648 = vmatpush1.bf16.msra.mxu0 %v5251_v13 }
 0x32a   :  { %896 = vmatprep.subr.bf16.mxu0 %v5200_v4 }
 0x3ef   :  { %v421_v39 = vpop.f32.mrb[0].mxu0 }
 0x3f0   :  { %v428_v40 = vadd.f32 %v5285_v33, %v421_v39  ;;  %v423_v41 = vpop.f32.mrb[1].mxu0  ;;  %v429_v48 = vadd.f32 %v421_v39, %v5287_v34 }
 0x3f1   :  { %v430_v42 = vadd.f32 %v423_v41, %v5287_v34  ;;  %v425_v44 = vpop.f32.mrb[2].mxu0 }
 0x3f2   :  { %v432_v45 = vrot.slane %v428_v40, 6  ;;  %v426_v47 = vpop.f32.mrb[3].mxu0  ;;  %v461_v49 = vadd.f32 %v429_v48, %v5297_v46 }
 0x3f3   :  { %476 = vrot.lane.b32.xlu1 %v430_v42, %s5036_s5  ;;  %v468_v16 = vadd.f32 %v430_v42, %v5303_v62 }
 0x3f4   :  { %441 = vrot.lane.b32.xlu0 %v432_v45, %s5036_s5  ;;  %v434_v50 = vadd.f32 %v432_v45, %v5294_v43  ;;  %v4017_v51 = vmul.f32 -1.442695, %v461_v49 }
 0x3f5   :  { %v4018_v17 = vmul.f32 -1.442695, %v468_v16 }
 0x3f6   :  { %v4016_v52 = vmul.f32 -1.442695, %v434_v50  ;;  %4629 = vpow2.f32 %v4017_v51 }
 0x3f8   :  { %4631 = vpow2.f32 %v4016_v52 }
 0x400   :  { %v4630_v53 = vpop.eup %4629 }
 0x401   :  { %v465_v55 = vadd.f32 1.0, %v4630_v53 }
 0x402   :  { %v4632_v54 = vpop.eup %4631 }
 0x403   :  { %v438_v56 = vadd.f32 1.0, %v4632_v54  ;;  %4633 = vrcp.f32 %v465_v55 }
 0x405   :  { %4635 = vrcp.f32 %v438_v56 }
 0x40d   :  { %v4634_v57 = vpop.eup %4633 }
 0x40f   :  { %v4636_v59 = vpop.eup %4635 }
 0x410   :  { %v451_v27 = vsub.f32 1.0, %v4636_v59  ;;  %v459_v37 = vmul.f32 %v4636_v59, %v457_v29 }
 0x465   :  { %v477_v58 = vpop.permute.xlu1 %476 }
 0x466   :  { %v479_v60 = vmul.f32 %v4634_v57, %v477_v58  ;;  %v442_v61 = vpop.permute.xlu0 %441 }
 0x467   :  { %v444_v63 = vmul.f32 %v4636_v59, %v442_v61 }
 0x468   :  { %481 = vrot.lane.b32.xlu1 %v479_v60, %s5036_s5 }
 0x469   :  { %446 = vrot.lane.b32.xlu0 %v444_v63, %s5036_s5 }
 0x4da   :  { %v482_v1 = vpop.permute.xlu1 %481 }
 0x4db   :  { %v484_v2 = vadd.f32 %v482_v1, %v5303_v62  ;;  %v447_v3 = vpop.permute.xlu0 %446 }
 0x4dc   :  { %v449_v8 = vadd.f32 %v447_v3, %v5294_v43 }
 0x4dd   :  { %4637 = vtanh.f32 %v484_v2 }
 0x4de   :  { %4639 = vtanh.f32 %v449_v8 }
 0x4df   :  { %4641 = vpow2.f32 %v4018_v17 }
 0x4e7   :  { %v4638_v10 = vpop.eup %4637 }
 0x4e8   :  { %v4640_v14 = vpop.eup %4639  ;;  %488 = vrot.lane.b32.xlu1 %v4638_v10, %s5034_s1 }
 0x4e9   :  { %453 = vrot.lane.b32.xlu0 %v4640_v14, %s5034_s1  ;;  %v4642_v18 = vpop.eup %4641 }
 0x4ea   :  { %v472_v20 = vadd.f32 1.0, %v4642_v18 }
 0x4ec   :  { %4643 = vrcp.f32 %v472_v20 }
 0x4f6   :  { %v4644_v21 = vpop.eup %4643 }
 0x4f7   :  { %v486_v22 = vsub.f32 1.0, %v4644_v21  ;;  %v493_v35 = vmul.f32 %v4644_v21, %v377_v32 }
 0x55a   :  { %v489_v23 = vpop.permute.xlu1 %488 }
 0x55b   :  { %v491_v30 = vmul.f32 %v489_v23, %v486_v22  ;;  %v454_v36 = vpop.permute.xlu0 %453 }
 0x55c   :  { %v456_v38 = vmul.f32 %v454_v36, %v451_v27 }
 0x55d   :  { %v5347_v39 = vadd.f32 %v493_v35, %v491_v30 }
 0x55e   :  { %v5349_v62 = vadd.f32 %v459_v37, %v456_v38 }
 0x55f   :  { %v500_v40 = vrot.slane %v5347_v39, 6  ;;  %v621_v59 = vrot.slane %v5347_v39, 2 }
 0x560   :  { %496 = vrot.lane.b32.xlu1 %v5349_v62, %s5034_s1 }
 0x561   :  { %501 = vrot.lane.b32.xlu0 %v500_v40, %s5037_s27 }
 0x5d2   :  { %v497_v41 = vpop.permute.xlu1 %496 }
 0x5d3   :  { %v502_v42 = vpop.permute.xlu0 %501 }
 0x5d4   :  { %v504_v44 = vsel %vm381_vm1, %v497_v41, %v502_v42  ;;  %v581_v42 = vrot.slane %v5349_v62, 6 }
 0x5d5   :  { %v505_v45 = vpack.c.bf16 %v504_v44, %v504_v44 }
 0x5d7   :  { %v507_v32 = vrot.slane %v505_v45, 1 }
 0x5d9   :  { %4019 = vmatmul.mubr.msk.bf16.vlgmr.msra.gmra.mrb[12].mxu1 %vm257_vm2, %v507_v32 }
 0x5da   :  { %771 = vmatpush1.bf16.msra.mxu1 %v5205_v5  ;;  %802 = vmatprep.mubr.bf16.mxu1 %v5033_v0 }
 0x5db   :  { %772 = vmatprep.subr.bf16.mxu1 %v5210_v6 }
 0x5de   :  { %773 = vmatpush1.bf16.msra.mxu1 %v5220_v7 }
 0x5df   :  { %774 = vmatprep.subr.bf16.mxu1 %v5230_v9 }
 0x5e2   :  { %775 = vmatpush1.bf16.msra.mxu1 %v5236_v11 }
 0x5e3   :  { %776 = vmatprep.subr.bf16.mxu1 %v5242_v12 }
 0x5e6   :  { %777 = vmatpush1.bf16.msra.mxu1 %v5251_v13 }
 0x5e7   :  { %1020 = vmatprep.subr.bf16.mxu1 %v5200_v4 }
 0x6ac   :  { %v545_v47 = vpop.f32.mrb[12].mxu1 }
 0x6ad   :  { %v552_v48 = vadd.f32 %v5285_v33, %v545_v47  ;;  %v547_v49 = vpop.f32.mrb[13].mxu1  ;;  %v553_v63 = vadd.f32 %v545_v47, %v5287_v34 }
 0x6ae   :  { %v554_v50 = vadd.f32 %v547_v49, %v5287_v34  ;;  %v549_v51 = vpop.f32.mrb[14].mxu1 }
 0x6af   :  { %v556_v52 = vrot.slane %v552_v48, 4  ;;  %v550_v53 = vpop.f32.mrb[15].mxu1  ;;  %v586_v1 = vrot.slane %v553_v63, 2 }
 0x6b0   :  { %v596_v54 = vrot.slane %v554_v50, 2 }
 0x6b1   :  { %565 = vrot.lane.b32.xlu0 %v556_v52, %s5036_s5  ;;  %v558_v2 = vadd.f32 %v556_v52, %v5294_v43  ;;  %v588_v3 = vadd.f32 %v586_v1, %v5281_v26  ;;  %v1610_v52 = vsel %vm1609_vm3, %v5309_v25, %v5349_v62 }
 0x6b2   :  { %v598_v55 = vadd.f32 %v596_v54, %v5283_v28  ;;  %605 = vrot.lane.b32.xlu1 %v596_v54, %s5036_s5 }
 0x6b3   :  { %v4020_v8 = vmul.f32 -1.442695, %v558_v2  ;;  %v4021_v10 = vmul.f32 -1.442695, %v588_v3 }
 0x6b4   :  { %v4022_v56 = vmul.f32 -1.442695, %v598_v55 }
 0x6b6   :  { %4645 = vpow2.f32 %v4022_v56 }
 0x6c0   :  { %v4646_v57 = vpop.eup %4645 }
 0x6c1   :  { %v602_v58 = vadd.f32 1.0, %v4646_v57 }
 0x6c3   :  { %4647 = vrcp.f32 %v602_v58 }
 0x6c4   :  { %4649 = vpow2.f32 %v4020_v8 }
 0x6c5   :  { %4651 = vpow2.f32 %v4021_v10 }
 0x6cd   :  { %v4648_v60 = vpop.eup %4647 }
 0x6ce   :  { %v623_v61 = vmul.f32 %v4648_v60, %v621_v59  ;;  %v4650_v14 = vpop.eup %4649  ;;  %v615_v45 = vsub.f32 1.0, %v4648_v60 }
 0x6cf   :  { %v4652_v16 = vpop.eup %4651  ;;  %v562_v17 = vadd.f32 1.0, %v4650_v14 }
 0x6d0   :  { %v592_v18 = vadd.f32 1.0, %v4652_v16 }
 0x6d1   :  { %4653 = vrcp.f32 %v562_v17 }
 0x6d2   :  { %4655 = vrcp.f32 %v592_v18 }
 0x6db   :  { %v4654_v20 = vpop.eup %4653 }
 0x6dc   :  { %v4656_v22 = vpop.eup %4655  ;;  %v575_v41 = vsub.f32 1.0, %v4654_v20  ;;  %v583_v32 = vmul.f32 %v4654_v20, %v581_v42 }
 0x723   :  { %v566_v21 = vpop.permute.xlu0 %565 }
 0x724   :  { %v568_v23 = vmul.f32 %v4654_v20, %v566_v21  ;;  %v606_v27 = vpop.permute.xlu1 %605 }
 0x725   :  { %v608_v29 = vmul.f32 %v4656_v22, %v606_v27 }
 0x726   :  { %570 = vrot.lane.b32.xlu0 %v568_v23, %s5036_s5 }
 0x727   :  { %610 = vrot.lane.b32.xlu1 %v608_v29, %s5036_s5 }
 0x798   :  { %v571_v30 = vpop.permute.xlu0 %570 }
 0x799   :  { %v573_v35 = vadd.f32 %v571_v30, %v5294_v43  ;;  %v611_v36 = vpop.permute.xlu1 %610 }
 0x79a   :  { %v613_v37 = vadd.f32 %v611_v36, %v5283_v28 }
 0x79b   :  { %4657 = vtanh.f32 %v573_v35 }
 0x79c   :  { %4659 = vtanh.f32 %v613_v37 }
 0x7a5   :  { %v4658_v38 = vpop.eup %4657 }
 0x7a6   :  { %v4660_v40 = vpop.eup %4659  ;;  %577 = vrot.lane.b32.xlu0 %v4658_v38, %s5034_s1 }
 0x7a7   :  { %617 = vrot.lane.b32.xlu1 %v4660_v40, %s5034_s1 }
 0x818   :  { %v578_v44 = vpop.permute.xlu0 %577 }
 0x819   :  { %v580_v47 = vmul.f32 %v578_v44, %v575_v41  ;;  %v618_v48 = vpop.permute.xlu1 %617 }
 0x81a   :  { %v620_v49 = vmul.f32 %v618_v48, %v615_v45 }
 0x81b   :  { %v5382_v50 = vadd.f32 %v583_v32, %v580_v47 }
 0x81c   :  { %v5384_v51 = vadd.f32 %v623_v61, %v620_v49 }
 0x81d   :  { %626 = vrot.lane.b32.xlu1 %v5382_v50, %s5034_s1  ;;  %v5393_v53 = vsel %vm1611_vm4, %v1610_v52, %v5382_v50 }
 0x81e   :  { %v630_v54 = vrot.slane %v5384_v51, 2 }
 0x820   :  { %631 = vrot.lane.b32.xlu0 %v630_v54, %s5037_s27 }
 0x88f   :  { %v627_v55 = vpop.permute.xlu1 %626 }
 0x892   :  { %v632_v56 = vpop.permute.xlu0 %631 }
 0x893   :  { %v634_v57 = vsel %vm381_vm1, %v627_v55, %v632_v56  ;;  %v711_v56 = vrot.slane %v5382_v50, 6 }
 0x894   :  { %v635_v58 = vpack.c.bf16 %v634_v57, %v634_v57 }
 0x896   :  { %v637_v59 = vrot.slane %v635_v58, 2 }
 0x898   :  { %4023 = vmatmul.mubr.msk.bf16.vlgmr.msra.gmra.mrb[4].mxu0 %vm257_vm2, %v637_v59 }
 0x899   :  { %897 = vmatpush1.bf16.msra.mxu0 %v5205_v5  ;;  %928 = vmatprep.mubr.bf16.mxu0 %v5033_v0 }
 0x89a   :  { %898 = vmatprep.subr.bf16.mxu0 %v5210_v6 }
 0x89d   :  { %899 = vmatpush1.bf16.msra.mxu0 %v5220_v7 }
 0x89e   :  { %900 = vmatprep.subr.bf16.mxu0 %v5230_v9 }
 0x8a1   :  { %901 = vmatpush1.bf16.msra.mxu0 %v5236_v11 }
 0x8a2   :  { %902 = vmatprep.subr.bf16.mxu0 %v5242_v12 }
 0x8a5   :  { %903 = vmatpush1.bf16.msra.mxu0 %v5251_v13 }
 0x8a6   :  { %1150 = vmatprep.subr.bf16.mxu0 %v5200_v4 }
 0x96b   :  { %v675_v25 = vpop.f32.mrb[4].mxu0 }
 0x96c   :  { %v682_v62 = vadd.f32 %v5285_v33, %v675_v25  ;;  %v677_v60 = vpop.f32.mrb[5].mxu0  ;;  %v683_v8 = vadd.f32 %v675_v25, %v5287_v34 }
 0x96d   :  { %v684_v61 = vadd.f32 %v677_v60, %v5287_v34  ;;  %v679_v63 = vpop.f32.mrb[6].mxu0 }
 0x96e   :  { %v686_v1 = vrot.slane %v682_v62, 2  ;;  %v680_v2 = vpop.f32.mrb[7].mxu0  ;;  %v716_v10 = vrot.slane %v683_v8, 4 }
 0x96f   :  { %v726_v3 = vrot.slane %v684_v61, 4 }
 0x970   :  { %695 = vrot.lane.b32.xlu0 %v686_v1, %s5036_s5  ;;  %v688_v14 = vadd.f32 %v686_v1, %v5294_v43  ;;  %v718_v16 = vadd.f32 %v716_v10, %v5281_v26 }
 0x971   :  { %735 = vrot.lane.b32.xlu1 %v726_v3, %s5036_s5  ;;  %v728_v32 = vadd.f32 %v726_v3, %v5283_v28 }
 0x972   :  { %v4024_v17 = vmul.f32 -1.442695, %v688_v14  ;;  %v4025_v18 = vmul.f32 -1.442695, %v718_v16 }
 0x973   :  { %v4026_v47 = vmul.f32 -1.442695, %v728_v32 }
 0x974   :  { %4661 = vpow2.f32 %v4024_v17 }
 0x975   :  { %4663 = vpow2.f32 %v4025_v18 }
 0x97e   :  { %v4662_v20 = vpop.eup %4661 }
 0x97f   :  { %v4664_v21 = vpop.eup %4663  ;;  %v692_v22 = vadd.f32 1.0, %v4662_v20 }
 0x980   :  { %v722_v23 = vadd.f32 1.0, %v4664_v21 }
 0x981   :  { %4665 = vrcp.f32 %v692_v22 }
 0x982   :  { %4667 = vrcp.f32 %v722_v23 }
 0x98b   :  { %v4666_v27 = vpop.eup %4665 }
 0x98c   :  { %v4668_v30 = vpop.eup %4667  ;;  %v705_v55 = vsub.f32 1.0, %v4666_v27  ;;  %v713_v59 = vmul.f32 %v4666_v27, %v711_v56 }
 0x9e2   :  { %v696_v29 = vpop.permute.xlu0 %695 }
 0x9e3   :  { %v698_v35 = vmul.f32 %v4666_v27, %v696_v29  ;;  %v736_v36 = vpop.permute.xlu1 %735 }
 0x9e4   :  { %v738_v37 = vmul.f32 %v4668_v30, %v736_v36 }
 0x9e5   :  { %700 = vrot.lane.b32.xlu0 %v698_v35, %s5036_s5 }
 0x9e6   :  { %740 = vrot.lane.b32.xlu1 %v738_v37, %s5036_s5 }
 0xa57   :  { %v701_v38 = vpop.permute.xlu0 %700 }
 0xa58   :  { %v703_v40 = vadd.f32 %v701_v38, %v5294_v43  ;;  %v741_v41 = vpop.permute.xlu1 %740 }
 0xa59   :  { %v743_v42 = vadd.f32 %v741_v41, %v5283_v28 }
 0xa5a   :  { %4669 = vtanh.f32 %v703_v40 }
 0xa5b   :  { %4671 = vtanh.f32 %v743_v42 }
 0xa5c   :  { %4673 = vpow2.f32 %v4026_v47 }
 0xa64   :  { %v4670_v44 = vpop.eup %4669 }
 0xa65   :  { %v4672_v45 = vpop.eup %4671  ;;  %707 = vrot.lane.b32.xlu0 %v4670_v44, %s5034_s1 }
 0xa66   :  { %747 = vrot.lane.b32.xlu1 %v4672_v45, %s5034_s1  ;;  %v4674_v48 = vpop.eup %4673 }
 0xa67   :  { %v732_v49 = vadd.f32 1.0, %v4674_v48 }
 0xa69   :  { %4675 = vrcp.f32 %v732_v49 }
 0xa73   :  { %v4676_v52 = vpop.eup %4675 }
 0xa74   :  { %v745_v58 = vsub.f32 1.0, %v4676_v52  ;;  %v752_v61 = vmul.f32 %v4676_v52, %v630_v54 }
 0xad7   :  { %v708_v57 = vpop.permute.xlu0 %707 }
 0xad8   :  { %v710_v25 = vmul.f32 %v708_v57, %v705_v55  ;;  %v748_v62 = vpop.permute.xlu1 %747 }
 0xad9   :  { %v750_v60 = vmul.f32 %v748_v62, %v745_v58 }
 0xada   :  { %v5427_v63 = vadd.f32 %v713_v59, %v710_v25 }
 0xadb   :  { %v5429_v1 = vadd.f32 %v752_v61, %v750_v60 }
 0xadc   :  { %755 = vrot.lane.b32.xlu1 %v5427_v63, %s5034_s1  ;;  %v5436_v50 = vsel %vm1613_vm5, %v5393_v53, %v5427_v63 }
 0xadd   :  { %v759_v2 = vrot.slane %v5429_v1, 6 }
 0xadf   :  { %760 = vrot.lane.b32.xlu0 %v759_v2, %s5037_s27 }
 0xb4e   :  { %v756_v3 = vpop.permute.xlu1 %755 }
 0xb51   :  { %v761_v8 = vpop.permute.xlu0 %760 }
 0xb52   :  { %v763_v54 = vsel %vm381_vm1, %v756_v3, %v761_v8  ;;  %v838_v3 = vrot.slane %v5427_v63, 6 }
 0xb53   :  { %v764_v10 = vpack.c.bf16 %v763_v54, %v763_v54 }
 0xb55   :  { %v766_v14 = vrot.slane %v764_v10, 3 }
 0xb57   :  { %4027 = vmatmul.mubr.msk.bf16.vlgmr.msra.gmra.mrb[16].mxu1 %vm257_vm2, %v766_v14  ;;  %v878_v14 = vrot.slane %v5429_v1, 2 }
 0xb58   :  { %1021 = vmatpush1.bf16.msra.mxu1 %v5205_v5  ;;  %1052 = vmatprep.mubr.bf16.mxu1 %v5033_v0 }
 0xb59   :  { %1022 = vmatprep.subr.bf16.mxu1 %v5210_v6 }
 0xb5c   :  { %1023 = vmatpush1.bf16.msra.mxu1 %v5220_v7 }
 0xb5d   :  { %1024 = vmatprep.subr.bf16.mxu1 %v5230_v9 }
 0xb60   :  { %1025 = vmatpush1.bf16.msra.mxu1 %v5236_v11 }
 0xb61   :  { %1026 = vmatprep.subr.bf16.mxu1 %v5242_v12 }
 0xb64   :  { %1027 = vmatpush1.bf16.msra.mxu1 %v5251_v13 }
 0xb65   :  { %1279 = vmatprep.subr.bf16.mxu1 %v5200_v4 }
 0xc2a   :  { %v804_v53 = vpop.f32.mrb[16].mxu1 }
 0xc2b   :  { %v811_v16 = vadd.f32 %v5285_v33, %v804_v53  ;;  %v806_v17 = vpop.f32.mrb[17].mxu1  ;;  %v812_v23 = vadd.f32 %v804_v53, %v5287_v34 }
 0xc2c   :  { %v813_v18 = vadd.f32 %v806_v17, %v5287_v34  ;;  %v808_v20 = vpop.f32.mrb[18].mxu1 }
 0xc2d   :  { %822 = vrot.lane.b32.xlu0 %v811_v16, %s5036_s5  ;;  %v809_v21 = vpop.f32.mrb[19].mxu1  ;;  %v843_v27 = vrot.slane %v812_v23, 6  ;;  %v814_v29 = vadd.f32 %v811_v16, %v5281_v26 }
 0xc2e   :  { %v853_v22 = vrot.slane %v813_v18, 6 }
 0xc2f   :  { %v845_v30 = vadd.f32 %v843_v27, %v5281_v26  ;;  %v4028_v35 = vmul.f32 -1.442695, %v814_v29 }
 0xc30   :  { %862 = vrot.lane.b32.xlu1 %v853_v22, %s5036_s5  ;;  %v855_v59 = vadd.f32 %v853_v22, %v5283_v28 }
 0xc31   :  { %v4029_v36 = vmul.f32 -1.442695, %v845_v30  ;;  %4677 = vpow2.f32 %v4028_v35 }
 0xc32   :  { %v4030_v25 = vmul.f32 -1.442695, %v855_v59 }
 0xc33   :  { %4679 = vpow2.f32 %v4029_v36 }
 0xc3b   :  { %v4678_v37 = vpop.eup %4677 }
 0xc3c   :  { %v818_v40 = vadd.f32 1.0, %v4678_v37 }
 0xc3d   :  { %v4680_v38 = vpop.eup %4679 }
 0xc3e   :  { %v849_v41 = vadd.f32 1.0, %v4680_v38  ;;  %4681 = vrcp.f32 %v818_v40 }
 0xc40   :  { %4683 = vrcp.f32 %v849_v41 }
 0xc48   :  { %v4682_v42 = vpop.eup %4681 }
 0xc49   :  { %v832_v2 = vsub.f32 1.0, %v4682_v42  ;;  %v840_v54 = vmul.f32 %v4682_v42, %v838_v3 }
 0xc4a   :  { %v4684_v32 = vpop.eup %4683 }
 0xc9f   :  { %v823_v44 = vpop.permute.xlu0 %822 }
 0xca0   :  { %v825_v45 = vmul.f32 %v4682_v42, %v823_v44 }
 0xca2   :  { %827 = vrot.lane.b32.xlu0 %v825_v45, %s5036_s5  ;;  %v863_v47 = vpop.permute.xlu1 %862 }
 0xca3   :  { %v865_v48 = vmul.f32 %v4684_v32, %v863_v47 }
 0xca5   :  { %867 = vrot.lane.b32.xlu1 %v865_v48, %s5036_s5 }
 0xd14   :  { %v828_v49 = vpop.permute.xlu0 %827 }
 0xd15   :  { %v830_v52 = vadd.f32 %v828_v49, %v5281_v26 }
 0xd17   :  { %4685 = vtanh.f32 %v830_v52  ;;  %v868_v55 = vpop.permute.xlu1 %867 }
 0xd18   :  { %v870_v56 = vadd.f32 %v868_v55, %v5283_v28 }
 0xd1a   :  { %4687 = vtanh.f32 %v870_v56 }
 0xd1b   :  { %4689 = vpow2.f32 %v4030_v25 }
 0xd21   :  { %v4686_v57 = vpop.eup %4685 }
 0xd22   :  { %834 = vrot.lane.b32.xlu0 %v4686_v57, %s5034_s1 }
 0xd24   :  { %v4688_v58 = vpop.eup %4687 }
 0xd25   :  { %874 = vrot.lane.b32.xlu1 %v4688_v58, %s5034_s1  ;;  %v4690_v62 = vpop.eup %4689 }
 0xd26   :  { %v859_v60 = vadd.f32 1.0, %v4690_v62 }
 0xd28   :  { %4691 = vrcp.f32 %v859_v60 }
 0xd32   :  { %v4692_v61 = vpop.eup %4691 }
 0xd33   :  { %v872_v53 = vsub.f32 1.0, %v4692_v61  ;;  %v880_v20 = vmul.f32 %v4692_v61, %v878_v14 }
 0xd94   :  { %v835_v8 = vpop.permute.xlu0 %834 }
 0xd95   :  { %v837_v10 = vmul.f32 %v835_v8, %v832_v2 }
 0xd97   :  { %v5467_v16 = vadd.f32 %v840_v54, %v837_v10  ;;  %v875_v17 = vpop.permute.xlu1 %874 }
 0xd98   :  { %v877_v18 = vmul.f32 %v875_v17, %v872_v53 }
 0xd99   :  { %883 = vrot.lane.b32.xlu1 %v5467_v16, %s5034_s1  ;;  %v966_v10 = vrot.slane %v5467_v16, 6 }
 0xd9a   :  { %v5471_v21 = vadd.f32 %v880_v20, %v877_v18 }
 0xd9c   :  { %v887_v22 = vrot.slane %v5471_v21, 2 }
 0xd9e   :  { %888 = vrot.lane.b32.xlu0 %v887_v22, %s5037_s27 }
 0xe0b   :  { %v884_v63 = vpop.permute.xlu1 %883 }
 0xe10   :  { %v889_v23 = vpop.permute.xlu0 %888 }
 0xe11   :  { %v891_v27 = vsel %vm381_vm1, %v884_v63, %v889_v23 }
 0xe12   :  { %v892_v29 = vpack.c.bf16 %v891_v27, %v891_v27 }
 0xe14   :  { %4031 = vmatmul.mubr.msk.bf16.vlgmr.msra.gmra.mrb[8].mxu0 %vm257_vm2, %v892_v29 }
 0xe15   :  { %1151 = vmatpush1.bf16.msra.mxu0 %v5205_v5  ;;  %1182 = vmatprep.mubr.bf16.mxu0 %v5033_v0 }
 0xe16   :  { %1152 = vmatprep.subr.bf16.mxu0 %v5210_v6 }
 0xe19   :  { %1153 = vmatpush1.bf16.msra.mxu0 %v5220_v7 }
 0xe1a   :  { %1154 = vmatprep.subr.bf16.mxu0 %v5230_v9 }
 0xe1d   :  { %1155 = vmatpush1.bf16.msra.mxu0 %v5236_v11 }
 0xe1e   :  { %1156 = vmatprep.subr.bf16.mxu0 %v5242_v12 }
 0xe21   :  { %1157 = vmatpush1.bf16.msra.mxu0 %v5251_v13 }
 0xe22   :  { %1405 = vmatprep.subr.bf16.mxu0 %v5200_v4 }
 0xee7   :  { %v930_v30 = vpop.f32.mrb[8].mxu0 }
 0xee8   :  { %v937_v35 = vadd.f32 %v5285_v33, %v930_v30  ;;  %v932_v5 = vpop.f32.mrb[9].mxu0  ;;  %v938_v7 = vadd.f32 %v930_v30, %v5287_v34 }
 0xee9   :  { %v939_v36 = vadd.f32 %v932_v5, %v5287_v34  ;;  %v934_v37 = vpop.f32.mrb[10].mxu0  ;;  %v5518_v5 = vld [vmem:[%s6566_s6] ss:$8 sps:$4 sm:$0xff]  }
 0xeea   :  { %v941_v6 = vrot.slane %v937_v35, 6  ;;  %v935_v38 = vpop.f32.mrb[11].mxu0  ;;  %v970_v9 = vadd.f32 %v938_v7, %v5281_v26  ;;  %v5531_v37 = vld [vmem:[%s6566_s6 + $0x10] ss:$8 sps:$4 sm:$0xff]   ;;  %v5549_v7 = vld [vmem:[%s6566_s6 + $0x34] ss:$8 sps:$4 sm:$0xff]  }
 0xeeb   :  { %985 = vrot.lane.b32.xlu1 %v939_v36, %s5036_s5  ;;  %v977_v25 = vadd.f32 %v939_v36, %v5283_v28  ;;  %v5525_v36 = vld [vmem:[%s6566_s6 + $0x14] ss:$8 sps:$4 sm:$0xff]   ;;  %v5543_v38 = vld [vmem:[%s6566_s6 + $0x20] ss:$8 sps:$4 sm:$0xff]  }
 0xeec   :  { %950 = vrot.lane.b32.xlu0 %v941_v6, %s5036_s5  ;;  %v943_v11 = vadd.f32 %v941_v6, %v5281_v26  ;;  %v4033_v4 = vmul.f32 -1.442695, %v970_v9  ;;  %v5537_v6 = vld [vmem:[%s6566_s6 + $0x24] ss:$8 sps:$4 sm:$0xff]   ;;  %v5555_v9 = vld [vmem:[%s6566_s6 + $0x30] ss:$8 sps:$4 sm:$0xff]  }
 0xeed   :  { %v4034_v62 = vmul.f32 -1.442695, %v977_v25 }
 0xeee   :  { %v4032_v12 = vmul.f32 -1.442695, %v943_v11  ;;  %4693 = vpow2.f32 %v4033_v4 }
 0xef0   :  { %4695 = vpow2.f32 %v4032_v12 }
 0xef8   :  { %v4694_v13 = vpop.eup %4693 }
 0xef9   :  { %v974_v41 = vadd.f32 1.0, %v4694_v13 }
 0xefa   :  { %v4696_v40 = vpop.eup %4695 }
 0xefb   :  { %v947_v42 = vadd.f32 1.0, %v4696_v40  ;;  %4697 = vrcp.f32 %v974_v41 }
 0xefd   :  { %4699 = vrcp.f32 %v947_v42 }
 0xf05   :  { %v4698_v44 = vpop.eup %4697 }
 0xf07   :  { %v4700_v32 = vpop.eup %4699 }
 0xf08   :  { %v960_v54 = vsub.f32 1.0, %v4700_v32  ;;  %v968_v18 = vmul.f32 %v4700_v32, %v966_v10 }
 0xf5d   :  { %v986_v45 = vpop.permute.xlu1 %985 }
 0xf5e   :  { %v988_v47 = vmul.f32 %v4698_v44, %v986_v45  ;;  %v951_v48 = vpop.permute.xlu0 %950 }
 0xf5f   :  { %v953_v49 = vmul.f32 %v4700_v32, %v951_v48 }
 0xf60   :  { %990 = vrot.lane.b32.xlu1 %v988_v47, %s5036_s5 }
 0xf61   :  { %955 = vrot.lane.b32.xlu0 %v953_v49, %s5036_s5 }
 0xfd2   :  { %v991_v52 = vpop.permute.xlu1 %990 }
 0xfd3   :  { %v993_v55 = vadd.f32 %v991_v52, %v5283_v28  ;;  %v956_v56 = vpop.permute.xlu0 %955 }
 0xfd4   :  { %v958_v57 = vadd.f32 %v956_v56, %v5281_v26 }
 0xfd5   :  { %4701 = vtanh.f32 %v993_v55 }
 0xfd6   :  { %4703 = vtanh.f32 %v958_v57 }
 0xfd7   :  { %4705 = vpow2.f32 %v4034_v62 }
 0xfdf   :  { %v4702_v58 = vpop.eup %4701 }
 0xfe0   :  { %v4704_v59 = vpop.eup %4703  ;;  %997 = vrot.lane.b32.xlu1 %v4702_v58, %s5034_s1 }
 0xfe1   :  { %962 = vrot.lane.b32.xlu0 %v4704_v59, %s5034_s1  ;;  %v4706_v60 = vpop.eup %4705 }
 0xfe2   :  { %v981_v61 = vadd.f32 1.0, %v4706_v60 }
 0xfe4   :  { %4707 = vrcp.f32 %v981_v61 }
 0xfee   :  { %v4708_v2 = vpop.eup %4707 }
 0xfef   :  { %v995_v3 = vsub.f32 1.0, %v4708_v2  ;;  %v1002_v53 = vmul.f32 %v4708_v2, %v887_v22 }
0x1052   :  { %v998_v8 = vpop.permute.xlu1 %997 }
0x1053   :  { %v1000_v14 = vmul.f32 %v998_v8, %v995_v3  ;;  %v963_v17 = vpop.permute.xlu0 %962 }
0x1054   :  { %v965_v20 = vmul.f32 %v963_v17, %v960_v54 }
0x1055   :  { %v5505_v63 = vadd.f32 %v1002_v53, %v1000_v14 }
0x1056   :  { %v5507_v28 = vadd.f32 %v968_v18, %v965_v20 }
0x1057   :  { %v1009_v23 = vrot.slane %v5505_v63, 6 }
0x1058   :  { %1005 = vrot.lane.b32.xlu1 %v5507_v28, %s5034_s1 }
0x1059   :  { %1010 = vrot.lane.b32.xlu0 %v1009_v23, %s5037_s27 }
0x10ca   :  { %v1006_v27 = vpop.permute.xlu1 %1005 }
0x10cb   :  { %v1011_v29 = vpop.permute.xlu0 %1010 }
0x10cc   :  { %v1013_v30 = vsel %vm381_vm1, %v1006_v27, %v1011_v29 }
0x10cd   :  { %v1014_v35 = vpack.c.bf16 %v1013_v30, %v1013_v30 }
0x10cf   :  { %v1016_v22 = vrot.slane %v1014_v35, 1  ;;  %v1090_v35 = vrot.slane %v5507_v28, 6 }
0x10d1   :  { %4035 = vmatmul.mubr.msk.bf16.vlgmr.msra.gmra.mrb[20].mxu1 %vm257_vm2, %v1016_v22 }
0x10d2   :  { %1280 = vmatpush1.bf16.msra.mxu1 %v5518_v5  ;;  %1311 = vmatprep.mubr.bf16.mxu1 %v5033_v0 }
0x10d3   :  { %1281 = vmatprep.subr.bf16.mxu1 %v5525_v36 }
0x10d6   :  { %1282 = vmatpush1.bf16.msra.mxu1 %v5531_v37 }
0x10d7   :  { %1283 = vmatprep.subr.bf16.mxu1 %v5537_v6 }
0x10da   :  { %1284 = vmatpush1.bf16.msra.mxu1 %v5543_v38 }
0x10db   :  { %1285 = vmatprep.subr.bf16.mxu1 %v5549_v7 }
0x10de   :  { %1286 = vmatpush1.bf16.msra.mxu1 %v5555_v9 }
0x11a4   :  { %v1054_v11 = vpop.f32.mrb[20].mxu1 }
0x11a5   :  { %v1061_v4 = vadd.f32 %v5285_v33, %v1054_v11  ;;  %v1056_v12 = vpop.f32.mrb[21].mxu1  ;;  %v1130_v33 = vrot.slane %v5505_v63, 2  ;;  %v1062_v55 = vadd.f32 %v1054_v11, %v5287_v34 }
0x11a6   :  { %v1063_v13 = vadd.f32 %v1056_v12, %v5287_v34  ;;  %v1058_v40 = vpop.f32.mrb[22].mxu1 }
0x11a7   :  { %v1065_v41 = vrot.slane %v1061_v4, 4  ;;  %v1059_v42 = vpop.f32.mrb[23].mxu1  ;;  %v1095_v56 = vrot.slane %v1062_v55, 2 }
0x11a8   :  { %v1105_v44 = vrot.slane %v1063_v13, 2 }
0x11a9   :  { %1074 = vrot.lane.b32.xlu0 %v1065_v41, %s5036_s5  ;;  %v1067_v57 = vadd.f32 %v1065_v41, %v5281_v26  ;;  %v1097_v58 = vadd.f32 %v1095_v56, %v5294_v43 }
0x11aa   :  { %v1107_v45 = vadd.f32 %v1105_v44, %v5279_v24  ;;  %1114 = vrot.lane.b32.xlu1 %v1105_v44, %s5036_s5  ;;  %v1615_v44 = vsel %vm1609_vm3, %v5467_v16, %v5507_v28  ;;  %v5601_v28 = vld [vmem:[#allocation5] ss:$0 sm:$0xff] }
0x11ab   :  { %v4036_v59 = vmul.f32 -1.442695, %v1067_v57  ;;  %v4037_v25 = vmul.f32 -1.442695, %v1097_v58 }
0x11ac   :  { %v4038_v32 = vmul.f32 -1.442695, %v1107_v45 }
0x11ae   :  { %4709 = vpow2.f32 %v4038_v32 }
0x11b8   :  { %v4710_v47 = vpop.eup %4709 }
0x11b9   :  { %v1111_v48 = vadd.f32 1.0, %v4710_v47 }
0x11bb   :  { %4711 = vrcp.f32 %v1111_v48 }
0x11bc   :  { %4713 = vpow2.f32 %v4036_v59 }
0x11bd   :  { %4715 = vpow2.f32 %v4037_v25 }
0x11c5   :  { %v4712_v49 = vpop.eup %4711 }
0x11c6   :  { %v1132_v52 = vmul.f32 %v4712_v49, %v1130_v33  ;;  %v4714_v62 = vpop.eup %4713  ;;  %v1124_v11 = vsub.f32 1.0, %v4712_v49 }
0x11c7   :  { %v4716_v60 = vpop.eup %4715  ;;  %v1071_v61 = vadd.f32 1.0, %v4714_v62 }
0x11c8   :  { %v1101_v2 = vadd.f32 1.0, %v4716_v60 }
0x11c9   :  { %4717 = vrcp.f32 %v1071_v61 }
0x11ca   :  { %4719 = vrcp.f32 %v1101_v2 }
0x11d3   :  { %v4718_v3 = vpop.eup %4717 }
0x11d4   :  { %v4720_v54 = vpop.eup %4719  ;;  %v1084_v30 = vsub.f32 1.0, %v4718_v3  ;;  %v1092_v4 = vmul.f32 %v4718_v3, %v1090_v35 }
0x121b   :  { %v1075_v8 = vpop.permute.xlu0 %1074 }
0x121c   :  { %v1077_v10 = vmul.f32 %v4718_v3, %v1075_v8  ;;  %v1115_v14 = vpop.permute.xlu1 %1114 }
0x121d   :  { %v1117_v53 = vmul.f32 %v4720_v54, %v1115_v14 }
0x121e   :  { %1079 = vrot.lane.b32.xlu0 %v1077_v10, %s5036_s5 }
0x121f   :  { %1119 = vrot.lane.b32.xlu1 %v1117_v53, %s5036_s5 }
0x1290   :  { %v1080_v17 = vpop.permute.xlu0 %1079 }
0x1291   :  { %v1082_v18 = vadd.f32 %v1080_v17, %v5281_v26  ;;  %v1120_v20 = vpop.permute.xlu1 %1119 }
0x1292   :  { %v1122_v23 = vadd.f32 %v1120_v20, %v5279_v24 }
0x1293   :  { %4721 = vtanh.f32 %v1082_v18 }
0x1294   :  { %4723 = vtanh.f32 %v1122_v23 }
0x129d   :  { %v4722_v27 = vpop.eup %4721 }
0x129e   :  { %v4724_v29 = vpop.eup %4723  ;;  %1086 = vrot.lane.b32.xlu0 %v4722_v27, %s5034_s1 }
0x129f   :  { %1126 = vrot.lane.b32.xlu1 %v4724_v29, %s5034_s1 }
0x1310   :  { %v1087_v22 = vpop.permute.xlu0 %1086 }
0x1311   :  { %v1089_v12 = vmul.f32 %v1087_v22, %v1084_v30  ;;  %v1127_v13 = vpop.permute.xlu1 %1126 }
0x1312   :  { %v1129_v40 = vmul.f32 %v1127_v13, %v1124_v11 }
0x1313   :  { %v5574_v41 = vadd.f32 %v1092_v4, %v1089_v12 }
0x1314   :  { %v5576_v42 = vadd.f32 %v1132_v52, %v1129_v40 }
0x1315   :  { %1135 = vrot.lane.b32.xlu1 %v5574_v41, %s5034_s1  ;;  %v5585_v45 = vsel %vm1611_vm4, %v1615_v44, %v5574_v41  ;;  %v1220_v4 = vrot.slane %v5574_v41, 6 }
0x1316   :  { %v1139_v32 = vrot.slane %v5576_v42, 2 }
0x1318   :  { %1140 = vrot.lane.b32.xlu0 %v1139_v32, %s5037_s27 }
0x1387   :  { %v1136_v47 = vpop.permute.xlu1 %1135 }
0x138a   :  { %v1141_v48 = vpop.permute.xlu0 %1140 }
0x138b   :  { %v1143_v33 = vsel %vm381_vm1, %v1136_v47, %v1141_v48 }
0x138c   :  { %v1144_v49 = vpack.c.bf16 %v1143_v33, %v1143_v33 }
0x138e   :  { %v1146_v52 = vrot.slane %v1144_v49, 2 }
0x1390   :  { %4039 = vmatmul.mubr.msk.bf16.vlgmr.msra.gmra.mrb[12].mxu0 %vm257_vm2, %v1146_v52 }
0x1391   :  { %1406 = vmatpush1.bf16.msra.mxu0 %v5518_v5  ;;  %1437 = vmatprep.mubr.bf16.mxu0 %v5033_v0 }
0x1392   :  { %1407 = vmatprep.subr.bf16.mxu0 %v5525_v36 }
0x1395   :  { %1408 = vmatpush1.bf16.msra.mxu0 %v5531_v37 }
0x1396   :  { %1409 = vmatprep.subr.bf16.mxu0 %v5537_v6 }
0x1399   :  { %1410 = vmatpush1.bf16.msra.mxu0 %v5543_v38 }
0x139a   :  { %1411 = vmatprep.subr.bf16.mxu0 %v5549_v7 }
0x139d   :  { %1412 = vmatpush1.bf16.msra.mxu0 %v5555_v9 }
0x1463   :  { %v1184_v16 = vpop.f32.mrb[12].mxu0 }
0x1464   :  { %v1191_v55 = vadd.f32 %v5601_v28, %v1184_v16  ;;  %v1186_v5 = vpop.f32.mrb[13].mxu0  ;;  %v1192_v6 = vadd.f32 %v1184_v16, %v5287_v34 }
0x1465   :  { %v1193_v0 = vadd.f32 %v1186_v5, %v5287_v34  ;;  %v1188_v56 = vpop.f32.mrb[14].mxu0 }
0x1466   :  { %v1195_v36 = vrot.slane %v1191_v55, 2  ;;  %v1189_v57 = vpop.f32.mrb[15].mxu0  ;;  %v1225_v38 = vrot.slane %v1192_v6, 4 }
0x1467   :  { %v1235_v37 = vrot.slane %v1193_v0, 4 }
0x1468   :  { %1204 = vrot.lane.b32.xlu0 %v1195_v36, %s5036_s5  ;;  %v1197_v7 = vadd.f32 %v1195_v36, %v5281_v26  ;;  %v1227_v9 = vadd.f32 %v1225_v38, %v5294_v43 }
0x1469   :  { %1244 = vrot.lane.b32.xlu1 %v1235_v37, %s5036_s5  ;;  %v1237_v29 = vadd.f32 %v1235_v37, %v5279_v24 }
0x146a   :  { %v4040_v58 = vmul.f32 -1.442695, %v1197_v7  ;;  %v4041_v59 = vmul.f32 -1.442695, %v1227_v9 }
0x146b   :  { %v4042_v30 = vmul.f32 -1.442695, %v1237_v29 }
0x146c   :  { %4725 = vpow2.f32 %v4040_v58 }
0x146d   :  { %4727 = vpow2.f32 %v4041_v59 }
0x1476   :  { %v4726_v25 = vpop.eup %4725 }
0x1477   :  { %v4728_v62 = vpop.eup %4727  ;;  %v1201_v60 = vadd.f32 1.0, %v4726_v25 }
0x1478   :  { %v1231_v61 = vadd.f32 1.0, %v4728_v62 }
0x1479   :  { %4729 = vrcp.f32 %v1201_v60 }
0x147a   :  { %4731 = vrcp.f32 %v1231_v61 }
0x1483   :  { %v4730_v2 = vpop.eup %4729 }
0x1484   :  { %v4732_v8 = vpop.eup %4731  ;;  %v1222_v40 = vmul.f32 %v4730_v2, %v1220_v4 }
0x14da   :  { %v1205_v3 = vpop.permute.xlu0 %1204 }
0x14db   :  { %v1207_v54 = vmul.f32 %v4730_v2, %v1205_v3  ;;  %v1245_v10 = vpop.permute.xlu1 %1244 }
0x14dc   :  { %v1247_v14 = vmul.f32 %v4732_v8, %v1245_v10 }
0x14dd   :  { %1209 = vrot.lane.b32.xlu0 %v1207_v54, %s5036_s5 }
0x14de   :  { %1249 = vrot.lane.b32.xlu1 %v1247_v14, %s5036_s5 }
0x154f   :  { %v1210_v53 = vpop.permute.xlu0 %1209 }
0x1550   :  { %v1212_v17 = vadd.f32 %v1210_v53, %v5281_v26  ;;  %v1250_v18 = vpop.permute.xlu1 %1249  ;;  %v1214_v26 = vsub.f32 1.0, %v4730_v2 }
0x1551   :  { %v1252_v20 = vadd.f32 %v1250_v18, %v5279_v24 }
0x1552   :  { %4733 = vtanh.f32 %v1212_v17 }
0x1553   :  { %4735 = vtanh.f32 %v1252_v20 }
0x1554   :  { %4737 = vpow2.f32 %v4042_v30 }
0x155c   :  { %v4734_v23 = vpop.eup %4733 }
0x155d   :  { %v4736_v27 = vpop.eup %4735  ;;  %1216 = vrot.lane.b32.xlu0 %v4734_v23, %s5034_s1 }
0x155e   :  { %1256 = vrot.lane.b32.xlu1 %v4736_v27, %s5034_s1  ;;  %v4738_v35 = vpop.eup %4737 }
0x155f   :  { %v1241_v22 = vadd.f32 1.0, %v4738_v35 }
0x1561   :  { %4739 = vrcp.f32 %v1241_v22 }
0x156b   :  { %v4740_v11 = vpop.eup %4739 }
0x156c   :  { %v1254_v13 = vsub.f32 1.0, %v4740_v11  ;;  %v1261_v33 = vmul.f32 %v4740_v11, %v1139_v32 }
0x15cf   :  { %v1217_v12 = vpop.permute.xlu0 %1216 }
0x15d0   :  { %v1219_v44 = vmul.f32 %v1217_v12, %v1214_v26  ;;  %v1257_v47 = vpop.permute.xlu1 %1256 }
0x15d1   :  { %v1259_v48 = vmul.f32 %v1257_v47, %v1254_v13 }
0x15d2   :  { %v5620_v49 = vadd.f32 %v1222_v40, %v1219_v44 }
0x15d3   :  { %v5622_v52 = vadd.f32 %v1261_v33, %v1259_v48 }
0x15d4   :  { %1264 = vrot.lane.b32.xlu1 %v5620_v49, %s5034_s1  ;;  %v5629_v41 = vsel %vm1613_vm5, %v5585_v45, %v5620_v49  ;;  %v1347_v40 = vrot.slane %v5620_v49, 6 }
0x15d5   :  { %v1268_v16 = vrot.slane %v5622_v52, 6  ;;  %v1387_v33 = vrot.slane %v5622_v52, 2 }
0x15d7   :  { %1269 = vrot.lane.b32.xlu0 %v1268_v16, %s5037_s27 }
0x1646   :  { %v1265_v55 = vpop.permute.xlu1 %1264 }
0x1649   :  { %v1270_v5 = vpop.permute.xlu0 %1269 }
0x164a   :  { %v1272_v32 = vsel %vm381_vm1, %v1265_v55, %v1270_v5 }
0x164b   :  { %v1273_v0 = vpack.c.bf16 %v1272_v32, %v1272_v32 }
0x164d   :  { %v1275_v56 = vrot.slane %v1273_v0, 3 }
0x164f   :  { %4043 = vmatmul.mubr.msk.bf16.vlgmr.msra.gmra.mrb[24].mxu1 %vm257_vm2, %v1275_v56 }
0x1722   :  { %v1313_v36 = vpop.f32.mrb[24].mxu1 }
0x1723   :  { %v1320_v57 = vadd.f32 %v5601_v28, %v1313_v36  ;;  %v1315_v37 = vpop.f32.mrb[25].mxu1  ;;  %v1321_v9 = vadd.f32 %v1313_v36, %v5287_v34 }
0x1724   :  { %v1322_v6 = vadd.f32 %v1315_v37, %v5287_v34  ;;  %v1317_v45 = vpop.f32.mrb[26].mxu1 }
0x1725   :  { %1331 = vrot.lane.b32.xlu0 %v1320_v57, %s5036_s5  ;;  %v1318_v38 = vpop.f32.mrb[27].mxu1  ;;  %v1352_v58 = vrot.slane %v1321_v9, 6  ;;  %v1323_v59 = vadd.f32 %v1320_v57, %v5297_v46 }
0x1726   :  { %v1362_v7 = vrot.slane %v1322_v6, 6 }
0x1727   :  { %v1354_v25 = vadd.f32 %v1352_v58, %v5294_v43  ;;  %v4044_v62 = vmul.f32 -1.442695, %v1323_v59 }
0x1728   :  { %1371 = vrot.lane.b32.xlu1 %v1362_v7, %s5036_s5  ;;  %v1364_v22 = vadd.f32 %v1362_v7, %v5279_v24 }
0x1729   :  { %v4045_v60 = vmul.f32 -1.442695, %v1354_v25  ;;  %4741 = vpow2.f32 %v4044_v62 }
0x172a   :  { %v4046_v11 = vmul.f32 -1.442695, %v1364_v22  ;;  %v4594_v22 = vld [vmem:[%s6569_s9] sm:$0xff]  }
0x172b   :  { %4743 = vpow2.f32 %v4045_v60 }
0x1733   :  { %v4742_v61 = vpop.eup %4741 }
0x1734   :  { %v1327_v3 = vadd.f32 1.0, %v4742_v61 }
0x1735   :  { %v4744_v2 = vpop.eup %4743 }
0x1736   :  { %v1358_v8 = vadd.f32 1.0, %v4744_v2  ;;  %4745 = vrcp.f32 %v1327_v3 }
0x1738   :  { %4747 = vrcp.f32 %v1358_v8 }
0x1740   :  { %v4746_v54 = vpop.eup %4745 }
0x1741   :  { %v1341_v13 = vsub.f32 1.0, %v4746_v54  ;;  %v1349_v47 = vmul.f32 %v4746_v54, %v1347_v40 }
0x1742   :  { %v4748_v53 = vpop.eup %4747 }
0x1797   :  { %v1332_v10 = vpop.permute.xlu0 %1331 }
0x1798   :  { %v1334_v14 = vmul.f32 %v4746_v54, %v1332_v10 }
0x179a   :  { %1336 = vrot.lane.b32.xlu0 %v1334_v14, %s5036_s5  ;;  %v1372_v17 = vpop.permute.xlu1 %1371 }
0x179b   :  { %v1374_v18 = vmul.f32 %v4748_v53, %v1372_v17 }
0x179d   :  { %1376 = vrot.lane.b32.xlu1 %v1374_v18, %s5036_s5 }
0x180c   :  { %v1337_v20 = vpop.permute.xlu0 %1336 }
0x180d   :  { %v1339_v23 = vadd.f32 %v1337_v20, %v5297_v46 }
0x180f   :  { %4749 = vtanh.f32 %v1339_v23  ;;  %v1377_v27 = vpop.permute.xlu1 %1376 }
0x1810   :  { %v1379_v29 = vadd.f32 %v1377_v27, %v5279_v24 }
0x1812   :  { %4751 = vtanh.f32 %v1379_v29 }
0x1813   :  { %4753 = vpow2.f32 %v4046_v11  ;;  %v5038_v11 = vmov 0.0  }
0x1814   :  { %4247 = vmatprep.subr.bf16.mxu1 %v5038_v11  ;;  %4255 = vmatprep.mubr.msk.bf16.mxu1 %vm5039_vm6, %v5038_v11 }
0x1815   :  { %4248 = vmatpush3.bf16.msra.mxu1 %v4594_v22 }
0x1816   :  { %4249 = vmatprep.subr.bf16.mxu1 %v5038_v11 }
0x1819   :  { %v4750_v30 = vpop.eup %4749 }
0x181a   :  { %1343 = vrot.lane.b32.xlu0 %v4750_v30, %s5034_s1 }
0x181c   :  { %v4752_v35 = vpop.eup %4751 }
0x181d   :  { %1383 = vrot.lane.b32.xlu1 %v4752_v35, %s5034_s1  ;;  %v4754_v26 = vpop.eup %4753 }
0x181e   :  { %v1368_v4 = vadd.f32 1.0, %v4754_v26  ;;  %v4596_v26 = vld [vmem:[%s6569_s9 + $0x10] sm:$0xff]  }
0x1820   :  { %4755 = vrcp.f32 %v1368_v4 }
0x182a   :  { %v4756_v12 = vpop.eup %4755 }
0x182b   :  { %v1381_v16 = vsub.f32 1.0, %v4756_v12  ;;  %v1389_v0 = vmul.f32 %v4756_v12, %v1387_v33 }
0x188c   :  { %v1344_v44 = vpop.permute.xlu0 %1343 }
0x188d   :  { %v1346_v48 = vmul.f32 %v1344_v44, %v1341_v13  ;;  %v4597_v44 = vld [vmem:[%s6571_s11] sm:$0xff]  }
0x188e   :  { %4259 = vmatprep.subr.bf16.mxu0 %v4597_v44 }
0x188f   :  { %v5651_v55 = vadd.f32 %v1349_v47, %v1346_v48  ;;  %v1384_v5 = vpop.permute.xlu1 %1383  ;;  %v4598_v47 = vld [vmem:[%s6569_s9 + $0x18] sm:$0xff]  }
0x1890   :  { %v1386_v32 = vmul.f32 %v1384_v5, %v1381_v16 }
0x1891   :  { %1392 = vrot.lane.b32.xlu1 %v5651_v55, %s5034_s1 }
0x1892   :  { %v5655_v56 = vadd.f32 %v1389_v0, %v1386_v32  ;;  %v1475_v32 = vrot.slane %v5651_v55, 6  ;;  %v4600_v0 = vld [vmem:[%s6571_s11 + $0x10] sm:$0xff]  }
0x1894   :  { %v1396_v36 = vrot.slane %v5655_v56, 2 }
0x1896   :  { %1397 = vrot.lane.b32.xlu0 %v1396_v36, %s5037_s27 }
0x1903   :  { %v1393_v49 = vpop.permute.xlu1 %1392 }
0x1908   :  { %v1398_v57 = vpop.permute.xlu0 %1397 }
0x1909   :  { %v1400_v37 = vsel %vm381_vm1, %v1393_v49, %v1398_v57 }
0x190a   :  { %v1401_v6 = vpack.c.bf16 %v1400_v37, %v1400_v37 }
0x190c   :  { %4047 = vmatmul.mubr.msk.bf16.vlgmr.msra.gmra.mrb[16].mxu0 %vm257_vm2, %v1401_v6 }
0x190d   :  { %4260 = vmatpush3.bf16.msra.mxu0 %v4597_v44 }
0x19df   :  { %v1439_v45 = vpop.f32.mrb[16].mxu0 }
0x19e0   :  { %v1446_v38 = vadd.f32 %v5601_v28, %v1439_v45  ;;  %v1441_v7 = vpop.f32.mrb[17].mxu0  ;;  %v1447_v62 = vadd.f32 %v1439_v45, %v5287_v34 }
0x19e1   :  { %v1448_v9 = vadd.f32 %v1441_v7, %v5287_v34  ;;  %v1443_v58 = vpop.f32.mrb[18].mxu0 }
0x19e2   :  { %v1450_v59 = vrot.slane %v1446_v38, 6  ;;  %v1444_v25 = vpop.f32.mrb[19].mxu0  ;;  %v1479_v60 = vadd.f32 %v1447_v62, %v5294_v43 }
0x19e3   :  { %1494 = vrot.lane.b32.xlu1 %v1448_v9, %s5036_s5  ;;  %v1486_v4 = vadd.f32 %v1448_v9, %v5279_v24  ;;  %v4601_v9 = vld [vmem:[%s6571_s11 + $0x18] sm:$0xff]  }
0x19e4   :  { %1459 = vrot.lane.b32.xlu0 %v1450_v59, %s5036_s5  ;;  %v1452_v61 = vadd.f32 %v1450_v59, %v5297_v46  ;;  %v4049_v2 = vmul.f32 -1.442695, %v1479_v60  ;;  %v1622_v59 = vsel %vm1609_vm3, %v5505_v63, %v5471_v21  ;;  %v1625_v63 = vsel %vm1609_vm3, %v5347_v39, %v5313_v31 }
0x19e5   :  { %v4050_v12 = vmul.f32 -1.442695, %v1486_v4  ;;  %v1623_v62 = vsel %vm1611_vm4, %v1622_v59, %v5429_v1 }
0x19e6   :  { %v4048_v3 = vmul.f32 -1.442695, %v1452_v61  ;;  %4757 = vpow2.f32 %v4049_v2  ;;  %v1624_v21 = vsel %vm1613_vm5, %v1623_v62, %v5384_v51 }
0x19e8   :  { %4759 = vpow2.f32 %v4048_v3 }
0x19f0   :  { %v4758_v28 = vpop.eup %4757 }
0x19f1   :  { %v1483_v54 = vadd.f32 1.0, %v4758_v28 }
0x19f2   :  { %v4760_v8 = vpop.eup %4759 }
0x19f3   :  { %v1456_v10 = vadd.f32 1.0, %v4760_v8  ;;  %4761 = vrcp.f32 %v1483_v54 }
0x19f5   :  { %4763 = vrcp.f32 %v1456_v10 }
0x19fd   :  { %v4762_v14 = vpop.eup %4761 }
0x19ff   :  { %v4764_v17 = vpop.eup %4763 }
0x1a00   :  { %v1469_v5 = vsub.f32 1.0, %v4764_v17  ;;  %v1477_v6 = vmul.f32 %v4764_v17, %v1475_v32 }
0x1a55   :  { %v1495_v53 = vpop.permute.xlu1 %1494 }
0x1a56   :  { %v1497_v18 = vmul.f32 %v4762_v14, %v1495_v53  ;;  %v1460_v20 = vpop.permute.xlu0 %1459  ;;  %v5764_v14 = vld [vmem:[%s6574_s14] sm:$0xff]   ;;  %v5771_v53 = vld [vmem:[%s6574_s14 + $0x8] sm:$0xff]  }
0x1a57   :  { %v1462_v34 = vmul.f32 %v4764_v17, %v1460_v20  ;;  %v4051_v17 = vld [vmem:[%s6570_s10] ss:$0 sm:$0xff] }
0x1a58   :  { %1499 = vrot.lane.b32.xlu1 %v1497_v18, %s5036_s5 }
0x1a59   :  { %1464 = vrot.lane.b32.xlu0 %v1462_v34, %s5036_s5 }
0x1aca   :  { %v1500_v43 = vpop.permute.xlu1 %1499 }
0x1acb   :  { %v1502_v23 = vadd.f32 %v1500_v43, %v5279_v24  ;;  %v1465_v27 = vpop.permute.xlu0 %1464  ;;  %v4599_v24 = vld [vmem:[%s6571_s11 + $0x8] sm:$0xff]  }
0x1acc   :  { %v1467_v29 = vadd.f32 %v1465_v27, %v5297_v46  ;;  %v4595_v46 = vld [vmem:[%s6569_s9 + $0x8] sm:$0xff]   ;;  %4261 = vmatprep.subr.bf16.mxu0 %v4599_v24 }
0x1acd   :  { %4765 = vtanh.f32 %v1502_v23  ;;  %4250 = vmatpush3.bf16.msra.mxu1 %v4595_v46  ;;  %4262 = vmatpush3.bf16.msra.mxu0 %v4599_v24 }
0x1ace   :  { %4767 = vtanh.f32 %v1467_v29  ;;  %4251 = vmatprep.subr.bf16.mxu1 %v5038_v11  ;;  %4263 = vmatprep.subr.bf16.mxu0 %v4600_v0 }
0x1acf   :  { %4769 = vpow2.f32 %v4050_v12 }
0x1ad1   :  { %4252 = vmatpush3.bf16.msra.mxu1 %v4596_v26  ;;  %4264 = vmatpush3.bf16.msra.mxu0 %v4600_v0  ;;  %v1756_v26 = vld [vmem:[%s6573_s13] sm:$0x1] }
0x1ad2   :  { %4253 = vmatprep.subr.bf16.mxu1 %v5038_v11  ;;  %4265 = vmatprep.subr.bf16.mxu0 %v4601_v9  ;;  %v1763_v4 = vand.u32 2147483647, %v1756_v26 }
0x1ad4   :  { %v1765_v12 = vsel %vm1764_vm7, %v1763_v4, 0.0  ;;  %v5851_v4 = vld [vmem:[%s6577_s17] sm:$0xff]  }
0x1ad5   :  { %4254 = vmatpush3.bf16.msra.mxu1 %v4598_v47  ;;  %4266 = vmatpush3.bf16.msra.mxu0 %v4601_v9 }
0x1ad6   :  { %4271 = vmatprep.subr.bf16.mxu1 %v5038_v11  ;;  %4279 = vmatprep.subr.bf16.mxu0 %v5038_v11 }
0x1ad7   :  { %v4766_v30 = vpop.eup %4765 }
0x1ad8   :  { %v4768_v35 = vpop.eup %4767  ;;  %1506 = vrot.lane.b32.xlu1 %v4766_v30, %s5034_s1 }
0x1ad9   :  { %1471 = vrot.lane.b32.xlu0 %v4768_v35, %s5034_s1  ;;  %v4770_v13 = vpop.eup %4769 }
0x1ada   :  { %v1490_v40 = vadd.f32 1.0, %v4770_v13  ;;  %v4057_v13 = vld [vmem:[%s6572_s12] ss:$0 sm:$0xff] }
0x1adc   :  { %4771 = vrcp.f32 %v1490_v40 }
0x1ae6   :  { %v4772_v48 = vpop.eup %4771 }
0x1ae7   :  { %v1504_v33 = vsub.f32 1.0, %v4772_v48  ;;  %v1511_v57 = vmul.f32 %v4772_v48, %v1396_v36 }
0x1b4a   :  { %v1507_v16 = vpop.permute.xlu1 %1506 }
0x1b4b   :  { %v1509_v49 = vmul.f32 %v1507_v16, %v1504_v33  ;;  %v1472_v37 = vpop.permute.xlu0 %1471 }
0x1b4c   :  { %v1474_v45 = vmul.f32 %v1472_v37, %v1469_v5 }
0x1b4d   :  { %v1512_v38 = vadd.f32 %v1511_v57, %v1509_v49 }
0x1b4e   :  { %v1478_v7 = vadd.f32 %v1477_v6, %v1474_v45 }
0x1b4f   :  { %v1518_v58 = vrot.slane %v1512_v38, 6  ;;  %v1619_v36 = vsel %vm1609_vm3, %v1512_v38, %v5655_v56 }
0x1b50   :  { %1514 = vrot.lane.b32.xlu1 %v1478_v7, %s5034_s1  ;;  %v1620_v25 = vsel %vm1611_vm4, %v1619_v36, %v5622_v52 }
0x1b51   :  { %1519 = vrot.lane.b32.xlu0 %v1518_v58, %s5037_s27  ;;  %v1621_v56 = vsel %vm1613_vm5, %v1620_v25, %v5576_v42 }
0x1b54   :  { %1629 = vrot.lane.b32.xlu1 %v5436_v50, %s5034_s1  ;;  %v1618_v50 = vsel %vm1609_vm3, %v5651_v55, %v1478_v7  ;;  %v5810_v7 = vrot.slane %v1756_v26, %v5276_v19 }
0x1b55   :  { %1631 = vrot.lane.b32.xlu0 %v5629_v41, %s5034_s1 }
0x1b58   :  { %1641 = vrot.lane.b32.xlu1 %v1621_v56, %s5037_s27 }
0x1b59   :  { %1643 = vrot.lane.b32.xlu0 %v1624_v21, %s5037_s27 }
0x1b5c   :  { %1633 = vrot.lane.b32.xlu1 %v1618_v50, %s5034_s1 }
0x1b5d   :  { %1645 = vrot.lane.b32.xlu0 %v1625_v63, %s5037_s27 }
0x1b80   :  { %1766 = vadd.xlane.f32.xlu1 %v1765_v12  ;;  %v5857_v12 = vld [vmem:[%s6577_s17 + $0x8] sm:$0xff]  }
0x1bc2   :  { %v1515_v1 = vpop.permute.xlu1 %1514 }
0x1bc3   :  { %v1520_v42 = vpop.permute.xlu0 %1519 }
0x1bc4   :  { %v1522_v52 = vsel %vm381_vm1, %v1515_v1, %v1520_v42 }
0x1bc5   :  { %v1523_v41 = vpack.c.bf16 %v1522_v52, %v1522_v52 }
0x1bc6   :  { %v1630_v60 = vpop.permute.xlu1 %1629 }
0x1bc7   :  { %v1540_v51 = vrot.slane %v1523_v41, 1  ;;  %v1632_v61 = vpop.permute.xlu0 %1631 }
0x1bc9   :  { %4256 = vmatmul.mubr.msk.bf16.vlgmr.msra.gmra.mrb[28].mxu1 %vm257_vm2, %v1540_v51 }
0x1bca   :  { %v1642_v2 = vpop.permute.xlu1 %1641  ;;  %4275 = vmatprep.mubr.msk.bf16.mxu1 %vm5039_vm6, %v5038_v11  ;;  %4272 = vmatpush3.bf16.msra.mxu1 %v5764_v14 }
0x1bcb   :  { %v5745_v55 = vsel %vm381_vm1, %v1630_v60, %v1642_v2  ;;  %v1644_v31 = vpop.permute.xlu0 %1643  ;;  %4273 = vmatprep.subr.bf16.mxu1 %v5038_v11 }
0x1bcc   :  { %v5748_v39 = vsel %vm381_vm1, %v1632_v61, %v1644_v31 }
0x1bcd   :  { %v1653_v3 = vpack.c.bf16 %v5748_v39, %v5745_v55 }
0x1bce   :  { %v1634_v28 = vpop.permute.xlu1 %1633  ;;  %4274 = vmatpush3.bf16.msra.mxu1 %v5771_v53 }
0x1bcf   :  { %4267 = vmatprep.mubr.msk.bf16.mxu0 %vm257_vm2, %v1653_v3  ;;  %v1646_v8 = vpop.permute.xlu0 %1645  ;;  %4287 = vmatprep.subr.bf16.mxu1 %v5038_v11 }
0x1bd0   :  { %v5754_v54 = vsel %vm381_vm1, %v1634_v28, %v1646_v8 }
0x1bd1   :  { %v1654_v10 = vpack.c.bf16 %v5754_v54, %v5754_v54 }
0x1bd3   :  { %4268 = vmatmul.mubr.msk.bf16.vlgmr.msra.gmra.mrb[20].mxu0 %vm257_vm2, %v1654_v10 }
0x1bd4   :  { %4283 = vmatprep.mubr.msk.bf16.mxu0 %vm5039_vm6, %v5038_v11 }
0x1c0d   :  { %v1767_v63 = vpop.xlane.xlu1 %1766 }
0x1c0e   :  { %v5819_v1 = vrot.slane %v1767_v63, %v5276_v19  ;;  %v5826_v19 = vsel %vm257_vm2, %v5754_v54, 1.0 }
0x1c9c   :  { %v1602_v18 = vpop.f32.mrb[28].mxu1 }
0x1c9d   :  { %v1603_v20 = vadd.f32 %v4051_v17, %v1602_v18  ;;  %v4257_v34 = vpop.f32.mrb[29].mxu1  ;;  %v5830_v17 = vsel %vm257_vm2, %v5745_v55, 1.0  ;;  %v5834_v18 = vsel %vm257_vm2, %v5748_v39, 1.0  ;;  %v5841_v55 = vld [vmem:[#allocation2] sm:$0x1]  ;;  %v5040_v39 = vmov 64  }
0x1c9e   :  { %v1605_v43 = vpop.f32.mrb[30].mxu1  ;;  %4576 = vset.pattern.permute.xlu0 %v5040_v39 }
0x1c9f   :  { %4773 = vtanh.f32 %v1603_v20  ;;  %v4258_v23 = vpop.f32.mrb[31].mxu1 }
0x1ca6   :  { %v4269_v27 = vpop.f32.mrb[20].mxu0 }
0x1ca7   :  { %v1734_v29 = vpop.f32.mrb[21].mxu0  ;;  %v5795_v24 = vadd.f32 %v4269_v27, %v4057_v13 }
0x1ca8   :  { %v4270_v30 = vpop.f32.mrb[22].mxu0  ;;  %v5800_v0 = vadd.f32 %v4057_v13, %v1734_v29 }
0x1ca9   :  { %v5778_v35 = vpop.eup %4773  ;;  %v1737_v22 = vpop.f32.mrb[23].mxu0 }
0x1caa   :  { %v1808_v46 = vpack.c.bf16 %v5778_v35, %v5778_v35  ;;  %v5802_v49 = vadd.f32 %v4057_v13, %v1737_v22  ;;  %v5864_v13 = vld [vmem:[%s6577_s17 + $0x10] sm:$0xff]  }
0x1cac   :  { %4276 = vmatmul.mubr.msk.bf16.vlgmr.msra.gmra.mrb[32].mxu1 %vm381_vm1, %v1808_v46 }
0x1cad   :  { %4297 = vmatprep.mubr.msk.bf16.mxu1 %vm5039_vm6, %v5038_v11  ;;  %4288 = vmatpush3.bf16.msra.mxu1 %v5851_v4 }
0x1cae   :  { %4289 = vmatprep.subr.bf16.mxu1 %v5038_v11 }
0x1cb1   :  { %4290 = vmatpush3.bf16.msra.mxu1 %v5857_v12 }
0x1cb2   :  { %4291 = vmatprep.subr.bf16.mxu1 %v5038_v11 }
0x1cb5   :  { %4292 = vmatpush3.bf16.msra.mxu1 %v5864_v13 }
0x1cb6   :  { %4293 = vmatprep.subr.bf16.mxu1 %v5038_v11 }
0x1d7f   :  { %v5791_v40 = vpop.f32.mrb[32].mxu1 }
0x1d80   :  { %v1869_v44 = vrot.slane %v5791_v40, 6  ;;  %v1871_v47 = vrot.slane %v5791_v40, 4  ;;  %v4277_v48 = vpop.f32.mrb[33].mxu1  ;;  %v1873_v16 = vrot.slane %v5791_v40, 2 }
0x1d81   :  { %v1861_v33 = vpop.f32.mrb[34].mxu1 }
0x1d82   :  { %v1875_v5 = vsel %vm1609_vm3, %v5791_v40, %v1869_v44  ;;  %v4278_v32 = vpop.f32.mrb[35].mxu1  ;;  %v5871_v44 = vld [vmem:[%s6577_s17 + $0x18] sm:$0xff]  }
0x1d83   :  { %v1876_v57 = vsel %vm1611_vm4, %v1875_v5, %v1871_v47  ;;  %v1880_v37 = vadd.f32 %v1875_v5, %v5795_v24  ;;  %4294 = vmatpush3.bf16.msra.mxu1 %v5871_v44  ;;  %v5879_v47 = vld [vmem:[%s6577_s17 + $0x20] sm:$0xff]  }
0x1d84   :  { %v1877_v6 = vsel %vm1613_vm5, %v1876_v57, %v1873_v16  ;;  %4295 = vmatprep.subr.bf16.mxu1 %v5038_v11  ;;  %v4065_v16 = vld [vmem:[%s6576_s16] ss:$0 sm:$0xff] }
0x1d85   :  { %4775 = vtanh.f32 %v1880_v37  ;;  %v1878_v45 = vadd.f32 %v1877_v6, %v5800_v0  ;;  %v1879_v38 = vadd.f32 %v1877_v6, %v5802_v49  ;;  %v1807_v5 = vld [vmem:[%s6594_s28] sm:$0x3] }
0x1d87   :  { %4777 = vtanh.f32 %v1878_v45  ;;  %4296 = vmatpush3.bf16.msra.mxu1 %v5879_v47 }
0x1d88   :  { %4779 = vtanh.f32 %v1879_v38  ;;  %4325 = vmatprep.subr.bf16.mxu1 %v5038_v11  ;;  %v5904_v38 = vld [vmem:[%s6575_s15] ss:$0 sm:$0xff] }
0x1d8f   :  { %v4776_v9 = vpop.eup %4775 }
0x1d90   :  { %v1886_v58 = vmul.f32 %v4776_v9, %v5810_v7 }
0x1d91   :  { %v4778_v36 = vpop.eup %4777 }
0x1d92   :  { %v4780_v59 = vpop.eup %4779  ;;  %v1894_v25 = vsel %vm1893_vm8, %v1886_v58, 0.0  ;;  %v1884_v62 = vmul.f32 %v4778_v36, %v5810_v7 }
0x1d93   :  { %1895 = vadd.xlane.f32.xlu1 %v1894_v25  ;;  %v1885_v21 = vmul.f32 %v4780_v59, %v5810_v7 }
0x1d94   :  { %v1887_v56 = vsel %vm381_vm1, %v1884_v62, 0.0 }
0x1d95   :  { %1888 = vadd.xlane.f32.xlu0 %v1887_v56  ;;  %v1890_v50 = vsel %vm381_vm1, %v1885_v21, 0.0 }
0x1d99   :  { %1891 = vadd.xlane.f32.xlu0 %v1890_v50 }
0x1e20   :  { %v1896_v42 = vpop.xlane.xlu1 %1895 }
0x1e21   :  { %v1903_v52 = vsub.f32 %v1896_v42, %v5819_v1 }
0x1e22   :  { %v1889_v41 = vpop.xlane.xlu0 %1888 }
0x1e23   :  { %v1901_v60 = vsub.f32 %v1889_v41, %v5819_v1  ;;  %v1908_v51 = vmul.f32 1.442695, %v1903_v52 }
0x1e25   :  { %v1904_v61 = vmul.f32 1.442695, %v1901_v60  ;;  %4781 = vpow2.f32 %v1908_v51  ;;  %v5912_v51 = vld [vmem:[%s6578_s18] sm:$0xff]  }
0x1e26   :  { %v1892_v2 = vpop.xlane.xlu0 %1891 }
0x1e27   :  { %v1902_v31 = vsub.f32 %v1892_v2, %v5819_v1  ;;  %4783 = vpow2.f32 %v1904_v61  ;;  %v5918_v2 = vld [vmem:[%s6578_s18 + $0x8] sm:$0xff]  }
0x1e29   :  { %v1906_v3 = vmul.f32 1.442695, %v1902_v31 }
0x1e2b   :  { %4785 = vpow2.f32 %v1906_v3 }
0x1e2f   :  { %v4782_v28 = vpop.eup %4781 }
0x1e30   :  { %v1912_v20 = vmul.f32 %v4782_v28, %v5826_v19 }
0x1e31   :  { %v4784_v8 = vpop.eup %4783 }
0x1e32   :  { %v1910_v34 = vmul.f32 %v4784_v8, %v5830_v17  ;;  %v1914_v27 = vpack.c.bf16 %v1912_v20, %v1912_v20 }
0x1e34   :  { %v1920_v54 = vsel %vm1609_vm3, %v1914_v27, 0 }
0x1e35   :  { %v4786_v10 = vpop.eup %4785 }
0x1e36   :  { %v1911_v43 = vmul.f32 %v4786_v10, %v5834_v18 }
0x1e38   :  { %v1913_v23 = vpack.c.bf16 %v1911_v43, %v1910_v34 }
0x1e3a   :  { %4280 = vmatpush3.bf16.msra.mxu0 %v1913_v23  ;;  %v5937_v23 = vld [vmem:[%s6579_s19] ss:$0 sm:$0xff] }
0x1e3b   :  { %4281 = vmatprep.subr.bf16.mxu0 %v5038_v11 }
0x1e3e   :  { %4282 = vmatpush3.bf16.msra.mxu0 %v1920_v54 }
0x1e3f   :  { %4301 = vmatprep.subr.bf16.mxu0 %v5038_v11 }
0x1e41   :  { %4284 = vmatmul.mubr.msk.bf16.vlgmr.msra.gmra.mrb[24].mxu0 %vm1915_vm9, %v5841_v55 }
0x1e42   :  { %4305 = vmatprep.mubr.msk.bf16.mxu0 %vm5039_vm6, %v5038_v11  ;;  %4302 = vmatpush3.bf16.msra.mxu0 %v5912_v51 }
0x1e43   :  { %4303 = vmatprep.subr.bf16.mxu0 %v5038_v11 }
0x1e46   :  { %4304 = vmatpush3.bf16.msra.mxu0 %v5918_v2 }
0x1e47   :  { %4309 = vmatprep.subr.bf16.mxu0 %v5038_v11 }
0x1f14   :  { %v1956_v29 = vpop.f32.mrb[24].mxu0 }
0x1f15   :  { %4787 = vrcp.f32 %v1956_v29  ;;  %v4285_v30 = vpop.f32.mrb[25].mxu0 }
0x1f16   :  { %v1959_v22 = vpop.f32.mrb[26].mxu0 }
0x1f17   :  { %v4286_v46 = vpop.f32.mrb[27].mxu0 }
0x1f1f   :  { %v4788_v26 = vpop.eup %4787 }
0x1f20   :  { %1965 = vperm.xlu0 %4576, %v4788_v26   ;;  %v5945_v26 = vand.u32 127, %v109_v15  ;;  %v5953_v15 = vld [vmem:[%s6595_s30] sm:$0xff]  }
0x1f9f   :  { %v1966_v48 = vpop.permute.xlu0 %1965 }
0x1fa0   :  { %v1968_v33 = vmul.f32 %v1966_v48, %v1956_v29 }
0x1fa2   :  { %1970 = vrot.lane.b32.xlu1 %v1968_v33, %s5041_s25 }
0x1fa6   :  { %1864 = vrot.lane.b32.xlu1 %v4065_v16, %s5037_s27 }
0x2014   :  { %v1971_v32 = vpop.permute.xlu1 %1970 }
0x2015   :  { %v1973_v57 = vsel %vm137_vm0, %v1807_v5, %v1971_v32 }
0x2016   :  { %v1974_v37 = vpack.c.bf16 %v1973_v57, %v1973_v57 }
0x2018   :  { %4298 = vmatmul.mubr.msk.bf16.vlgmr.msra.gmra.mrb[36].mxu1 %vm2005_vm10, %v1974_v37  ;;  %v5893_v6 = vpop.permute.xlu1 %1864 }
0x2019   :  { %v1867_v45 = vadd.f32 %v5893_v6, %v5791_v40  ;;  %4329 = vmatprep.mubr.msk.bf16.mxu1 %vm5039_vm6, %v5038_v11 }
0x201b   :  { %2051 = vrot.lane.b32.xlu1 %v1867_v45, %s5034_s1 }
0x201f   :  { %2061 = vrot.lane.b32.xlu1 %v1867_v45, %s5037_s27 }
0x208d   :  { %v2052_v59 = vpop.permute.xlu1 %2051 }
0x2091   :  { %v2062_v42 = vpop.permute.xlu1 %2061 }
0x20eb   :  { %v2043_v9 = vpop.f32.mrb[36].mxu1 }
0x20ec   :  { %v2049_v58 = vadd.f32 %v5904_v38, %v2043_v9  ;;  %2100 = vrot.lane.b32.xlu0 %v2043_v9, %s5037_s27  ;;  %v4299_v36 = vpop.f32.mrb[37].mxu1 }
0x20ed   :  { %v2046_v40 = vpop.f32.mrb[38].mxu1 }
0x20ee   :  { %v2054_v25 = vadd.f32 %v2052_v59, %v2049_v58  ;;  %v4300_v62 = vpop.f32.mrb[39].mxu1 }
0x20f0   :  { %v4077_v56 = vmul.f32 -1.442695, %v2054_v25 }
0x20f2   :  { %4789 = vpow2.f32 %v4077_v56 }
0x20fc   :  { %v4790_v21 = vpop.eup %4789 }
0x20fd   :  { %v2058_v50 = vadd.f32 1.0, %v4790_v21 }
0x20ff   :  { %4791 = vrcp.f32 %v2058_v50 }
0x2109   :  { %v4792_v63 = vpop.eup %4791 }
0x210a   :  { %v2064_v52 = vmul.f32 %v4792_v63, %v2062_v42  ;;  %v2071_v3 = vsub.f32 1.0, %v4792_v63 }
0x210c   :  { %2066 = vrot.lane.b32.xlu1 %v2064_v52, %s5036_s5 }
0x217e   :  { %v2067_v41 = vpop.permute.xlu1 %2066 }
0x217f   :  { %v2069_v60 = vadd.f32 %v2067_v41, %v2049_v58  ;;  %v4612_v58 = vld [vmem:[%s6595_s30 + $0x8] ss:$0 sps:$4 sm:$0xff]  }
0x2180   :  { %v5961_v36 = vsel %vm1611_vm4, %v4612_v58, 0 }
0x2181   :  { %4793 = vtanh.f32 %v2069_v60 }
0x218b   :  { %v4794_v61 = vpop.eup %4793 }
0x218c   :  { %2073 = vrot.lane.b32.xlu1 %v4794_v61, %s5034_s1 }
0x2190   :  { %2078 = vrot.lane.b32.xlu1 %v5778_v35, %s5037_s27  ;;  %v2101_v35 = vpop.permute.xlu0 %2100 }
0x21fe   :  { %v2074_v31 = vpop.permute.xlu1 %2073 }
0x21ff   :  { %v2076_v8 = vmul.f32 %v2074_v31, %v2071_v3 }
0x2202   :  { %v2079_v28 = vpop.permute.xlu1 %2078 }
0x2203   :  { %v2081_v10 = vmul.f32 %v4792_v63, %v2079_v28 }
0x2205   :  { %v5926_v20 = vadd.f32 %v2081_v10, %v2076_v8 }
0x2207   :  { %v2083_v34 = vpack.c.bf16 %v5926_v20, %v5926_v20 }
0x2209   :  { %2085 = vrot.lane.b32.xlu1 %v2083_v34, %s5034_s1 }
0x227b   :  { %v2086_v43 = vpop.permute.xlu1 %2085 }
0x227c   :  { %4306 = vmatmul.mubr.msk.bf16.vlgmr.msra.gmra.mrb[28].mxu0 %vm381_vm1, %v2086_v43 }
0x227d   :  { %4313 = vmatprep.mubr.msk.bf16.mxu0 %vm5039_vm6, %v5038_v11  ;;  %4310 = vmatpush3.bf16.msra.mxu0 %v5953_v15 }
0x227e   :  { %4311 = vmatprep.subr.bf16.mxu0 %v5038_v11 }
0x2281   :  { %4312 = vmatpush3.bf16.msra.mxu0 %v5961_v36 }
0x2282   :  { %4317 = vmatprep.subr.bf16.mxu0 %v5038_v11 }
0x234f   :  { %v2140_v27 = vpop.f32.mrb[28].mxu0 }
0x2350   :  { %v2141_v54 = vadd.f32 %v2140_v27, %v2101_v35  ;;  %v4307_v39 = vpop.f32.mrb[29].mxu0 }
0x2351   :  { %v2143_v29 = vpop.f32.mrb[30].mxu0 }
0x2352   :  { %v5940_v30 = vadd.f32 %v5937_v23, %v2141_v54  ;;  %v4308_v22 = vpop.f32.mrb[31].mxu0 }
0x2354   :  { %v2148_v46 = vsel %vm2147_vm11, %v5940_v30, -inf }
0x2355   :  { %2149 = vmax.xlane.f32.xlu1 %v2148_v46 }
0x23e2   :  { %v2150_v48 = vpop.xlane.xlu1 %2149 }
0x23e3   :  { %vm2151_vm12 = vcmp.eq.f32.partialorder %v5940_v30, %v2150_v48 }
0x23e4   :  { %v2152_v33 = vsel %vm2151_vm12, %v5945_v26, 24 }
0x23e5   :  { %v2153_v16 = vsel %vm2147_vm11, %v2152_v33, 2147483647 }
0x23e6   :  { %v2155_v5 = vshra.s32 %v2153_v16, 16  ;;  %v2154_v57 = vand.u32 65535, %v2153_v16 }
0x23e8   :  { %v2157_v32 = vcvt.s32.f32 %v2155_v5  ;;  %v2156_v45 = vcvt.s32.f32 %v2154_v57 }
0x23ea   :  { %2158 = vmin.xlane.f32.xlu0 %v2157_v32 }
0x2477   :  { %v2159_v37 = vpop.xlane.xlu0 %2158 }
0x2478   :  { %vm2160_vm13 = vcmp.eq.f32.partialorder %v2157_v32, %v2159_v37  ;;  %v2165_v59 = vcvt.f32.s32 %v2159_v37 }
0x2479   :  { %v2161_v9 = vsel %vm2160_vm13, %v2156_v45, inf }
0x247a   :  { %2162 = vmin.xlane.f32.xlu0 %v2161_v9  ;;  %v2166_v25 = vshll.u32 %v2165_v59, 16 }
0x2507   :  { %v2163_v40 = vpop.xlane.xlu0 %2162 }
0x2508   :  { %v2164_v62 = vcvt.f32.s32 %v2163_v40 }
0x250a   :  { %v2167_v56 = vadd.s32 %v2166_v25, %v2164_v62 }
0x250c   :  { %vm2168_vm14 = vcmp.eq.s32.totalorder %v5945_v26, %v2167_v56 }
0x250d   :  { %v4081_v21 = vsel %vm2168_vm14, 1.0, %v5038_v11 }
0x250e   :  { %v2171_v50 = vpack.c.bf16 %v4081_v21, %v4081_v21 }
0x2510   :  { %4314 = vmatmul.mubr.msk.bf16.vlgmr.msra.gmra.mrb[32].mxu0 %vm2181_vm15, %v2171_v50 }
0x2511   :  { %4318 = vmatpush3.bf16.msra.mxu0 %v5764_v14  ;;  %4321 = vmatprep.mubr.msk.bf16.mxu0 %vm5039_vm6, %v5038_v11 }
0x2512   :  { %4319 = vmatprep.subr.bf16.mxu0 %v5038_v11 }
0x2515   :  { %4320 = vmatpush3.bf16.msra.mxu0 %v5771_v53 }
0x2516   :  { %4333 = vmatprep.subr.bf16.mxu0 %v5038_v11 }
0x2518   :  { %4322 = vmatmul.mubr.msk.bf16.vlgmr.msra.gmra.mrb[36].mxu0 %vm381_vm1, %v2086_v43 }
0x2519   :  { %4334 = vmatpush3.bf16.msra.mxu0 %v5851_v4  ;;  %4343 = vmatprep.mubr.msk.bf16.mxu0 %vm5039_vm6, %v5038_v11 }
0x251a   :  { %4335 = vmatprep.subr.bf16.mxu0 %v5038_v11 }
0x251d   :  { %4336 = vmatpush3.bf16.msra.mxu0 %v5857_v12 }
0x251e   :  { %4337 = vmatprep.subr.bf16.mxu0 %v5038_v11 }
0x2521   :  { %4338 = vmatpush3.bf16.msra.mxu0 %v5864_v13 }
0x2522   :  { %4339 = vmatprep.subr.bf16.mxu0 %v5038_v11 }
0x2525   :  { %4340 = vmatpush3.bf16.msra.mxu0 %v5871_v44 }
0x2526   :  { %4341 = vmatprep.subr.bf16.mxu0 %v5038_v11 }
0x2529   :  { %4342 = vmatpush3.bf16.msra.mxu0 %v5879_v47 }
0x252a   :  { %4371 = vmatprep.subr.bf16.mxu0 %v5038_v11 }
0x25e3   :  { %v5987_v63 = vpop.f32.mrb[32].mxu0 }
0x25e4   :  { %v4315_v42 = vpop.f32.mrb[33].mxu0 }
0x25e5   :  { %v2225_v52 = vpop.f32.mrb[34].mxu0 }
0x25e6   :  { %v4316_v41 = vpop.f32.mrb[35].mxu0 }
0x25eb   :  { %v5989_v60 = vpop.f32.mrb[36].mxu0 }
0x25ec   :  { %v2270_v61 = vrot.slane %v5989_v60, 6  ;;  %v2272_v31 = vrot.slane %v5989_v60, 4  ;;  %v4323_v3 = vpop.f32.mrb[37].mxu0  ;;  %v2274_v8 = vrot.slane %v5989_v60, 2 }
0x25ed   :  { %v2265_v28 = vpop.f32.mrb[38].mxu0 }
0x25ee   :  { %v2276_v10 = vsel %vm1609_vm3, %v5989_v60, %v2270_v61  ;;  %v4324_v34 = vpop.f32.mrb[39].mxu0 }
0x25ef   :  { %v2277_v43 = vsel %vm1611_vm4, %v2276_v10, %v2272_v31  ;;  %v2281_v35 = vadd.f32 %v2276_v10, %v5795_v24 }
0x25f0   :  { %v2278_v27 = vsel %vm1613_vm5, %v2277_v43, %v2274_v8 }
0x25f1   :  { %v2279_v54 = vadd.f32 %v2278_v27, %v5800_v0  ;;  %v2280_v39 = vadd.f32 %v2278_v27, %v5802_v49  ;;  %4795 = vtanh.f32 %v2281_v35  ;;  %v2268_v27 = vadd.f32 %v5989_v60, %v5893_v6 }
0x25f3   :  { %4797 = vtanh.f32 %v2279_v54 }
0x25f4   :  { %4799 = vtanh.f32 %v2280_v39 }
0x25fb   :  { %v4796_v29 = vpop.eup %4795 }
0x25fc   :  { %v2287_v5 = vmul.f32 %v4796_v29, %v5810_v7 }
0x25fd   :  { %v4798_v22 = vpop.eup %4797 }
0x25fe   :  { %v4800_v46 = vpop.eup %4799  ;;  %v2285_v48 = vmul.f32 %v4798_v22, %v5810_v7  ;;  %v2294_v57 = vsel %vm1893_vm8, %v2287_v5, 0.0 }
0x25ff   :  { %v2286_v33 = vmul.f32 %v4800_v46, %v5810_v7 }
0x2600   :  { %v2288_v16 = vsel %vm381_vm1, %v2285_v48, 0.0 }
0x2601   :  { %v2291_v32 = vsel %vm381_vm1, %v2286_v33, 0.0  ;;  %2289 = vadd.xlane.f32.xlu1 %v2288_v16 }
0x2602   :  { %2292 = vadd.xlane.f32.xlu0 %v2291_v32 }
0x2605   :  { %2295 = vadd.xlane.f32.xlu1 %v2294_v57 }
0x268e   :  { %v2290_v37 = vpop.xlane.xlu1 %2289 }
0x268f   :  { %v2293_v45 = vpop.xlane.xlu0 %2292  ;;  %v2297_v9 = vsub.f32 %v2290_v37, %v5819_v1 }
0x2690   :  { %v2298_v58 = vsub.f32 %v2293_v45, %v5819_v1 }
0x2691   :  { %v2300_v59 = vmul.f32 1.442695, %v2297_v9 }
0x2692   :  { %v2302_v40 = vmul.f32 1.442695, %v2298_v58  ;;  %v2296_v25 = vpop.xlane.xlu1 %2295 }
0x2693   :  { %4801 = vpow2.f32 %v2300_v59  ;;  %v2299_v62 = vsub.f32 %v2296_v25, %v5819_v1 }
0x2694   :  { %4803 = vpow2.f32 %v2302_v40 }
0x2695   :  { %v2304_v56 = vmul.f32 1.442695, %v2299_v62 }
0x2697   :  { %4805 = vpow2.f32 %v2304_v56 }
0x269d   :  { %v4802_v21 = vpop.eup %4801 }
0x269e   :  { %v4804_v50 = vpop.eup %4803  ;;  %v2306_v42 = vmul.f32 %v4802_v21, %v5830_v17 }
0x269f   :  { %v2307_v52 = vmul.f32 %v4804_v50, %v5834_v18 }
0x26a1   :  { %v4806_v41 = vpop.eup %4805  ;;  %v2309_v61 = vpack.c.bf16 %v2307_v52, %v2306_v42 }
0x26a2   :  { %v2308_v31 = vmul.f32 %v4806_v41, %v5826_v19 }
0x26a3   :  { %4326 = vmatpush3.bf16.msra.mxu1 %v2309_v61 }
0x26a4   :  { %4327 = vmatprep.subr.bf16.mxu1 %v5038_v11  ;;  %v2310_v3 = vpack.c.bf16 %v2308_v31, %v2308_v31 }
0x26a6   :  { %v2312_v28 = vsel %vm1609_vm3, %v2310_v3, 0 }
0x26a7   :  { %4328 = vmatpush3.bf16.msra.mxu1 %v2312_v28 }
0x26a8   :  { %4347 = vmatprep.subr.bf16.mxu1 %v5038_v11 }
0x26aa   :  { %4330 = vmatmul.mubr.msk.bf16.vlgmr.msra.gmra.mrb[40].mxu1 %vm1915_vm9, %v5841_v55 }
0x26ab   :  { %4348 = vmatpush3.bf16.msra.mxu1 %v5912_v51  ;;  %4351 = vmatprep.mubr.msk.bf16.mxu1 %vm5039_vm6, %v5038_v11 }
0x26ac   :  { %4349 = vmatprep.subr.bf16.mxu1 %v5038_v11 }
0x26af   :  { %4350 = vmatpush3.bf16.msra.mxu1 %v5918_v2 }
0x26b0   :  { %4355 = vmatprep.subr.bf16.mxu1 %v5038_v11 }
0x277d   :  { %v2348_v8 = vpop.f32.mrb[40].mxu1 }
0x277e   :  { %4807 = vrcp.f32 %v2348_v8  ;;  %v4331_v10 = vpop.f32.mrb[41].mxu1 }
0x277f   :  { %v2351_v34 = vpop.f32.mrb[42].mxu1 }
0x2780   :  { %v4332_v43 = vpop.f32.mrb[43].mxu1 }
0x2788   :  { %v4808_v35 = vpop.eup %4807 }
0x2789   :  { %2357 = vperm.xlu0 %4576, %v4808_v35  }
0x278d   :  { %2422 = vrot.lane.b32.xlu0 %v2268_v27, %s5037_s27 }
0x2808   :  { %v2358_v54 = vpop.permute.xlu0 %2357 }
0x2809   :  { %v2360_v39 = vmul.f32 %v2358_v54, %v2348_v8 }
0x280b   :  { %2362 = vrot.lane.b32.xlu1 %v2360_v39, %s5041_s25 }
0x280c   :  { %v2423_v58 = vpop.permute.xlu0 %2422 }
0x280f   :  { %2412 = vrot.lane.b32.xlu1 %v2268_v27, %s5034_s1 }
0x287d   :  { %v2363_v29 = vpop.permute.xlu1 %2362 }
0x287e   :  { %v2365_v22 = vsel %vm137_vm0, %v5987_v63, %v2363_v29 }
0x287f   :  { %v2366_v46 = vpack.c.bf16 %v2365_v22, %v2365_v22 }
0x2881   :  { %4344 = vmatmul.mubr.msk.bf16.vlgmr.msra.gmra.mrb[40].mxu0 %vm2005_vm10, %v2366_v46  ;;  %v2413_v16 = vpop.permute.xlu1 %2412 }
0x2882   :  { %4375 = vmatprep.mubr.msk.bf16.mxu0 %vm5039_vm6, %v5038_v11 }
0x2954   :  { %v2404_v48 = vpop.f32.mrb[40].mxu0 }
0x2955   :  { %v2410_v60 = vadd.f32 %v5904_v38, %v2404_v48  ;;  %v4345_v33 = vpop.f32.mrb[41].mxu0 }
0x2956   :  { %v2407_v5 = vpop.f32.mrb[42].mxu0 }
0x2957   :  { %v2415_v32 = vadd.f32 %v2413_v16, %v2410_v60  ;;  %v4346_v57 = vpop.f32.mrb[43].mxu0 }
0x2959   :  { %v4088_v37 = vmul.f32 -1.442695, %v2415_v32 }
0x295b   :  { %4809 = vpow2.f32 %v4088_v37 }
0x2965   :  { %v4810_v45 = vpop.eup %4809 }
0x2966   :  { %v2419_v9 = vadd.f32 1.0, %v4810_v45 }
0x2968   :  { %4811 = vrcp.f32 %v2419_v9 }
0x2972   :  { %v4812_v63 = vpop.eup %4811 }
0x2973   :  { %v2425_v59 = vmul.f32 %v4812_v63, %v2423_v58  ;;  %v2432_v56 = vsub.f32 1.0, %v4812_v63  ;;  %v2438_v50 = vmul.f32 %v4812_v63, %v5926_v20 }
0x2975   :  { %2427 = vrot.lane.b32.xlu1 %v2425_v59, %s5036_s5 }
0x29e7   :  { %v2428_v40 = vpop.permute.xlu1 %2427 }
0x29e8   :  { %v2430_v25 = vadd.f32 %v2428_v40, %v2410_v60 }
0x29ea   :  { %4813 = vtanh.f32 %v2430_v25 }
0x29f4   :  { %v4814_v62 = vpop.eup %4813 }
0x29f5   :  { %2434 = vrot.lane.b32.xlu0 %v4814_v62, %s5034_s1 }
0x29f9   :  { %2445 = vrot.lane.b32.xlu0 %v2404_v48, %s5037_s27 }
0x2a67   :  { %v2435_v21 = vpop.permute.xlu0 %2434 }
0x2a68   :  { %v2437_v42 = vmul.f32 %v2435_v21, %v2432_v56 }
0x2a6a   :  { %v6039_v52 = vadd.f32 %v2438_v50, %v2437_v42 }
0x2a6b   :  { %v2446_v20 = vpop.permute.xlu0 %2445 }
0x2a6c   :  { %v2440_v41 = vpack.c.bf16 %v6039_v52, %v6039_v52 }
0x2a6e   :  { %2442 = vrot.lane.b32.xlu1 %v2440_v41, %s5034_s1 }
0x2ae0   :  { %v2443_v61 = vpop.permute.xlu1 %2442 }
0x2ae1   :  { %4352 = vmatmul.mubr.msk.bf16.vlgmr.msra.gmra.mrb[44].mxu1 %vm381_vm1, %v2443_v61 }
0x2ae2   :  { %4356 = vmatpush3.bf16.msra.mxu1 %v5953_v15  ;;  %4359 = vmatprep.mubr.msk.bf16.mxu1 %vm5039_vm6, %v5038_v11 }
0x2ae3   :  { %4357 = vmatprep.subr.bf16.mxu1 %v5038_v11 }
0x2ae6   :  { %4358 = vmatpush3.bf16.msra.mxu1 %v5961_v36 }
0x2ae7   :  { %4363 = vmatprep.subr.bf16.mxu1 %v5038_v11 }
0x2bb4   :  { %v2485_v31 = vpop.f32.mrb[44].mxu1 }
0x2bb5   :  { %v2486_v3 = vadd.f32 %v2485_v31, %v2446_v20  ;;  %v4353_v28 = vpop.f32.mrb[45].mxu1 }
0x2bb6   :  { %v2488_v8 = vpop.f32.mrb[46].mxu1 }
0x2bb7   :  { %v6052_v10 = vadd.f32 %v5937_v23, %v2486_v3  ;;  %v4354_v34 = vpop.f32.mrb[47].mxu1 }
0x2bb9   :  { %v2492_v15 = vsel %vm2147_vm11, %v6052_v10, -inf }
0x2bba   :  { %2493 = vmax.xlane.f32.xlu1 %v2492_v15 }
0x2c47   :  { %v2494_v43 = vpop.xlane.xlu1 %2493 }
0x2c48   :  { %vm2495_vm2 = vcmp.eq.f32.partialorder %v6052_v10, %v2494_v43 }
0x2c49   :  { %v2496_v35 = vsel %vm2495_vm2, %v5945_v26, 24 }
0x2c4a   :  { %v2497_v27 = vsel %vm2147_vm11, %v2496_v35, 2147483647 }
0x2c4b   :  { %v2499_v54 = vshra.s32 %v2497_v27, 16  ;;  %v2498_v29 = vand.u32 65535, %v2497_v27 }
0x2c4d   :  { %v2501_v39 = vcvt.s32.f32 %v2499_v54  ;;  %v2500_v46 = vcvt.s32.f32 %v2498_v29 }
0x2c4f   :  { %2502 = vmin.xlane.f32.xlu0 %v2501_v39 }
0x2cdc   :  { %v2503_v22 = vpop.xlane.xlu0 %2502 }
0x2cdd   :  { %vm2504_vm7 = vcmp.eq.f32.partialorder %v2501_v39, %v2503_v22  ;;  %v2509_v48 = vcvt.f32.s32 %v2503_v22 }
0x2cde   :  { %v2505_v23 = vsel %vm2504_vm7, %v2500_v46, inf }
0x2cdf   :  { %2506 = vmin.xlane.f32.xlu0 %v2505_v23  ;;  %v2510_v33 = vshll.u32 %v2509_v48, 16 }
0x2d6c   :  { %v2507_v60 = vpop.xlane.xlu0 %2506 }
0x2d6d   :  { %v2508_v16 = vcvt.f32.s32 %v2507_v60 }
0x2d6f   :  { %v2511_v5 = vadd.s32 %v2510_v33, %v2508_v16 }
0x2d71   :  { %vm2512_vm12 = vcmp.eq.s32.totalorder %v5945_v26, %v2511_v5 }
0x2d72   :  { %v4090_v32 = vsel %vm2512_vm12, 1.0, %v5038_v11 }
0x2d73   :  { %v2515_v57 = vpack.c.bf16 %v4090_v32, %v4090_v32 }
0x2d75   :  { %4360 = vmatmul.mubr.msk.bf16.vlgmr.msra.gmra.mrb[48].mxu1 %vm2181_vm15, %v2515_v57 }
0x2d76   :  { %4364 = vmatpush3.bf16.msra.mxu1 %v5764_v14  ;;  %4367 = vmatprep.mubr.msk.bf16.mxu1 %vm5039_vm6, %v5038_v11 }
0x2d77   :  { %4365 = vmatprep.subr.bf16.mxu1 %v5038_v11 }
0x2d7a   :  { %4366 = vmatpush3.bf16.msra.mxu1 %v5771_v53 }
0x2d7b   :  { %4379 = vmatprep.subr.bf16.mxu1 %v5038_v11 }
0x2d7d   :  { %4368 = vmatmul.mubr.msk.bf16.vlgmr.msra.gmra.mrb[52].mxu1 %vm381_vm1, %v2443_v61 }
0x2d7e   :  { %4380 = vmatpush3.bf16.msra.mxu1 %v5851_v4  ;;  %4389 = vmatprep.mubr.msk.bf16.mxu1 %vm5039_vm6, %v5038_v11 }
0x2d7f   :  { %4381 = vmatprep.subr.bf16.mxu1 %v5038_v11 }
0x2d82   :  { %4382 = vmatpush3.bf16.msra.mxu1 %v5857_v12 }
0x2d83   :  { %4383 = vmatprep.subr.bf16.mxu1 %v5038_v11 }
0x2d86   :  { %4384 = vmatpush3.bf16.msra.mxu1 %v5864_v13 }
0x2d87   :  { %4385 = vmatprep.subr.bf16.mxu1 %v5038_v11 }
0x2d8a   :  { %4386 = vmatpush3.bf16.msra.mxu1 %v5871_v44 }
0x2d8b   :  { %4387 = vmatprep.subr.bf16.mxu1 %v5038_v11 }
0x2d8e   :  { %4388 = vmatpush3.bf16.msra.mxu1 %v5879_v47 }
0x2d8f   :  { %4417 = vmatprep.subr.bf16.mxu1 %v5038_v11 }
0x2e48   :  { %v6081_v14 = vpop.f32.mrb[48].mxu1 }
0x2e49   :  { %v4361_v53 = vpop.f32.mrb[49].mxu1 }
0x2e4a   :  { %v2556_v37 = vpop.f32.mrb[50].mxu1 }
0x2e4b   :  { %v4362_v45 = vpop.f32.mrb[51].mxu1 }
0x2e50   :  { %v6083_v9 = vpop.f32.mrb[52].mxu1 }
0x2e51   :  { %v2601_v63 = vrot.slane %v6083_v9, 6  ;;  %v2603_v58 = vrot.slane %v6083_v9, 4  ;;  %v4369_v59 = vpop.f32.mrb[53].mxu1  ;;  %v2605_v25 = vrot.slane %v6083_v9, 2 }
0x2e52   :  { %v2596_v40 = vpop.f32.mrb[54].mxu1 }
0x2e53   :  { %v2607_v62 = vsel %vm1609_vm3, %v6083_v9, %v2601_v63  ;;  %v4370_v56 = vpop.f32.mrb[55].mxu1 }
0x2e54   :  { %v2608_v21 = vsel %vm1611_vm4, %v2607_v62, %v2603_v58  ;;  %v2612_v50 = vadd.f32 %v2607_v62, %v5795_v24  ;;  %v2599_v56 = vadd.f32 %v6083_v9, %v5893_v6 }
0x2e55   :  { %v2609_v42 = vsel %vm1613_vm5, %v2608_v21, %v2605_v25 }
0x2e56   :  { %v2610_v41 = vadd.f32 %v2609_v42, %v5800_v0  ;;  %v2611_v61 = vadd.f32 %v2609_v42, %v5802_v49  ;;  %4815 = vtanh.f32 %v2612_v50 }
0x2e58   :  { %4817 = vtanh.f32 %v2610_v41 }
0x2e59   :  { %4819 = vtanh.f32 %v2611_v61 }
0x2e60   :  { %v4816_v20 = vpop.eup %4815 }
0x2e61   :  { %v2618_v15 = vmul.f32 %v4816_v20, %v5810_v7 }
0x2e62   :  { %v4818_v31 = vpop.eup %4817 }
0x2e63   :  { %v4820_v3 = vpop.eup %4819  ;;  %v2616_v28 = vmul.f32 %v4818_v31, %v5810_v7  ;;  %v2625_v35 = vsel %vm1893_vm8, %v2618_v15, 0.0 }
0x2e64   :  { %v2617_v8 = vmul.f32 %v4820_v3, %v5810_v7 }
0x2e65   :  { %v2619_v34 = vsel %vm381_vm1, %v2616_v28, 0.0 }
0x2e66   :  { %v2622_v43 = vsel %vm381_vm1, %v2617_v8, 0.0  ;;  %2620 = vadd.xlane.f32.xlu1 %v2619_v34 }
0x2e67   :  { %2623 = vadd.xlane.f32.xlu0 %v2622_v43 }
0x2e6a   :  { %2626 = vadd.xlane.f32.xlu1 %v2625_v35 }
0x2ef3   :  { %v2621_v27 = vpop.xlane.xlu1 %2620 }
0x2ef4   :  { %v2624_v54 = vpop.xlane.xlu0 %2623  ;;  %v2628_v39 = vsub.f32 %v2621_v27, %v5819_v1 }
0x2ef5   :  { %v2629_v29 = vsub.f32 %v2624_v54, %v5819_v1 }
0x2ef6   :  { %v2631_v22 = vmul.f32 1.442695, %v2628_v39 }
0x2ef7   :  { %v2633_v46 = vmul.f32 1.442695, %v2629_v29  ;;  %v2627_v23 = vpop.xlane.xlu1 %2626 }
0x2ef8   :  { %4821 = vpow2.f32 %v2631_v22  ;;  %v2630_v48 = vsub.f32 %v2627_v23, %v5819_v1 }
0x2ef9   :  { %4823 = vpow2.f32 %v2633_v46 }
0x2efa   :  { %v2635_v60 = vmul.f32 1.442695, %v2630_v48  ;;  %v6154_v48 = vld [vmem:[%s6574_s14] sm:$0xff]  }
0x2efc   :  { %4825 = vpow2.f32 %v2635_v60 }
0x2f02   :  { %v4822_v33 = vpop.eup %4821 }
0x2f03   :  { %v4824_v16 = vpop.eup %4823  ;;  %v2637_v5 = vmul.f32 %v4822_v33, %v5830_v17 }
0x2f04   :  { %v2638_v32 = vmul.f32 %v4824_v16, %v5834_v18 }
0x2f06   :  { %v4826_v57 = vpop.eup %4825  ;;  %v2640_v53 = vpack.c.bf16 %v2638_v32, %v2637_v5 }
0x2f07   :  { %v2639_v37 = vmul.f32 %v4826_v57, %v5826_v19 }
0x2f08   :  { %4372 = vmatpush3.bf16.msra.mxu0 %v2640_v53 }
0x2f09   :  { %4373 = vmatprep.subr.bf16.mxu0 %v5038_v11  ;;  %v2641_v45 = vpack.c.bf16 %v2639_v37, %v2639_v37 }
0x2f0b   :  { %v2643_v63 = vsel %vm1609_vm3, %v2641_v45, 0 }
0x2f0c   :  { %4374 = vmatpush3.bf16.msra.mxu0 %v2643_v63 }
0x2f0d   :  { %4393 = vmatprep.subr.bf16.mxu0 %v5038_v11 }
0x2f0f   :  { %4376 = vmatmul.mubr.msk.bf16.vlgmr.msra.gmra.mrb[44].mxu0 %vm1915_vm9, %v5841_v55 }
0x2f10   :  { %4394 = vmatpush3.bf16.msra.mxu0 %v5912_v51  ;;  %4397 = vmatprep.mubr.msk.bf16.mxu0 %vm5039_vm6, %v5038_v11 }
0x2f11   :  { %4395 = vmatprep.subr.bf16.mxu0 %v5038_v11 }
0x2f14   :  { %4396 = vmatpush3.bf16.msra.mxu0 %v5918_v2 }
0x2f15   :  { %4401 = vmatprep.subr.bf16.mxu0 %v5038_v11 }
0x2fe2   :  { %v2679_v58 = vpop.f32.mrb[44].mxu0 }
0x2fe3   :  { %4827 = vrcp.f32 %v2679_v58  ;;  %v4377_v59 = vpop.f32.mrb[45].mxu0 }
0x2fe4   :  { %v2682_v40 = vpop.f32.mrb[46].mxu0 }
0x2fe5   :  { %v4378_v25 = vpop.f32.mrb[47].mxu0 }
0x2fed   :  { %v4828_v62 = vpop.eup %4827 }
0x2fee   :  { %2688 = vperm.xlu0 %4576, %v4828_v62  }
0x2ff2   :  { %2753 = vrot.lane.b32.xlu0 %v2599_v56, %s5037_s27 }
0x306d   :  { %v2689_v21 = vpop.permute.xlu0 %2688 }
0x306e   :  { %v2691_v50 = vmul.f32 %v2689_v21, %v2679_v58 }
0x3070   :  { %2693 = vrot.lane.b32.xlu1 %v2691_v50, %s5041_s25 }
0x3071   :  { %v2754_v34 = vpop.permute.xlu0 %2753 }
0x3074   :  { %2743 = vrot.lane.b32.xlu1 %v2599_v56, %s5034_s1 }
0x30e2   :  { %v2694_v42 = vpop.permute.xlu1 %2693 }
0x30e3   :  { %v2696_v41 = vsel %vm137_vm0, %v6081_v14, %v2694_v42 }
0x30e4   :  { %v2697_v61 = vpack.c.bf16 %v2696_v41, %v2696_v41 }
0x30e6   :  { %4390 = vmatmul.mubr.msk.bf16.vlgmr.msra.gmra.mrb[56].mxu1 %vm2005_vm10, %v2697_v61  ;;  %v2744_v9 = vpop.permute.xlu1 %2743 }
0x30e7   :  { %4418 = vmatpush3.bf16.msra.mxu1 %v5851_v4  ;;  %4427 = vmatprep.mubr.msk.bf16.mxu1 %vm5039_vm6, %v5038_v11 }
0x30e8   :  { %4419 = vmatprep.subr.bf16.mxu1 %v5038_v11 }
0x30eb   :  { %4420 = vmatpush3.bf16.msra.mxu1 %v5857_v12 }
0x30ec   :  { %4421 = vmatprep.subr.bf16.mxu1 %v5038_v11 }
0x30ef   :  { %4422 = vmatpush3.bf16.msra.mxu1 %v5864_v13 }
0x30f0   :  { %4423 = vmatprep.subr.bf16.mxu1 %v5038_v11 }
0x30f3   :  { %4424 = vmatpush3.bf16.msra.mxu1 %v5871_v44 }
0x30f4   :  { %4425 = vmatprep.subr.bf16.mxu1 %v5038_v11 }
0x30f7   :  { %4426 = vmatpush3.bf16.msra.mxu1 %v5879_v47 }
0x30f8   :  { %4447 = vmatprep.subr.bf16.mxu1 %v5038_v11 }
0x31b9   :  { %v6138_v4 = vpop.f32.mrb[56].mxu1 }
0x31ba   :  { %v2741_v14 = vadd.f32 %v5904_v38, %v6138_v4  ;;  %v4391_v12 = vpop.f32.mrb[57].mxu1 }
0x31bb   :  { %v2738_v20 = vpop.f32.mrb[58].mxu1 }
0x31bc   :  { %v2746_v31 = vadd.f32 %v2744_v9, %v2741_v14  ;;  %v4392_v13 = vpop.f32.mrb[59].mxu1 }
0x31be   :  { %v4095_v3 = vmul.f32 -1.442695, %v2746_v31 }
0x31c0   :  { %4829 = vpow2.f32 %v4095_v3 }
0x31ca   :  { %v4830_v28 = vpop.eup %4829 }
0x31cb   :  { %v2750_v44 = vadd.f32 1.0, %v4830_v28 }
0x31cd   :  { %4831 = vrcp.f32 %v2750_v44 }
0x31d7   :  { %v4832_v8 = vpop.eup %4831 }
0x31d8   :  { %v2756_v47 = vmul.f32 %v4832_v8, %v2754_v34  ;;  %v2763_v27 = vsub.f32 1.0, %v4832_v8  ;;  %v2769_v39 = vmul.f32 %v4832_v8, %v6039_v52  ;;  %v6163_v52 = vld [vmem:[%s6574_s14 + $0x8] sm:$0xff]  }
0x31da   :  { %2758 = vrot.lane.b32.xlu1 %v2756_v47, %s5036_s5 }
0x324c   :  { %v2759_v15 = vpop.permute.xlu1 %2758 }
0x324d   :  { %v2761_v43 = vadd.f32 %v2759_v15, %v2741_v14 }
0x324f   :  { %4833 = vtanh.f32 %v2761_v43 }
0x3259   :  { %v4834_v35 = vpop.eup %4833 }
0x325a   :  { %2765 = vrot.lane.b32.xlu0 %v4834_v35, %s5034_s1 }
0x32cc   :  { %v2766_v54 = vpop.permute.xlu0 %2765 }
0x32cd   :  { %v2768_v29 = vmul.f32 %v2766_v54, %v2763_v27 }
0x32cf   :  { %v6145_v22 = vadd.f32 %v2769_v39, %v2768_v29 }
0x32d1   :  { %v2771_v46 = vpack.c.bf16 %v6145_v22, %v6145_v22 }
0x32d3   :  { %2773 = vrot.lane.b32.xlu1 %v2771_v46, %s5034_s1 }
0x3345   :  { %v2774_v23 = vpop.permute.xlu1 %2773 }
0x3346   :  { %4398 = vmatmul.mubr.msk.bf16.vlgmr.msra.gmra.mrb[48].mxu0 %vm381_vm1, %v2774_v23 }
0x3347   :  { %4402 = vmatpush3.bf16.msra.mxu0 %v6154_v48  ;;  %4405 = vmatprep.mubr.msk.bf16.mxu0 %vm5039_vm6, %v5038_v11 }
0x3348   :  { %4403 = vmatprep.subr.bf16.mxu0 %v5038_v11 }
0x334b   :  { %4404 = vmatpush3.bf16.msra.mxu0 %v6163_v52 }
0x334c   :  { %4409 = vmatprep.subr.bf16.mxu0 %v5038_v11 }
0x334e   :  { %4406 = vmatmul.mubr.msk.bf16.vlgmr.msra.gmra.mrb[52].mxu0 %vm381_vm1, %v2774_v23 }
0x334f   :  { %4413 = vmatprep.mubr.msk.bf16.mxu0 %vm5039_vm6, %v5038_v11 }
0x3419   :  { %v6170_v60 = vpop.f32.mrb[48].mxu0 }
0x341a   :  { %v4399_v33 = vpop.f32.mrb[49].mxu0 }
0x341b   :  { %v2819_v16 = vpop.f32.mrb[50].mxu0 }
0x341c   :  { %v4400_v5 = vpop.f32.mrb[51].mxu0 }
0x3421   :  { %v6172_v32 = vpop.f32.mrb[52].mxu0 }
0x3422   :  { %v2867_v57 = vrot.slane %v6172_v32, 6  ;;  %v2869_v53 = vrot.slane %v6172_v32, 4  ;;  %v4407_v37 = vpop.f32.mrb[53].mxu0  ;;  %v2871_v63 = vrot.slane %v6172_v32, 2 }
0x3423   :  { %v2862_v45 = vpop.f32.mrb[54].mxu0 }
0x3424   :  { %v2873_v58 = vsel %vm1609_vm3, %v6172_v32, %v2867_v57  ;;  %v4408_v59 = vpop.f32.mrb[55].mxu0 }
0x3425   :  { %v2874_v40 = vsel %vm1611_vm4, %v2873_v58, %v2869_v53  ;;  %v2878_v25 = vadd.f32 %v2873_v58, %v5795_v24 }
0x3426   :  { %v2875_v62 = vsel %vm1613_vm5, %v2874_v40, %v2871_v63 }
0x3427   :  { %v2876_v56 = vadd.f32 %v2875_v62, %v5800_v0  ;;  %v2877_v21 = vadd.f32 %v2875_v62, %v5802_v49  ;;  %4835 = vtanh.f32 %v2878_v25 }
0x3429   :  { %4837 = vtanh.f32 %v2876_v56 }
0x342a   :  { %4839 = vtanh.f32 %v2877_v21 }
0x3431   :  { %v4836_v50 = vpop.eup %4835 }
0x3432   :  { %v2884_v9 = vmul.f32 %v4836_v50, %v5810_v7 }
0x3433   :  { %v4838_v42 = vpop.eup %4837 }
0x3434   :  { %v4840_v41 = vpop.eup %4839  ;;  %v2882_v61 = vmul.f32 %v4838_v42, %v5810_v7  ;;  %v2891_v31 = vsel %vm1893_vm8, %v2884_v9, 0.0 }
0x3435   :  { %v2883_v14 = vmul.f32 %v4840_v41, %v5810_v7 }
0x3436   :  { %v2885_v12 = vsel %vm381_vm1, %v2882_v61, 0.0 }
0x3437   :  { %v2888_v20 = vsel %vm381_vm1, %v2883_v14, 0.0  ;;  %2886 = vadd.xlane.f32.xlu0 %v2885_v12 }
0x3438   :  { %2889 = vadd.xlane.f32.xlu1 %v2888_v20 }
0x343b   :  { %2892 = vadd.xlane.f32.xlu0 %v2891_v31 }
0x34c4   :  { %v2887_v13 = vpop.xlane.xlu0 %2886 }
0x34c5   :  { %v2890_v3 = vpop.xlane.xlu1 %2889  ;;  %v2894_v28 = vsub.f32 %v2887_v13, %v5819_v1 }
0x34c6   :  { %v2895_v44 = vsub.f32 %v2890_v3, %v5819_v1 }
0x34c7   :  { %v2897_v8 = vmul.f32 1.442695, %v2894_v28 }
0x34c8   :  { %v2899_v34 = vmul.f32 1.442695, %v2895_v44  ;;  %v2893_v47 = vpop.xlane.xlu0 %2892 }
0x34c9   :  { %4841 = vpow2.f32 %v2897_v8  ;;  %v2896_v15 = vsub.f32 %v2893_v47, %v5819_v1 }
0x34ca   :  { %4843 = vpow2.f32 %v2899_v34 }
0x34cb   :  { %v2901_v43 = vmul.f32 1.442695, %v2896_v15 }
0x34cd   :  { %4845 = vpow2.f32 %v2901_v43  ;;  %v6251_v43 = vld [vmem:[%s6577_s17 + $0x8] sm:$0xff]  }
0x34d3   :  { %v4842_v35 = vpop.eup %4841 }
0x34d4   :  { %v4844_v27 = vpop.eup %4843  ;;  %v2903_v54 = vmul.f32 %v4842_v35, %v5830_v17  ;;  %v6258_v35 = vld [vmem:[%s6577_s17 + $0x10] sm:$0xff]  }
0x34d5   :  { %v2904_v39 = vmul.f32 %v4844_v27, %v5834_v18  ;;  %v6265_v27 = vld [vmem:[%s6577_s17 + $0x18] sm:$0xff]  }
0x34d7   :  { %v4846_v29 = vpop.eup %4845  ;;  %v2906_v46 = vpack.c.bf16 %v2904_v39, %v2903_v54  ;;  %v6272_v54 = vld [vmem:[%s6577_s17 + $0x20] sm:$0xff]  }
0x34d8   :  { %v2905_v23 = vmul.f32 %v4846_v29, %v5826_v19 }
0x34d9   :  { %4410 = vmatpush3.bf16.msra.mxu0 %v2906_v46 }
0x34da   :  { %4411 = vmatprep.subr.bf16.mxu0 %v5038_v11  ;;  %v2907_v33 = vpack.c.bf16 %v2905_v23, %v2905_v23 }
0x34dc   :  { %v2909_v16 = vsel %vm1609_vm3, %v2907_v33, 0 }
0x34dd   :  { %4412 = vmatpush3.bf16.msra.mxu0 %v2909_v16 }
0x34de   :  { %4431 = vmatprep.subr.bf16.mxu0 %v5038_v11 }
0x34e0   :  { %4414 = vmatmul.mubr.msk.bf16.vlgmr.msra.gmra.mrb[56].mxu0 %vm1915_vm9, %v5841_v55  ;;  %v2865_v55 = vadd.f32 %v6172_v32, %v5893_v6 }
0x34e1   :  { %4432 = vmatpush3.bf16.msra.mxu0 %v5912_v51  ;;  %4435 = vmatprep.mubr.msk.bf16.mxu0 %vm5039_vm6, %v5038_v11 }
0x34e2   :  { %4433 = vmatprep.subr.bf16.mxu0 %v5038_v11 }
0x34e5   :  { %4434 = vmatpush3.bf16.msra.mxu0 %v5918_v2  ;;  %v4097_v2 = vld [vmem:[%s6594_s28 + $0x6] sm:$0x3] }
0x34e6   :  { %4439 = vmatprep.subr.bf16.mxu0 %v5038_v11 }
0x35b3   :  { %v2945_v5 = vpop.f32.mrb[56].mxu0 }
0x35b4   :  { %4847 = vrcp.f32 %v2945_v5  ;;  %v4415_v57 = vpop.f32.mrb[57].mxu0 }
0x35b5   :  { %v2948_v53 = vpop.f32.mrb[58].mxu0 }
0x35b6   :  { %v4416_v37 = vpop.f32.mrb[59].mxu0 }
0x35be   :  { %v4848_v45 = vpop.eup %4847 }
0x35bf   :  { %2954 = vperm.xlu0 %4576, %v4848_v45  }
0x35c3   :  { %3019 = vrot.lane.b32.xlu0 %v2865_v55, %s5037_s27 }
0x363e   :  { %v2955_v51 = vpop.permute.xlu0 %2954 }
0x363f   :  { %v2957_v63 = vmul.f32 %v2955_v51, %v2945_v5 }
0x3641   :  { %2959 = vrot.lane.b32.xlu1 %v2957_v63, %s5041_s25 }
0x3642   :  { %v3020_v9 = vpop.permute.xlu0 %3019 }
0x3645   :  { %3009 = vrot.lane.b32.xlu1 %v2865_v55, %s5034_s1 }
0x36b3   :  { %v2960_v58 = vpop.permute.xlu1 %2959 }
0x36b4   :  { %v2962_v59 = vsel %vm137_vm0, %v4097_v2, %v2960_v58 }
0x36b5   :  { %v2963_v40 = vpack.c.bf16 %v2962_v59, %v2962_v59 }
0x36b7   :  { %4428 = vmatmul.mubr.msk.bf16.vlgmr.msra.gmra.mrb[60].mxu1 %vm2005_vm10, %v2963_v40  ;;  %v3010_v56 = vpop.permute.xlu1 %3009 }
0x36b8   :  { %4451 = vmatprep.mubr.msk.bf16.mxu1 %vm5039_vm6, %v5038_v11 }
0x378a   :  { %v6219_v32 = vpop.f32.mrb[60].mxu1 }
0x378b   :  { %v3007_v25 = vadd.f32 %v5904_v38, %v6219_v32  ;;  %v4429_v62 = vpop.f32.mrb[61].mxu1 }
0x378c   :  { %v3004_v21 = vpop.f32.mrb[62].mxu1 }
0x378d   :  { %v3012_v50 = vadd.f32 %v3010_v56, %v3007_v25  ;;  %v4430_v42 = vpop.f32.mrb[63].mxu1 }
0x378f   :  { %v4101_v41 = vmul.f32 -1.442695, %v3012_v50 }
0x3791   :  { %4849 = vpow2.f32 %v4101_v41 }
0x379b   :  { %v4850_v61 = vpop.eup %4849 }
0x379c   :  { %v3016_v14 = vadd.f32 1.0, %v4850_v61 }
0x379e   :  { %4851 = vrcp.f32 %v3016_v14 }
0x37a8   :  { %v4852_v12 = vpop.eup %4851 }
0x37a9   :  { %v3022_v20 = vmul.f32 %v4852_v12, %v3020_v9  ;;  %v3029_v38 = vsub.f32 1.0, %v4852_v12  ;;  %v3035_v44 = vmul.f32 %v4852_v12, %v6145_v22  ;;  %v6242_v22 = vld [vmem:[%s6577_s17] sm:$0xff]  }
0x37ab   :  { %3024 = vrot.lane.b32.xlu1 %v3022_v20, %s5036_s5 }
0x381d   :  { %v3025_v31 = vpop.permute.xlu1 %3024 }
0x381e   :  { %v3027_v13 = vadd.f32 %v3025_v31, %v3007_v25 }
0x3820   :  { %4853 = vtanh.f32 %v3027_v13 }
0x382a   :  { %v4854_v3 = vpop.eup %4853 }
0x382b   :  { %3031 = vrot.lane.b32.xlu0 %v4854_v3, %s5034_s1 }
0x389d   :  { %v3032_v28 = vpop.permute.xlu0 %3031 }
0x389e   :  { %v3034_v8 = vmul.f32 %v3032_v28, %v3029_v38 }
0x38a0   :  { %v6226_v34 = vadd.f32 %v3035_v44, %v3034_v8 }
0x38a2   :  { %v3037_v47 = vpack.c.bf16 %v6226_v34, %v6226_v34 }
0x38a4   :  { %3039 = vrot.lane.b32.xlu1 %v3037_v47, %s5034_s1 }
0x3916   :  { %v3040_v15 = vpop.permute.xlu1 %3039 }
0x3917   :  { %4436 = vmatmul.mubr.msk.bf16.vlgmr.msra.gmra.mrb[60].mxu0 %vm381_vm1, %v3040_v15 }
0x3918   :  { %4440 = vmatpush3.bf16.msra.mxu0 %v6154_v48  ;;  %4443 = vmatprep.mubr.msk.bf16.mxu0 %vm5039_vm6, %v5038_v11 }
0x3919   :  { %4441 = vmatprep.subr.bf16.mxu0 %v5038_v11 }
0x391c   :  { %4442 = vmatpush3.bf16.msra.mxu0 %v6163_v52 }
0x391d   :  { %4455 = vmatprep.subr.bf16.mxu0 %v5038_v11 }
0x391f   :  { %4444 = vmatmul.mubr.msk.bf16.vlgmr.msra.gmra.mrb[64].mxu0 %vm381_vm1, %v3040_v15 }
0x3920   :  { %4456 = vmatpush3.bf16.msra.mxu0 %v6242_v22  ;;  %4465 = vmatprep.mubr.msk.bf16.mxu0 %vm5039_vm6, %v5038_v11 }
0x3921   :  { %4457 = vmatprep.subr.bf16.mxu0 %v5038_v11 }
0x3924   :  { %4458 = vmatpush3.bf16.msra.mxu0 %v6251_v43 }
0x3925   :  { %4459 = vmatprep.subr.bf16.mxu0 %v5038_v11 }
0x3928   :  { %4460 = vmatpush3.bf16.msra.mxu0 %v6258_v35 }
0x3929   :  { %4461 = vmatprep.subr.bf16.mxu0 %v5038_v11 }
0x392c   :  { %4462 = vmatpush3.bf16.msra.mxu0 %v6265_v27 }
0x392d   :  { %4463 = vmatprep.subr.bf16.mxu0 %v5038_v11 }
0x3930   :  { %4464 = vmatpush3.bf16.msra.mxu0 %v6272_v54 }
0x3931   :  { %4485 = vmatprep.subr.bf16.mxu0 %v5038_v11 }
0x39ea   :  { %v6276_v39 = vpop.f32.mrb[60].mxu0 }
0x39eb   :  { %v4437_v29 = vpop.f32.mrb[61].mxu0 }
0x39ec   :  { %v3085_v46 = vpop.f32.mrb[62].mxu0 }
0x39ed   :  { %v4438_v23 = vpop.f32.mrb[63].mxu0 }
0x39f2   :  { %v6278_v33 = vpop.f32.mrb[64].mxu0 }
0x39f3   :  { %v3133_v16 = vrot.slane %v6278_v33, 6  ;;  %v3135_v5 = vrot.slane %v6278_v33, 4  ;;  %v4445_v57 = vpop.f32.mrb[65].mxu0  ;;  %v3137_v37 = vrot.slane %v6278_v33, 2 }
0x39f4   :  { %v3128_v53 = vpop.f32.mrb[66].mxu0  ;;  %v6305_v57 = vld [vmem:[#allocation2] sm:$0x1] }
0x39f5   :  { %v3139_v45 = vsel %vm1609_vm3, %v6278_v33, %v3133_v16  ;;  %v4446_v55 = vpop.f32.mrb[67].mxu0  ;;  %v6312_v53 = vld [vmem:[%s6578_s18] sm:$0xff]  }
0x39f6   :  { %v3140_v51 = vsel %vm1611_vm4, %v3139_v45, %v3135_v5  ;;  %v3144_v63 = vadd.f32 %v3139_v45, %v5795_v24 }
0x39f7   :  { %v3141_v2 = vsel %vm1613_vm5, %v3140_v51, %v3137_v37  ;;  %v6321_v37 = vld [vmem:[%s6578_s18 + $0x8] sm:$0xff]  }
0x39f8   :  { %v3142_v58 = vadd.f32 %v3141_v2, %v5800_v0  ;;  %v3143_v59 = vadd.f32 %v3141_v2, %v5802_v49  ;;  %4855 = vtanh.f32 %v3144_v63 }
0x39fa   :  { %4857 = vtanh.f32 %v3142_v58  ;;  %v3131_v58 = vadd.f32 %v6278_v33, %v5893_v6 }
0x39fb   :  { %4859 = vtanh.f32 %v3143_v59 }
0x3a02   :  { %v4856_v40 = vpop.eup %4855 }
0x3a03   :  { %v3150_v42 = vmul.f32 %v4856_v40, %v5810_v7 }
0x3a04   :  { %v4858_v25 = vpop.eup %4857 }
0x3a05   :  { %v4860_v62 = vpop.eup %4859  ;;  %v3148_v56 = vmul.f32 %v4858_v25, %v5810_v7  ;;  %v3157_v61 = vsel %vm1893_vm8, %v3150_v42, 0.0  ;;  %v4103_v25 = vld [vmem:[%s6594_s28 + $0x8] sm:$0x3] }
0x3a06   :  { %v3149_v21 = vmul.f32 %v4860_v62, %v5810_v7 }
0x3a07   :  { %v3151_v50 = vsel %vm381_vm1, %v3148_v56, 0.0 }
0x3a08   :  { %v3154_v41 = vsel %vm381_vm1, %v3149_v21, 0.0  ;;  %3152 = vadd.xlane.f32.xlu0 %v3151_v50  ;;  %v6344_v50 = vld [vmem:[%s6575_s15] ss:$0 sm:$0xff] }
0x3a09   :  { %3155 = vadd.xlane.f32.xlu1 %v3154_v41 }
0x3a0c   :  { %3158 = vadd.xlane.f32.xlu0 %v3157_v61 }
0x3a95   :  { %v3153_v14 = vpop.xlane.xlu0 %3152 }
0x3a96   :  { %v3156_v12 = vpop.xlane.xlu1 %3155  ;;  %v3160_v9 = vsub.f32 %v3153_v14, %v5819_v1 }
0x3a97   :  { %v3161_v20 = vsub.f32 %v3156_v12, %v5819_v1 }
0x3a98   :  { %v3163_v31 = vmul.f32 1.442695, %v3160_v9 }
0x3a99   :  { %v3165_v13 = vmul.f32 1.442695, %v3161_v20  ;;  %v3159_v3 = vpop.xlane.xlu0 %3158 }
0x3a9a   :  { %4861 = vpow2.f32 %v3163_v31  ;;  %v3162_v38 = vsub.f32 %v3159_v3, %v5819_v1 }
0x3a9b   :  { %4863 = vpow2.f32 %v3165_v13 }
0x3a9c   :  { %v3167_v28 = vmul.f32 1.442695, %v3162_v38 }
0x3a9e   :  { %4865 = vpow2.f32 %v3167_v28 }
0x3aa4   :  { %v4862_v44 = vpop.eup %4861 }
0x3aa5   :  { %v4864_v8 = vpop.eup %4863  ;;  %v3169_v47 = vmul.f32 %v4862_v44, %v5830_v17 }
0x3aa6   :  { %v3170_v15 = vmul.f32 %v4864_v8, %v5834_v18 }
0x3aa8   :  { %v4866_v29 = vpop.eup %4865  ;;  %v3172_v46 = vpack.c.bf16 %v3170_v15, %v3169_v47 }
0x3aa9   :  { %v3171_v23 = vmul.f32 %v4866_v29, %v5826_v19 }
0x3aaa   :  { %4448 = vmatpush3.bf16.msra.mxu1 %v3172_v46 }
0x3aab   :  { %4449 = vmatprep.subr.bf16.mxu1 %v5038_v11  ;;  %v3173_v16 = vpack.c.bf16 %v3171_v23, %v3171_v23 }
0x3aad   :  { %v3175_v5 = vsel %vm1609_vm3, %v3173_v16, 0 }
0x3aae   :  { %4450 = vmatpush3.bf16.msra.mxu1 %v3175_v5 }
0x3aaf   :  { %4469 = vmatprep.subr.bf16.mxu1 %v5038_v11 }
0x3ab1   :  { %4452 = vmatmul.mubr.msk.bf16.vlgmr.msra.gmra.mrb[64].mxu1 %vm1915_vm9, %v6305_v57 }
0x3ab2   :  { %4470 = vmatpush3.bf16.msra.mxu1 %v6312_v53  ;;  %4473 = vmatprep.mubr.msk.bf16.mxu1 %vm5039_vm6, %v5038_v11 }
0x3ab3   :  { %4471 = vmatprep.subr.bf16.mxu1 %v5038_v11 }
0x3ab6   :  { %4472 = vmatpush3.bf16.msra.mxu1 %v6321_v37 }
0x3ab7   :  { %4477 = vmatprep.subr.bf16.mxu1 %v5038_v11 }
0x3b84   :  { %v3211_v45 = vpop.f32.mrb[64].mxu1 }
0x3b85   :  { %4867 = vrcp.f32 %v3211_v45  ;;  %v4453_v55 = vpop.f32.mrb[65].mxu1 }
0x3b86   :  { %v3214_v51 = vpop.f32.mrb[66].mxu1  ;;  %v4934_v55 = vld [vmem:[%s6595_s30] sm:$0xff]  }
0x3b87   :  { %v4454_v63 = vpop.f32.mrb[67].mxu1 }
0x3b8f   :  { %v4868_v2 = vpop.eup %4867 }
0x3b90   :  { %3220 = vperm.xlu0 %4576, %v4868_v2  }
0x3b94   :  { %3285 = vrot.lane.b32.xlu0 %v3131_v58, %s5037_s27 }
0x3c0f   :  { %v3221_v59 = vpop.permute.xlu0 %3220 }
0x3c10   :  { %v3223_v40 = vmul.f32 %v3221_v59, %v3211_v45 }
0x3c12   :  { %3225 = vrot.lane.b32.xlu1 %v3223_v40, %s5041_s25 }
0x3c13   :  { %v3286_v38 = vpop.permute.xlu0 %3285 }
0x3c16   :  { %3275 = vrot.lane.b32.xlu1 %v3131_v58, %s5034_s1 }
0x3c84   :  { %v3226_v62 = vpop.permute.xlu1 %3225 }
0x3c85   :  { %v3228_v56 = vsel %vm137_vm0, %v4103_v25, %v3226_v62 }
0x3c86   :  { %v3229_v21 = vpack.c.bf16 %v3228_v56, %v3228_v56  ;;  %v6385_v56 = vld [vmem:[%s6579_s19] ss:$0 sm:$0xff] }
0x3c88   :  { %4466 = vmatmul.mubr.msk.bf16.vlgmr.msra.gmra.mrb[68].mxu0 %vm2005_vm10, %v3229_v21  ;;  %v3276_v61 = vpop.permute.xlu1 %3275 }
0x3c89   :  { %4486 = vmatpush3.bf16.msra.mxu0 %v6154_v48  ;;  %4489 = vmatprep.mubr.msk.bf16.mxu0 %vm5039_vm6, %v5038_v11 }
0x3c8a   :  { %4487 = vmatprep.subr.bf16.mxu0 %v5038_v11 }
0x3c8d   :  { %4488 = vmatpush3.bf16.msra.mxu0 %v6163_v52 }
0x3c8e   :  { %4501 = vmatprep.subr.bf16.mxu0 %v5038_v11 }
0x3d5b   :  { %v3267_v33 = vpop.f32.mrb[68].mxu0 }
0x3d5c   :  { %v3273_v42 = vadd.f32 %v6344_v50, %v3267_v33  ;;  %v4467_v41 = vpop.f32.mrb[69].mxu0 }
0x3d5d   :  { %v3270_v14 = vpop.f32.mrb[70].mxu0 }
0x3d5e   :  { %v3278_v12 = vadd.f32 %v3276_v61, %v3273_v42  ;;  %v4468_v9 = vpop.f32.mrb[71].mxu0 }
0x3d60   :  { %v4107_v20 = vmul.f32 -1.442695, %v3278_v12 }
0x3d62   :  { %4869 = vpow2.f32 %v4107_v20 }
0x3d6c   :  { %v4870_v31 = vpop.eup %4869 }
0x3d6d   :  { %v3282_v13 = vadd.f32 1.0, %v4870_v31 }
0x3d6f   :  { %4871 = vrcp.f32 %v3282_v13 }
0x3d79   :  { %v4872_v3 = vpop.eup %4871 }
0x3d7a   :  { %v3288_v28 = vmul.f32 %v4872_v3, %v3286_v38  ;;  %v3295_v15 = vsub.f32 1.0, %v4872_v3  ;;  %v3301_v46 = vmul.f32 %v4872_v3, %v6226_v34 }
0x3d7c   :  { %3290 = vrot.lane.b32.xlu1 %v3288_v28, %s5036_s5 }
0x3dee   :  { %v3291_v44 = vpop.permute.xlu1 %3290 }
0x3def   :  { %v3293_v8 = vadd.f32 %v3291_v44, %v3273_v42 }
0x3df1   :  { %4873 = vtanh.f32 %v3293_v8 }
0x3dfb   :  { %v4874_v47 = vpop.eup %4873 }
0x3dfc   :  { %3297 = vrot.lane.b32.xlu0 %v4874_v47, %s5034_s1 }
0x3e00   :  { %3308 = vrot.lane.b32.xlu0 %v3267_v33, %s5037_s27 }
0x3e6e   :  { %v3298_v29 = vpop.permute.xlu0 %3297 }
0x3e6f   :  { %v3300_v23 = vmul.f32 %v3298_v29, %v3295_v15 }
0x3e71   :  { %v6351_v16 = vadd.f32 %v3301_v46, %v3300_v23 }
0x3e72   :  { %v3309_v34 = vpop.permute.xlu0 %3308 }
0x3e73   :  { %v3303_v5 = vpack.c.bf16 %v6351_v16, %v6351_v16 }
0x3e75   :  { %3305 = vrot.lane.b32.xlu1 %v3303_v5, %s5034_s1 }
0x3ee7   :  { %v3306_v45 = vpop.permute.xlu1 %3305 }
0x3ee8   :  { %4474 = vmatmul.mubr.msk.bf16.vlgmr.msra.gmra.mrb[68].mxu1 %vm381_vm1, %v3306_v45  ;;  %4490 = vmatmul.mubr.msk.bf16.vlgmr.msra.gmra.mrb[72].mxu0 %vm381_vm1, %v3306_v45 }
0x3ee9   :  { %4478 = vmatpush3.bf16.msra.mxu1 %v4934_v55  ;;  %4481 = vmatprep.mubr.msk.bf16.mxu1 %vm5039_vm6, %v5038_v11 }
0x3eea   :  { %4479 = vmatprep.subr.bf16.mxu1 %v5038_v11  ;;  %4502 = vmatpush3.bf16.msra.mxu0 %v6242_v22 }
0x3eeb   :  { %4503 = vmatprep.subr.bf16.mxu0 %v5038_v11  ;;  %4511 = vmatprep.mubr.msk.bf16.mxu0 %vm5039_vm6, %v5038_v11 }
0x3eed   :  { %4480 = vmatpush3.bf16.msra.mxu1 %v5961_v36 }
0x3eee   :  { %4493 = vmatprep.subr.bf16.mxu1 %v5038_v11  ;;  %4504 = vmatpush3.bf16.msra.mxu0 %v6251_v43 }
0x3eef   :  { %4505 = vmatprep.subr.bf16.mxu0 %v5038_v11 }
0x3ef2   :  { %4506 = vmatpush3.bf16.msra.mxu0 %v6258_v35 }
0x3ef3   :  { %4507 = vmatprep.subr.bf16.mxu0 %v5038_v11 }
0x3ef6   :  { %4508 = vmatpush3.bf16.msra.mxu0 %v6265_v27 }
0x3ef7   :  { %4509 = vmatprep.subr.bf16.mxu0 %v5038_v11 }
0x3efa   :  { %4510 = vmatpush3.bf16.msra.mxu0 %v6272_v54 }
0x3efb   :  { %4539 = vmatprep.subr.bf16.mxu0 %v5038_v11 }
0x3fbb   :  { %v3348_v36 = vpop.f32.mrb[68].mxu1  ;;  %v6378_v51 = vpop.f32.mrb[72].mxu0 }
0x3fbc   :  { %v3349_v63 = vadd.f32 %v3348_v36, %v3309_v34  ;;  %v3464_v2 = vrot.slane %v6378_v51, 6  ;;  %v3466_v58 = vrot.slane %v6378_v51, 4  ;;  %v4475_v59 = vpop.f32.mrb[69].mxu1  ;;  %v4491_v40 = vpop.f32.mrb[73].mxu0  ;;  %v3468_v33 = vrot.slane %v6378_v51, 2 }
0x3fbd   :  { %v3351_v25 = vpop.f32.mrb[70].mxu1  ;;  %v3459_v62 = vpop.f32.mrb[74].mxu0 }
0x3fbe   :  { %v6388_v21 = vadd.f32 %v6385_v56, %v3349_v63  ;;  %v3470_v42 = vsel %vm1609_vm3, %v6378_v51, %v3464_v2  ;;  %v4476_v41 = vpop.f32.mrb[71].mxu1  ;;  %v4492_v61 = vpop.f32.mrb[75].mxu0 }
0x3fbf   :  { %v3471_v14 = vsel %vm1611_vm4, %v3470_v42, %v3466_v58  ;;  %v3475_v28 = vadd.f32 %v3470_v42, %v5795_v24 }
0x3fc0   :  { %v3472_v12 = vsel %vm1613_vm5, %v3471_v14, %v3468_v33  ;;  %v3355_v9 = vsel %vm2147_vm11, %v6388_v21, -inf }
0x3fc1   :  { %v3474_v20 = vadd.f32 %v3472_v12, %v5802_v49  ;;  %3356 = vmax.xlane.f32.xlu1 %v3355_v9  ;;  %v3473_v38 = vadd.f32 %v3472_v12, %v5800_v0 }
0x3fc3   :  { %4875 = vtanh.f32 %v3474_v20 }
0x3fc4   :  { %4877 = vtanh.f32 %v3473_v38 }
0x3fc5   :  { %4879 = vtanh.f32 %v3475_v28 }
0x3fcd   :  { %v4876_v31 = vpop.eup %4875 }
0x3fce   :  { %v3480_v13 = vmul.f32 %v4876_v31, %v5810_v7  ;;  %v4878_v15 = vpop.eup %4877 }
0x3fcf   :  { %v3479_v23 = vmul.f32 %v4878_v15, %v5810_v7  ;;  %v4880_v5 = vpop.eup %4879 }
0x3fd0   :  { %v3485_v3 = vsel %vm381_vm1, %v3480_v13, 0.0  ;;  %v3481_v55 = vmul.f32 %v4880_v5, %v5810_v7 }
0x3fd1   :  { %3486 = vadd.xlane.f32.xlu1 %v3485_v3  ;;  %v3482_v45 = vsel %vm381_vm1, %v3479_v23, 0.0 }
0x3fd2   :  { %v3488_v34 = vsel %vm1893_vm8, %v3481_v55, 0.0 }
0x404e   :  { %v3357_v44 = vpop.xlane.xlu1 %3356 }
0x404f   :  { %vm3358_vm13 = vcmp.eq.f32.partialorder %v6388_v21, %v3357_v44 }
0x4050   :  { %v3359_v8 = vsel %vm3358_vm13, %v5945_v26, 24 }
0x4051   :  { %v3360_v47 = vsel %vm2147_vm11, %v3359_v8, 2147483647 }
0x4052   :  { %v3362_v29 = vshra.s32 %v3360_v47, 16  ;;  %v3361_v36 = vand.u32 65535, %v3360_v47 }
0x4054   :  { %v3364_v46 = vcvt.s32.f32 %v3362_v29  ;;  %v3363_v2 = vcvt.s32.f32 %v3361_v36 }
0x4056   :  { %3365 = vmin.xlane.f32.xlu0 %v3364_v46 }
0x405a   :  { %3483 = vadd.xlane.f32.xlu0 %v3482_v45 }
0x405e   :  { %3489 = vadd.xlane.f32.xlu0 %v3488_v34  ;;  %v3487_v25 = vpop.xlane.xlu1 %3486 }
0x405f   :  { %v3492_v42 = vsub.f32 %v3487_v25, %v5819_v1 }
0x4061   :  { %v3496_v14 = vmul.f32 1.442695, %v3492_v42 }
0x40e3   :  { %v3366_v63 = vpop.xlane.xlu0 %3365 }
0x40e4   :  { %vm3367_vm14 = vcmp.eq.f32.partialorder %v3364_v46, %v3366_v63  ;;  %v3372_v12 = vcvt.f32.s32 %v3366_v63 }
0x40e5   :  { %v3368_v58 = vsel %vm3367_vm14, %v3363_v2, inf }
0x40e6   :  { %3369 = vmin.xlane.f32.xlu1 %v3368_v58  ;;  %v3373_v31 = vshll.u32 %v3372_v12, 16 }
0x40e7   :  { %v3484_v59 = vpop.xlane.xlu0 %3483 }
0x40e8   :  { %v3491_v62 = vsub.f32 %v3484_v59, %v5819_v1 }
0x40ea   :  { %v3494_v41 = vmul.f32 1.442695, %v3491_v62 }
0x40eb   :  { %v3490_v40 = vpop.xlane.xlu0 %3489 }
0x40ec   :  { %v3493_v33 = vsub.f32 %v3490_v40, %v5819_v1  ;;  %4881 = vpow2.f32 %v3494_v41  ;;  %v3462_v40 = vadd.f32 %v6378_v51, %v5893_v6 }
0x40ee   :  { %v3498_v61 = vmul.f32 1.442695, %v3493_v33 }
0x40f0   :  { %4883 = vpow2.f32 %v3498_v61 }
0x40f1   :  { %4885 = vpow2.f32 %v3496_v14 }
0x40f6   :  { %v4882_v20 = vpop.eup %4881 }
0x40f7   :  { %v3500_v44 = vmul.f32 %v4882_v20, %v5830_v17 }
0x40fa   :  { %v4884_v3 = vpop.eup %4883 }
0x40fb   :  { %v4886_v38 = vpop.eup %4885  ;;  %v3502_v8 = vmul.f32 %v4884_v3, %v5826_v19 }
0x40fc   :  { %v3501_v15 = vmul.f32 %v4886_v38, %v5834_v18 }
0x40fd   :  { %v3504_v23 = vpack.c.bf16 %v3502_v8, %v3502_v8 }
0x40fe   :  { %v3503_v46 = vpack.c.bf16 %v3501_v15, %v3500_v44 }
0x40ff   :  { %v3506_v5 = vsel %vm1609_vm3, %v3504_v23, 0 }
0x4173   :  { %v3370_v9 = vpop.xlane.xlu1 %3369 }
0x4174   :  { %v3371_v13 = vcvt.f32.s32 %v3370_v9 }
0x4176   :  { %v3374_v28 = vadd.s32 %v3373_v31, %v3371_v13 }
0x4178   :  { %vm3375_vm11 = vcmp.eq.s32.totalorder %v5945_v26, %v3374_v28 }
0x4179   :  { %v4109_v47 = vsel %vm3375_vm11, 1.0, %v5038_v11 }
0x417a   :  { %v3378_v29 = vpack.c.bf16 %v4109_v47, %v4109_v47 }
0x417c   :  { %4482 = vmatmul.mubr.msk.bf16.vlgmr.msra.gmra.mrb[72].mxu1 %vm2181_vm15, %v3378_v29 }
0x417d   :  { %4494 = vmatpush3.bf16.msra.mxu1 %v3503_v46  ;;  %4497 = vmatprep.mubr.msk.bf16.mxu1 %vm5039_vm6, %v5038_v11 }
0x417e   :  { %4495 = vmatprep.subr.bf16.mxu1 %v5038_v11 }
0x4181   :  { %4496 = vmatpush3.bf16.msra.mxu1 %v3506_v5 }
0x4182   :  { %4515 = vmatprep.subr.bf16.mxu1 %v5038_v11 }
0x4184   :  { %4498 = vmatmul.mubr.msk.bf16.vlgmr.msra.gmra.mrb[76].mxu1 %vm1915_vm9, %v6305_v57 }
0x4185   :  { %4516 = vmatpush3.bf16.msra.mxu1 %v6312_v53  ;;  %4519 = vmatprep.mubr.msk.bf16.mxu1 %vm5039_vm6, %v5038_v11 }
0x4186   :  { %4517 = vmatprep.subr.bf16.mxu1 %v5038_v11 }
0x4189   :  { %4518 = vmatpush3.bf16.msra.mxu1 %v6321_v37 }
0x418a   :  { %4523 = vmatprep.subr.bf16.mxu1 %v5038_v11 }
0x424f   :  { %v3416_v26 = vpop.f32.mrb[72].mxu1 }
0x4250   :  { %v4483_v45 = vpop.f32.mrb[73].mxu1 }
0x4251   :  { %v3419_v55 = vpop.f32.mrb[74].mxu1 }
0x4252   :  { %v4484_v34 = vpop.f32.mrb[75].mxu1 }
0x4257   :  { %v3542_v36 = vpop.f32.mrb[76].mxu1 }
0x4258   :  { %4887 = vrcp.f32 %v3542_v36  ;;  %v4499_v63 = vpop.f32.mrb[77].mxu1 }
0x4259   :  { %v3545_v2 = vpop.f32.mrb[78].mxu1 }
0x425a   :  { %v4500_v58 = vpop.f32.mrb[79].mxu1 }
0x4262   :  { %v4888_v59 = vpop.eup %4887 }
0x4263   :  { %3551 = vperm.xlu0 %4576, %v4888_v59  }
0x4267   :  { %3616 = vrot.lane.b32.xlu0 %v3462_v40, %s5037_s27 }
0x42e2   :  { %v3552_v25 = vpop.permute.xlu0 %3551 }
0x42e3   :  { %v3554_v62 = vmul.f32 %v3552_v25, %v3542_v36 }
0x42e5   :  { %3556 = vrot.lane.b32.xlu1 %v3554_v62, %s5041_s25 }
0x42e6   :  { %v3617_v13 = vpop.permute.xlu0 %3616 }
0x42e9   :  { %3606 = vrot.lane.b32.xlu1 %v3462_v40, %s5034_s1 }
0x4357   :  { %v3557_v33 = vpop.permute.xlu1 %3556 }
0x4358   :  { %v3559_v42 = vsel %vm137_vm0, %v3416_v26, %v3557_v33 }
0x4359   :  { %v3560_v41 = vpack.c.bf16 %v3559_v42, %v3559_v42 }
0x435b   :  { %4512 = vmatmul.mubr.msk.bf16.vlgmr.msra.gmra.mrb[76].mxu0 %vm2005_vm10, %v3560_v41  ;;  %v3607_v14 = vpop.permute.xlu1 %3606 }
0x435c   :  { %4540 = vmatpush3.bf16.msra.mxu0 %v6242_v22  ;;  %4549 = vmatprep.mubr.msk.bf16.mxu0 %vm5039_vm6, %v5038_v11 }
0x435d   :  { %4541 = vmatprep.subr.bf16.mxu0 %v5038_v11 }
0x4360   :  { %4542 = vmatpush3.bf16.msra.mxu0 %v6251_v43 }
0x4361   :  { %4543 = vmatprep.subr.bf16.mxu0 %v5038_v11 }
0x4364   :  { %4544 = vmatpush3.bf16.msra.mxu0 %v6258_v35 }
0x4365   :  { %4545 = vmatprep.subr.bf16.mxu0 %v5038_v11 }
0x4368   :  { %4546 = vmatpush3.bf16.msra.mxu0 %v6265_v27 }
0x4369   :  { %4547 = vmatprep.subr.bf16.mxu0 %v5038_v11 }
0x436c   :  { %4548 = vmatpush3.bf16.msra.mxu0 %v6272_v54 }
0x442e   :  { %v6449_v22 = vpop.f32.mrb[76].mxu0 }
0x442f   :  { %v3604_v51 = vadd.f32 %v6344_v50, %v6449_v22  ;;  %v4513_v61 = vpop.f32.mrb[77].mxu0 }
0x4430   :  { %v3601_v43 = vpop.f32.mrb[78].mxu0 }
0x4431   :  { %v3609_v12 = vadd.f32 %v3607_v14, %v3604_v51  ;;  %v4514_v9 = vpop.f32.mrb[79].mxu0 }
0x4433   :  { %v4114_v20 = vmul.f32 -1.442695, %v3609_v12 }
0x4435   :  { %4889 = vpow2.f32 %v4114_v20 }
0x443f   :  { %v4890_v35 = vpop.eup %4889 }
0x4440   :  { %v3613_v31 = vadd.f32 1.0, %v4890_v35 }
0x4442   :  { %4891 = vrcp.f32 %v3613_v31 }
0x444c   :  { %v4892_v27 = vpop.eup %4891 }
0x444d   :  { %v3619_v3 = vmul.f32 %v4892_v27, %v3617_v13  ;;  %v3626_v44 = vsub.f32 1.0, %v4892_v27  ;;  %v3632_v47 = vmul.f32 %v4892_v27, %v6351_v16 }
0x444f   :  { %3621 = vrot.lane.b32.xlu1 %v3619_v3, %s5036_s5 }
0x44c1   :  { %v3622_v54 = vpop.permute.xlu1 %3621 }
0x44c2   :  { %v3624_v38 = vadd.f32 %v3622_v54, %v3604_v51 }
0x44c4   :  { %4893 = vtanh.f32 %v3624_v38 }
0x44ce   :  { %v4894_v28 = vpop.eup %4893 }
0x44cf   :  { %3628 = vrot.lane.b32.xlu0 %v4894_v28, %s5034_s1 }
0x4541   :  { %v3629_v8 = vpop.permute.xlu0 %3628 }
0x4542   :  { %v3631_v15 = vmul.f32 %v3629_v8, %v3626_v44 }
0x4544   :  { %v6456_v29 = vadd.f32 %v3632_v47, %v3631_v15 }
0x4546   :  { %v3634_v46 = vpack.c.bf16 %v6456_v29, %v6456_v29 }
0x4548   :  { %3636 = vrot.lane.b32.xlu1 %v3634_v46, %s5034_s1 }
0x45ba   :  { %v3637_v23 = vpop.permute.xlu1 %3636 }
0x45bb   :  { %4520 = vmatmul.mubr.msk.bf16.vlgmr.msra.gmra.mrb[80].mxu1 %vm381_vm1, %v3637_v23 }
0x45bc   :  { %4524 = vmatpush3.bf16.msra.mxu1 %v6154_v48  ;;  %4527 = vmatprep.mubr.msk.bf16.mxu1 %vm5039_vm6, %v5038_v11 }
0x45bd   :  { %4525 = vmatprep.subr.bf16.mxu1 %v5038_v11 }
0x45c0   :  { %4526 = vmatpush3.bf16.msra.mxu1 %v6163_v52 }
0x45c1   :  { %4531 = vmatprep.subr.bf16.mxu1 %v5038_v11 }
0x45c3   :  { %4528 = vmatmul.mubr.msk.bf16.vlgmr.msra.gmra.mrb[84].mxu1 %vm381_vm1, %v3637_v23 }
0x45c4   :  { %4535 = vmatprep.mubr.msk.bf16.mxu1 %vm5039_vm6, %v5038_v11 }
0x468e   :  { %v6471_v16 = vpop.f32.mrb[80].mxu1 }
0x468f   :  { %v4521_v5 = vpop.f32.mrb[81].mxu1 }
0x4690   :  { %v3682_v26 = vpop.f32.mrb[82].mxu1 }
0x4691   :  { %v4522_v45 = vpop.f32.mrb[83].mxu1 }
0x4696   :  { %v6473_v48 = vpop.f32.mrb[84].mxu1 }
0x4697   :  { %v3730_v55 = vrot.slane %v6473_v48, 6  ;;  %v3732_v34 = vrot.slane %v6473_v48, 4  ;;  %v4529_v36 = vpop.f32.mrb[85].mxu1  ;;  %v3734_v63 = vrot.slane %v6473_v48, 2  ;;  %v3728_v26 = vadd.f32 %v6473_v48, %v5893_v6 }
0x4698   :  { %v3725_v52 = vpop.f32.mrb[86].mxu1 }
0x4699   :  { %v3736_v2 = vsel %vm1609_vm3, %v6473_v48, %v3730_v55  ;;  %v4530_v58 = vpop.f32.mrb[87].mxu1 }
0x469a   :  { %v3737_v59 = vsel %vm1611_vm4, %v3736_v2, %v3732_v34  ;;  %v3741_v40 = vadd.f32 %v3736_v2, %v5795_v24 }
0x469b   :  { %v3738_v25 = vsel %vm1613_vm5, %v3737_v59, %v3734_v63 }
0x469c   :  { %v3739_v62 = vadd.f32 %v3738_v25, %v5800_v0  ;;  %v3740_v33 = vadd.f32 %v3738_v25, %v5802_v49  ;;  %4895 = vtanh.f32 %v3741_v40 }
0x469e   :  { %4897 = vtanh.f32 %v3739_v62 }
0x469f   :  { %4899 = vtanh.f32 %v3740_v33 }
0x46a6   :  { %v4896_v42 = vpop.eup %4895 }
0x46a7   :  { %v3747_v24 = vmul.f32 %v4896_v42, %v5810_v7 }
0x46a8   :  { %v4898_v41 = vpop.eup %4897 }
0x46a9   :  { %v4900_v51 = vpop.eup %4899  ;;  %v3745_v61 = vmul.f32 %v4898_v41, %v5810_v7  ;;  %v3754_v0 = vsel %vm1893_vm8, %v3747_v24, 0.0 }
0x46aa   :  { %v3746_v14 = vmul.f32 %v4900_v51, %v5810_v7 }
0x46ab   :  { %v3748_v43 = vsel %vm381_vm1, %v3745_v61, 0.0 }
0x46ac   :  { %v3751_v12 = vsel %vm381_vm1, %v3746_v14, 0.0  ;;  %3749 = vadd.xlane.f32.xlu0 %v3748_v43 }
0x46ad   :  { %3752 = vadd.xlane.f32.xlu1 %v3751_v12 }
0x46b0   :  { %3755 = vadd.xlane.f32.xlu0 %v3754_v0 }
0x4739   :  { %v3750_v49 = vpop.xlane.xlu0 %3749 }
0x473a   :  { %v3753_v9 = vpop.xlane.xlu1 %3752  ;;  %v3757_v20 = vsub.f32 %v3750_v49, %v5819_v1 }
0x473b   :  { %v3758_v35 = vsub.f32 %v3753_v9, %v5819_v1 }
0x473c   :  { %v3760_v31 = vmul.f32 1.442695, %v3757_v20 }
0x473d   :  { %v3762_v27 = vmul.f32 1.442695, %v3758_v35  ;;  %v3756_v13 = vpop.xlane.xlu0 %3755  ;;  %v3962_v35 = vrot.slane %v6388_v21, 6 }
0x473e   :  { %4901 = vpow2.f32 %v3760_v31  ;;  %v3759_v3 = vsub.f32 %v3756_v13, %v5819_v1 }
0x473f   :  { %4903 = vpow2.f32 %v3762_v27 }
0x4740   :  { %v3764_v7 = vmul.f32 1.442695, %v3759_v3  ;;  %v3956_v3 = vrot.slane %v6052_v10, 4 }
0x4742   :  { %4905 = vpow2.f32 %v3764_v7 }
0x4748   :  { %v4902_v54 = vpop.eup %4901 }
0x4749   :  { %v4904_v38 = vpop.eup %4903  ;;  %v3766_v28 = vmul.f32 %v4902_v54, %v5830_v17 }
0x474a   :  { %v3767_v44 = vmul.f32 %v4904_v38, %v5834_v18 }
0x474c   :  { %v4906_v8 = vpop.eup %4905  ;;  %v3769_v47 = vpack.c.bf16 %v3767_v44, %v3766_v28 }
0x474d   :  { %v3768_v15 = vmul.f32 %v4906_v8, %v5826_v19 }
0x474e   :  { %4532 = vmatpush3.bf16.msra.mxu1 %v3769_v47 }
0x474f   :  { %4533 = vmatprep.subr.bf16.mxu1 %v5038_v11  ;;  %v3770_v46 = vpack.c.bf16 %v3768_v15, %v3768_v15 }
0x4751   :  { %v3772_v23 = vsel %vm1609_vm3, %v3770_v46, 0 }
0x4752   :  { %4534 = vmatpush3.bf16.msra.mxu1 %v3772_v23 }
0x4753   :  { %4553 = vmatprep.subr.bf16.mxu1 %v5038_v11 }
0x4755   :  { %4536 = vmatmul.mubr.msk.bf16.vlgmr.msra.gmra.mrb[88].mxu1 %vm1915_vm9, %v6305_v57 }
0x4756   :  { %4554 = vmatpush3.bf16.msra.mxu1 %v6312_v53  ;;  %4557 = vmatprep.mubr.msk.bf16.mxu1 %vm5039_vm6, %v5038_v11 }
0x4757   :  { %4555 = vmatprep.subr.bf16.mxu1 %v5038_v11  ;;  %v4116_v11 = vld [vmem:[%s6594_s28 + $0xc] sm:$0x3] }
0x475a   :  { %4556 = vmatpush3.bf16.msra.mxu1 %v6321_v37 }
0x4828   :  { %v3808_v1 = vpop.f32.mrb[88].mxu1 }
0x4829   :  { %4907 = vrcp.f32 %v3808_v1  ;;  %v4537_v19 = vpop.f32.mrb[89].mxu1 }
0x482a   :  { %v3811_v17 = vpop.f32.mrb[90].mxu1 }
0x482b   :  { %v4538_v18 = vpop.f32.mrb[91].mxu1 }
0x4833   :  { %v4908_v5 = vpop.eup %4907 }
0x4834   :  { %3817 = vperm.xlu0 %4576, %v4908_v5  }
0x4838   :  { %3882 = vrot.lane.b32.xlu0 %v3728_v26, %s5037_s27 }
0x48b3   :  { %v3818_v57 = vpop.permute.xlu0 %3817 }
0x48b4   :  { %v3820_v53 = vmul.f32 %v3818_v57, %v3808_v1 }
0x48b6   :  { %3822 = vrot.lane.b32.xlu1 %v3820_v53, %s5041_s25 }
0x48b7   :  { %v3883_v62 = vpop.permute.xlu0 %3882 }
0x48ba   :  { %3872 = vrot.lane.b32.xlu1 %v3728_v26, %s5034_s1 }
0x4928   :  { %v3823_v37 = vpop.permute.xlu1 %3822 }
0x4929   :  { %v3825_v45 = vsel %vm137_vm0, %v4116_v11, %v3823_v37 }
0x492a   :  { %v3826_v55 = vpack.c.bf16 %v3825_v45, %v3825_v45 }
0x492c   :  { %4550 = vmatmul.mubr.msk.bf16.vlgmr.msra.gmra.mrb[80].mxu0 %vm2005_vm10, %v3826_v55  ;;  %v3873_v36 = vpop.permute.xlu1 %3872 }
0x49ff   :  { %v3864_v34 = vpop.f32.mrb[80].mxu0 }
0x4a00   :  { %v3870_v6 = vadd.f32 %v6344_v50, %v3864_v34  ;;  %v4551_v48 = vpop.f32.mrb[81].mxu0 }
0x4a01   :  { %v3867_v52 = vpop.f32.mrb[82].mxu0 }
0x4a02   :  { %v3875_v63 = vadd.f32 %v3873_v36, %v3870_v6  ;;  %v4552_v2 = vpop.f32.mrb[83].mxu0 }
0x4a04   :  { %v4120_v58 = vmul.f32 -1.442695, %v3875_v63 }
0x4a06   :  { %4909 = vpow2.f32 %v4120_v58 }
0x4a10   :  { %v4910_v59 = vpop.eup %4909 }
0x4a11   :  { %v3879_v40 = vadd.f32 1.0, %v4910_v59 }
0x4a13   :  { %4911 = vrcp.f32 %v3879_v40 }
0x4a1d   :  { %v4912_v25 = vpop.eup %4911 }
0x4a1e   :  { %v3885_v33 = vmul.f32 %v4912_v25, %v3883_v62  ;;  %v3892_v50 = vsub.f32 1.0, %v4912_v25  ;;  %v3898_v14 = vmul.f32 %v4912_v25, %v6456_v29 }
0x4a20   :  { %3887 = vrot.lane.b32.xlu1 %v3885_v33, %s5036_s5 }
0x4a92   :  { %v3888_v42 = vpop.permute.xlu1 %3887 }
0x4a93   :  { %v3890_v41 = vadd.f32 %v3888_v42, %v3870_v6 }
0x4a95   :  { %4913 = vtanh.f32 %v3890_v41 }
0x4a9f   :  { %v4914_v51 = vpop.eup %4913 }
0x4aa0   :  { %3894 = vrot.lane.b32.xlu0 %v4914_v51, %s5034_s1 }
0x4aa4   :  { %3639 = vrot.lane.b32.xlu0 %v6449_v22, %s5037_s27 }
0x4aa8   :  { %3042 = vrot.lane.b32.xlu0 %v6219_v32, %s5037_s27 }
0x4b12   :  { %v3895_v61 = vpop.permute.xlu0 %3894 }
0x4b13   :  { %v3897_v43 = vmul.f32 %v3895_v61, %v3892_v50 }
0x4b15   :  { %v3899_v24 = vadd.f32 %v3898_v14, %v3897_v43 }
0x4b16   :  { %v3640_v12 = vpop.permute.xlu0 %3639 }
0x4b17   :  { %v3900_v0 = vpack.c.bf16 %v3899_v24, %v3899_v24  ;;  %v3680_v49 = vadd.f32 %v6471_v16, %v3640_v12 }
0x4b19   :  { %3902 = vrot.lane.b32.xlu1 %v3900_v0, %s5034_s1  ;;  %v3685_v9 = vadd.f32 %v6385_v56, %v3680_v49  ;;  %s5042_s1 = smov [#allocation8]  }
0x4b1a   :  { %v3043_v20 = vpop.permute.xlu0 %3042  ;;  %s3983_s5 = sshll.u32 %s5042_s1, 4  ;;  %s3984_s5 = int_to_ptr.vmem [resolvable:$true] %s3983_s5 }
0x4b1b   :  { %v3083_v22 = vadd.f32 %v6276_v39, %v3043_v20  ;;  %v3965_v29 = vrot.slane %v3685_v9, 4  ;;  %v3953_v39 = vrot.slane %v5940_v30, 6  ;;  %p5007_p11 = scmp.lt.s32.totalorder %s3984_s5, %s3984_s5 }
0x4b1d   :  { %v3088_v32 = vadd.f32 %v6385_v56, %v3083_v22  ;;  %2776 = vrot.lane.b32.xlu1 %v6138_v4, %s5037_s27  ;;  %v3970_v4 = vsel %vm1609_vm3, 0.0, %v3953_v39 }
0x4b1e   :  { %v3971_v38 = vsel %vm1611_vm4, %v3970_v4, %v3956_v3 }
0x4b1f   :  { %v3973_v31 = vsel %vm1609_vm3, %v3088_v32, %v3962_v35 }
0x4b20   :  { %v3974_v27 = vsel %vm1611_vm4, %v3973_v31, %v3965_v29 }
0x4b21   :  { %3905 = vrot.lane.b32.xlu1 %v3864_v34, %s5037_s27  ;;  %s5002_s27 = scalar_lea.vmem %s3984_s5, 256 }
0x4b22   :  { %p5003_p10 = scmp.ne.s32.totalorder %s3984_s5, %s5002_s27  ;;  %p5008_p12 = scmp.lt.s32.totalorder %s5002_s27, %s5002_s27 }
0x4b24   :  { %p5009_p13 = por %p5008_p12, %p5007_p11 }
0x4b26   :  { %p5010_p0 = pnand %p5009_p13, %p5003_p10 }
0x4b8b   :  { %v3903_v16 = vpop.permute.xlu1 %3902 }
0x4b8c   :  { %4558 = vmatmul.mubr.msk.bf16.vlgmr.msra.gmra.mrb[92].mxu1 %vm381_vm1, %v3903_v16 }
0x4b8f   :  { %v2777_v13 = vpop.permute.xlu1 %2776 }
0x4b90   :  { %v2817_v21 = vadd.f32 %v6170_v60, %v2777_v13 }
0x4b92   :  { %v2822_v7 = vadd.f32 %v6385_v56, %v2817_v21 }
0x4b93   :  { %v3906_v44 = vpop.permute.xlu1 %3905 }
0x4b94   :  { %v3959_v54 = vrot.slane %v2822_v7, 2 }
0x4b96   :  { %v3972_v28 = vsel %vm1613_vm5, %v3971_v38, %v3959_v54 }
0x4b97   :  { %3976 = vst.msk [vmem:[#allocation8] sm:$0xff] %vm2181_vm15, %v3972_v28 }
0x4c5f   :  { %v3945_v8 = vpop.f32.mrb[92].mxu1 }
0x4c60   :  { %v3946_v47 = vadd.f32 %v3945_v8, %v3906_v44  ;;  %v4559_v15 = vpop.f32.mrb[93].mxu1 }
0x4c61   :  { %v3948_v30 = vpop.f32.mrb[94].mxu1 }
0x4c62   :  { %v3951_v60 = vadd.f32 %v6385_v56, %v3946_v47  ;;  %v4560_v46 = vpop.f32.mrb[95].mxu1 }
0x4c64   :  { %v3968_v10 = vrot.slane %v3951_v60, 2 }
0x4c66   :  { %v3975_v23 = vsel %vm1613_vm5, %v3974_v27, %v3968_v10 }
0x4c67   :  { %3977 = vst.msk [vmem:[#allocation8 + $0x8] sm:$0xff] %vm2181_vm15, %v3975_v23 }
0x4c68   :  { %5013 = shalt.err (!%p5010_p0)
}
0x4c69   :  { %s5014_s26 = scalar_lea.hbm %s6580_s20, 256 }
0x4c6a   :  { %p5015_p1 = scmp.ne.s32.totalorder %s6580_s20, %s5014_s26  ;;  %p5018_p2 = scmp.lt.u32.totalorder %s5014_s26, %s6580_s20 }
0x4c6c   :  { %p5020_p3 = pnand %p5018_p2, %p5015_p1 }
0x4c6e   :  { %5023 = shalt.err (!%p5020_p3)
}
0x4c6f   :  { %s5043_s10 = smov 128   ;;  %s5044_s2 = smov 8  }
0x4c70   :  { %3989 = dma.vmem_to_hbm [thread:$0]  %s3984_s5, 256, %s6580_s20, [#allocation4], %s5043_s10, %s5043_s10, %s5044_s2  }
0x4c71   :  { %5028 = dma.done.wait [#allocation4], 256  }
0x4c72   :  { %5029 = vsyncadd [#allocation4], 4294967040 }
0x4c73   :  { %3993 = vsyncpa [#allocation3], 1 }
0x4c74   :  { %3994 = vsyncpa [#allocation6], 1 }
0x4c75   :  { %3995 = vsyncpa [#allocation4], 1 }

</bundles_post_ra>
